<compile_context>
chip_gen: v7x
topology: tpu7x:2x2x1
jax: 0.10.0
libtpu: 0.0.40
codegen_flags: <defaults>
</compile_context>

<pallas_src>
import functools

import jax
import jax.numpy as jnp
from jax.experimental import pallas as pl
from jax.experimental.pallas import tpu as pltpu

EPS = 1e-5
LANE = 128                      # TPU lane width: channel dims are padded to this
VMEM_LIMIT = 48 * 1024 * 1024   # explicit budget; fits v7x (64 MiB physical VMEM)


def _round_up(x, m):
    return (x + m - 1) // m * m


# ---------------------------------------------------------------------------
# Kernel 1: [optional BN+ReLU of the input tile] -> 3x3 conv (stride 1, halo
# baked into the tile) -> raw conv tile + per-channel sum / sum-sq partials.
# One grid step handles one image and one 128-wide block of output channels.
# ---------------------------------------------------------------------------
def _conv3x3_stats_kernel(x_ref, w_ref, sc_ref, sh_ref, out_ref, stats_ref, *,
                          H, W, prenorm, pad_output, mm_dtype):
    Hp2, Wp2 = H + 2, W + 2
    cin = x_ref.shape[-1]
    cob = out_ref.shape[-1]

    xv = x_ref[0].astype(jnp.float32)                       # (H+2, W+2, Cin)
    if prenorm:
        # Previous stage's BN+ReLU, fused here so the intermediate never makes an
        # extra HBM round trip.  The 1-pixel halo ring must stay exactly zero, so
        # re-mask it after the affine (shift is generally nonzero).
        xv = jnp.maximum(xv * sc_ref[0] + sh_ref[0], 0.0)
        row = jax.lax.broadcasted_iota(jnp.int32, (Hp2, Wp2, 1), 0)
        col = jax.lax.broadcasted_iota(jnp.int32, (Hp2, Wp2, 1), 1)
        interior = (row >= 1) & (row <= H) & (col >= 1) & (col <= W)
        xv = jnp.where(interior, xv, 0.0)
    xmm = xv.astype(mm_dtype)

    # 3x3 conv as 9 MXU matmuls.  Width shift hoisted: 3 strided slices instead of
    # 9; the row (kh) shift is a cheap row-range slice of the flattened slab.
    acc = jnp.zeros((H * W, cob), jnp.float32)
    for kw in range(3):
        slab = xmm[:, kw:kw + W, :].reshape(Hp2 * W, cin)
        for kh in range(3):
            patch = slab[kh * W:(kh + H) * W, :]
            acc = acc + jnp.dot(patch, w_ref[kh * 3 + kw],
                                preferred_element_type=jnp.float32)

    # Per-channel BatchNorm partial statistics (finalized outside; f32 accumulation).
    stats_ref[0, 0:1, :] = jnp.sum(acc, axis=0, keepdims=True)
    stats_ref[0, 1:2, :] = jnp.sum(acc * acc, axis=0, keepdims=True)

    y = acc.reshape(H, W, cob).astype(out_ref.dtype)
    if pad_output:
        # Store with the zero halo ring so the next conv stage reads it directly
        # (no jnp.pad / extra HBM pass over the intermediate).
        out_ref[...] = jnp.zeros_like(out_ref)
        out_ref[0, 1:H + 1, 1:W + 1, :] = y
    else:
        out_ref[0] = y


def _conv3x3_stats(xp, w9, scale_in, shift_in, *, prenorm, pad_output,
                   mm_dtype, out_dtype):
    """xp: (N, H+2, W+2, Cin) zero-halo NHWC; w9: (9, Cin, Coutp) lane-padded.
    Returns (conv_out, stats) with stats[n] = [sum, sum_sq] per output channel."""
    # TODO(synk): for very large spatial extents (>~100x100) add H-row halo tiling;
    # all ResNet BasicBlock shapes fit comfortably with full-spatial blocks.
    N, Hp2, Wp2, cin = xp.shape
    H, W = Hp2 - 2, Wp2 - 2
    coutp = w9.shape[-1]
    cob = LANE                                  # 128-wide lane-dense Cout blocks
    n_co = coutp // cob
    oh, ow = (Hp2, Wp2) if pad_output else (H, W)

    kernel = functools.partial(_conv3x3_stats_kernel, H=H, W=W, prenorm=prenorm,
                               pad_output=pad_output, mm_dtype=mm_dtype)
    return pl.pallas_call(
        kernel,
        grid=(N, n_co),
        out_shape=(jax.ShapeDtypeStruct((N, oh, ow, coutp), out_dtype),
                   jax.ShapeDtypeStruct((N, 2, coutp), jnp.float32)),
        in_specs=[
            pl.BlockSpec((1, Hp2, Wp2, cin), lambda n, c: (n, 0, 0, 0)),
            pl.BlockSpec((9, cin, cob), lambda n, c: (0, 0, c)),
            pl.BlockSpec((1, cin), lambda n, c: (0, 0)),
            pl.BlockSpec((1, cin), lambda n, c: (0, 0)),
        ],
        out_specs=(
            pl.BlockSpec((1, oh, ow, cob), lambda n, c: (n, 0, 0, c)),
            pl.BlockSpec((1, 2, cob), lambda n, c: (n, 0, c)),
        ),
        compiler_params=pltpu.CompilerParams(
            dimension_semantics=("parallel", "parallel"),
            vmem_limit_bytes=VMEM_LIMIT),
    )(xp, w9, scale_in, shift_in)


# ---------------------------------------------------------------------------
# Kernel 2: tiled elementwise y = x*scale + shift (+ optional relu)  -- used to
# apply the final (bn2) normalization once its global stats are known.
# ---------------------------------------------------------------------------
def _affine_kernel(x_ref, sc_ref, sh_ref, o_ref, *, relu):
    y = x_ref[...].astype(jnp.float32) * sc_ref[0] + sh_ref[0]
    if relu:
        y = jnp.maximum(y, 0.0)
    o_ref[...] = y.astype(o_ref.dtype)


def _affine(x, scale, shift, *, relu=False):
    N, H, W, C = x.shape
    cob = LANE
    n_co = C // cob
    return pl.pallas_call(
        functools.partial(_affine_kernel, relu=relu),
        grid=(N, n_co),
        out_shape=jax.ShapeDtypeStruct((N, H, W, C), jnp.float32),
        in_specs=[
            pl.BlockSpec((1, H, W, cob), lambda n, c: (n, 0, 0, c)),
            pl.BlockSpec((1, cob), lambda n, c: (0, c)),
            pl.BlockSpec((1, cob), lambda n, c: (0, c)),
        ],
        out_specs=pl.BlockSpec((1, H, W, cob), lambda n, c: (n, 0, 0, c)),
        compiler_params=pltpu.CompilerParams(
            dimension_semantics=("parallel", "parallel"),
            vmem_limit_bytes=VMEM_LIMIT),
    )(x, scale, shift)


# ---------------------------------------------------------------------------
# Host-side helpers (tiny per-channel math / layout padding; fused by XLA).
# ---------------------------------------------------------------------------
def _bn_scale_shift(stats, gamma, beta, count):
    """Fold batch stats + (gamma, beta) into per-channel (scale, shift):
    x*scale + shift == (x - mean) * rsqrt(var + eps) * gamma + beta."""
    s = jnp.sum(stats[:, 0, :], axis=0)
    ss = jnp.sum(stats[:, 1, :], axis=0)
    mean = s / count
    var = jnp.maximum(ss / count - mean * mean, 0.0)   # biased var, f32 accumulation
    scale = gamma * jax.lax.rsqrt(var + EPS)
    shift = beta - mean * scale
    return scale.reshape(1, -1), shift.reshape(1, -1)


def _pad_weight(w, cinp, coutp, dtype):
    ci, co = w.shape[2], w.shape[3]
    w = jnp.pad(w, ((0, 0), (0, 0), (0, cinp - ci), (0, coutp - co)))
    return w.reshape(9, cinp, coutp).astype(dtype)


def _pad_vec(v, n):
    return jnp.pad(v.astype(jnp.float32), (0, n - v.shape[0]))


def basic_block_forward(x_nchw, params, *, compute_dtype=jnp.float32):
    """Pallas implementation of BasicBlock.forward (NCHW in / NCHW out).
    compute_dtype=jnp.bfloat16 selects the native MXU matmul/storage dtype
    (BN statistics and accumulation stay in f32)."""
    # TODO(synk): stride>1 / downsample path not implemented (module default stride=1).
    N, cin, H, W = x_nchw.shape
    cout = params["w1"].shape[-1]
    cinp, coutp = _round_up(cin, LANE), _round_up(cout, LANE)

    # Single fused layout transform: NCHW -> NHWC, 1-pixel halo, lane pad, cast.
    x = jnp.transpose(x_nchw, (0, 2, 3, 1))
    xp = jnp.pad(x, ((0, 0), (1, 1), (1, 1), (0, cinp - cin))).astype(compute_dtype)

    w1 = _pad_weight(params["w1"], cinp, coutp, compute_dtype)
    w2 = _pad_weight(params["w2"], coutp, coutp, compute_dtype)
    g1, b1 = _pad_vec(params["g1"], coutp), _pad_vec(params["b1"], coutp)
    g2, b2 = _pad_vec(params["g2"], coutp), _pad_vec(params["b2"], coutp)

    one = jnp.ones((1, cinp), jnp.float32)
    zero = jnp.zeros((1, cinp), jnp.float32)
    count = N * H * W

    # Stage 1: conv1 + BN1 partial stats; output keeps its zero halo ring.
    c1p, st1 = _conv3x3_stats(xp, w1, one, zero, prenorm=False, pad_output=True,
                              mm_dtype=compute_dtype, out_dtype=compute_dtype)
    sc1, sh1 = _bn_scale_shift(st1, g1, b1, count)

    # Stage 2: relu(bn1(.)) fused onto conv2's input tile; conv2 + BN2 partial stats.
    c2, st2 = _conv3x3_stats(c1p, w2, sc1, sh1, prenorm=True, pad_output=False,
                             mm_dtype=compute_dtype, out_dtype=compute_dtype)
    sc2, sh2 = _bn_scale_shift(st2, g2, b2, count)

    # Final BN2 normalization (elementwise Pallas pass), then back to NCHW.
    y = _affine(c2, sc2, sh2, relu=False)
    return jnp.transpose(y[..., :cout], (0, 3, 1, 2))


# ---------------------------------------------------------------------------
# Pure-JAX reference matching PyTorch semantics (for verification) + test.
# ---------------------------------------------------------------------------
def basic_block_reference(x_nchw, params):
    def conv(x, w_hwio):
        w_oihw = jnp.transpose(w_hwio, (3, 2, 0, 1))
        return jax.lax.conv_general_dilated(
            x, w_oihw, window_strides=(1, 1), padding=((1, 1), (1, 1)),
            dimension_numbers=("NCHW", "OIHW", "NCHW"))

    def bn(x, g, b):
        mean = x.mean(axis=(0, 2, 3), keepdims=True)
        var = ((x - mean) ** 2).mean(axis=(0, 2, 3), keepdims=True)
        return ((x - mean) * jax.lax.rsqrt(var + EPS)
                * g.reshape(1, -1, 1, 1) + b.reshape(1, -1, 1, 1))

    y = jnp.maximum(bn(conv(x_nchw, params["w1"]), params["g1"], params["b1"]), 0.0)
    return bn(conv(y, params["w2"]), params["g2"], params["b2"])


def init_params(key, inplanes, planes):
    k1, k2 = jax.random.split(key)
    s1 = 1.0 / (3 * 3 * inplanes) ** 0.5
    s2 = 1.0 / (3 * 3 * planes) ** 0.5
    return {
        "w1": jax.random.normal(k1, (3, 3, inplanes, planes), jnp.float32) * s1,
        "g1": jnp.ones((planes,), jnp.float32),
        "b1": jnp.zeros((planes,), jnp.float32),
        "w2": jax.random.normal(k2, (3, 3, planes, planes), jnp.float32) * s2,
        "g2": jnp.ones((planes,), jnp.float32),
        "b2": jnp.zeros((planes,), jnp.float32),
    }


if __name__ == "__main__":
    key = jax.random.PRNGKey(0)
    kx, kp = jax.random.split(key)

    N, inplanes, planes, HW = 2, 4, 8, 16
    x = jax.random.normal(kx, (N, inplanes, HW, HW), jnp.float32)   # NCHW, like PyTorch
    params = init_params(kp, inplanes, planes)

    ref = jax.block_until_ready(basic_block_reference(x, params))

    # Exact-semantics path (f32 matmuls): tight check against the reference.
    fwd_f32 = jax.jit(functools.partial(basic_block_forward,
                                        compute_dtype=jnp.float32))
    out = jax.block_until_ready(fwd_f32(x, params))
    assert out.shape == (N, planes, HW, HW), out.shape
    assert jnp.allclose(out, ref, atol=1e-4, rtol=1e-4), \
        float(jnp.max(jnp.abs(out - ref)))

    # Native-MXU bf16 path (perf-review suggestion): loose sanity check.
    fwd_bf16 = jax.jit(functools.partial(basic_block_forward,
                                         compute_dtype=jnp.bfloat16))
    out_bf16 = jax.block_until_ready(fwd_bf16(x, params))
    assert float(jnp.max(jnp.abs(out_bf16 - ref))) < 0.2, \
        float(jnp.max(jnp.abs(out_bf16 - ref)))

    print("KERNEL_OK")
</pallas_src>

<mosaic_0001>
module attributes {stable_mosaic.version = 11 : i64} {
  func.func @_conv3x3_stats_kernel(%arg0: i32, %arg1: i32, %arg2: memref<1x18x18x128xf32, #tpu.memory_space<vmem>>, %arg3: memref<9x128x128xf32, #tpu.memory_space<vmem>>, %arg4: memref<1x128xf32, #tpu.memory_space<vmem>>, %arg5: memref<1x128xf32, #tpu.memory_space<vmem>>, %arg6: memref<1x18x18x128xf32, #tpu.memory_space<vmem>>, %arg7: memref<1x2x128xf32, #tpu.memory_space<vmem>>) attributes {dimension_semantics = [#tpu.dimension_semantics<parallel>, #tpu.dimension_semantics<parallel>], iteration_bounds = array<i64: 2, 1>, scalar_prefetch = 0 : i64, scratch_operands = 0 : i64, tpu.core_type = #tpu.core_type<tc>, window_params = [{transform_indices = @transform_0, window_bounds = array<i64: 1, 18, 18, 128>}, {transform_indices = @transform_1, window_bounds = array<i64: 9, 128, 128>}, {pipeline_mode = #tpu.pipeline_mode<synchronous>, transform_indices = @transform_2, window_bounds = array<i64: 1, 128>}, {pipeline_mode = #tpu.pipeline_mode<synchronous>, transform_indices = @transform_3, window_bounds = array<i64: 1, 128>}, {transform_indices = @transform_4, window_bounds = array<i64: 1, 18, 18, 128>}, {transform_indices = @transform_5, window_bounds = array<i64: 1, 2, 128>}]} {
    %c0 = arith.constant 0 : index
    %c0_0 = arith.constant 0 : index
    %c0_1 = arith.constant 0 : index
    %c0_2 = arith.constant 0 : index
    %0 = vector.load %arg2[%c0, %c0_0, %c0_1, %c0_2] : memref<1x18x18x128xf32, #tpu.memory_space<vmem>>, vector<1x18x18x128xf32>
    %1 = vector.shape_cast %0 : vector<1x18x18x128xf32> to vector<18x18x128xf32>
    %cst = arith.constant 0.000000e+00 : f32
    %2 = vector.broadcast %cst : f32 to vector<256x128xf32>
    %3 = vector.extract_strided_slice %1 {offsets = [0, 0, 0], sizes = [18, 16, 128], strides = [1, 1, 1]} : vector<18x18x128xf32> to vector<18x16x128xf32>
    %4 = vector.shape_cast %3 : vector<18x16x128xf32> to vector<288x128xf32>
    %5 = vector.extract_strided_slice %4 {offsets = [0, 0], sizes = [256, 128], strides = [1, 1]} : vector<288x128xf32> to vector<256x128xf32>
    %c0_3 = arith.constant 0 : index
    %c0_4 = arith.constant 0 : index
    %c0_5 = arith.constant 0 : index
    %6 = vector.load %arg3[%c0_3, %c0_4, %c0_5] : memref<9x128x128xf32, #tpu.memory_space<vmem>>, vector<1x128x128xf32>
    %7 = vector.shape_cast %6 : vector<1x128x128xf32> to vector<128x128xf32>
    %cst_6 = arith.constant dense<0.000000e+00> : vector<256x128xf32>
    %8 = tpu.matmul %5, %7, %cst_6 {dimension_numbers = #tpu.dot_dimension_numbers<[1], [0], [0], [1], [0, 0, 1, 1], [], []>} : vector<256x128xf32>, vector<128x128xf32>, vector<256x128xf32> -> vector<256x128xf32>
    %9 = arith.addf %2, %8 : vector<256x128xf32>
    %10 = vector.extract_strided_slice %4 {offsets = [16, 0], sizes = [256, 128], strides = [1, 1]} : vector<288x128xf32> to vector<256x128xf32>
    %c3 = arith.constant 3 : index
    %c0_7 = arith.constant 0 : index
    %c0_8 = arith.constant 0 : index
    %11 = vector.load %arg3[%c3, %c0_7, %c0_8] : memref<9x128x128xf32, #tpu.memory_space<vmem>>, vector<1x128x128xf32>
    %12 = vector.shape_cast %11 : vector<1x128x128xf32> to vector<128x128xf32>
    %cst_9 = arith.constant dense<0.000000e+00> : vector<256x128xf32>
    %13 = tpu.matmul %10, %12, %cst_9 {dimension_numbers = #tpu.dot_dimension_numbers<[1], [0], [0], [1], [0, 0, 1, 1], [], []>} : vector<256x128xf32>, vector<128x128xf32>, vector<256x128xf32> -> vector<256x128xf32>
    %14 = arith.addf %9, %13 : vector<256x128xf32>
    %15 = vector.extract_strided_slice %4 {offsets = [32, 0], sizes = [256, 128], strides = [1, 1]} : vector<288x128xf32> to vector<256x128xf32>
    %c6 = arith.constant 6 : index
    %c0_10 = arith.constant 0 : index
    %c0_11 = arith.constant 0 : index
    %16 = vector.load %arg3[%c6, %c0_10, %c0_11] : memref<9x128x128xf32, #tpu.memory_space<vmem>>, vector<1x128x128xf32>
    %17 = vector.shape_cast %16 : vector<1x128x128xf32> to vector<128x128xf32>
    %cst_12 = arith.constant dense<0.000000e+00> : vector<256x128xf32>
    %18 = tpu.matmul %15, %17, %cst_12 {dimension_numbers = #tpu.dot_dimension_numbers<[1], [0], [0], [1], [0, 0, 1, 1], [], []>} : vector<256x128xf32>, vector<128x128xf32>, vector<256x128xf32> -> vector<256x128xf32>
    %19 = arith.addf %14, %18 : vector<256x128xf32>
    %20 = vector.extract_strided_slice %1 {offsets = [0, 1, 0], sizes = [18, 16, 128], strides = [1, 1, 1]} : vector<18x18x128xf32> to vector<18x16x128xf32>
    %21 = vector.shape_cast %20 : vector<18x16x128xf32> to vector<288x128xf32>
    %22 = vector.extract_strided_slice %21 {offsets = [0, 0], sizes = [256, 128], strides = [1, 1]} : vector<288x128xf32> to vector<256x128xf32>
    %c1 = arith.constant 1 : index
    %c0_13 = arith.constant 0 : index
    %c0_14 = arith.constant 0 : index
    %23 = vector.load %arg3[%c1, %c0_13, %c0_14] : memref<9x128x128xf32, #tpu.memory_space<vmem>>, vector<1x128x128xf32>
    %24 = vector.shape_cast %23 : vector<1x128x128xf32> to vector<128x128xf32>
    %cst_15 = arith.constant dense<0.000000e+00> : vector<256x128xf32>
    %25 = tpu.matmul %22, %24, %cst_15 {dimension_numbers = #tpu.dot_dimension_numbers<[1], [0], [0], [1], [0, 0, 1, 1], [], []>} : vector<256x128xf32>, vector<128x128xf32>, vector<256x128xf32> -> vector<256x128xf32>
    %26 = arith.addf %19, %25 : vector<256x128xf32>
    %27 = vector.extract_strided_slice %21 {offsets = [16, 0], sizes = [256, 128], strides = [1, 1]} : vector<288x128xf32> to vector<256x128xf32>
    %c4 = arith.constant 4 : index
    %c0_16 = arith.constant 0 : index
    %c0_17 = arith.constant 0 : index
    %28 = vector.load %arg3[%c4, %c0_16, %c0_17] : memref<9x128x128xf32, #tpu.memory_space<vmem>>, vector<1x128x128xf32>
    %29 = vector.shape_cast %28 : vector<1x128x128xf32> to vector<128x128xf32>
    %cst_18 = arith.constant dense<0.000000e+00> : vector<256x128xf32>
    %30 = tpu.matmul %27, %29, %cst_18 {dimension_numbers = #tpu.dot_dimension_numbers<[1], [0], [0], [1], [0, 0, 1, 1], [], []>} : vector<256x128xf32>, vector<128x128xf32>, vector<256x128xf32> -> vector<256x128xf32>
    %31 = arith.addf %26, %30 : vector<256x128xf32>
    %32 = vector.extract_strided_slice %21 {offsets = [32, 0], sizes = [256, 128], strides = [1, 1]} : vector<288x128xf32> to vector<256x128xf32>
    %c7 = arith.constant 7 : index
    %c0_19 = arith.constant 0 : index
    %c0_20 = arith.constant 0 : index
    %33 = vector.load %arg3[%c7, %c0_19, %c0_20] : memref<9x128x128xf32, #tpu.memory_space<vmem>>, vector<1x128x128xf32>
    %34 = vector.shape_cast %33 : vector<1x128x128xf32> to vector<128x128xf32>
    %cst_21 = arith.constant dense<0.000000e+00> : vector<256x128xf32>
    %35 = tpu.matmul %32, %34, %cst_21 {dimension_numbers = #tpu.dot_dimension_numbers<[1], [0], [0], [1], [0, 0, 1, 1], [], []>} : vector<256x128xf32>, vector<128x128xf32>, vector<256x128xf32> -> vector<256x128xf32>
    %36 = arith.addf %31, %35 : vector<256x128xf32>
    %37 = vector.extract_strided_slice %1 {offsets = [0, 2, 0], sizes = [18, 16, 128], strides = [1, 1, 1]} : vector<18x18x128xf32> to vector<18x16x128xf32>
    %38 = vector.shape_cast %37 : vector<18x16x128xf32> to vector<288x128xf32>
    %39 = vector.extract_strided_slice %38 {offsets = [0, 0], sizes = [256, 128], strides = [1, 1]} : vector<288x128xf32> to vector<256x128xf32>
    %c2 = arith.constant 2 : index
    %c0_22 = arith.constant 0 : index
    %c0_23 = arith.constant 0 : index
    %40 = vector.load %arg3[%c2, %c0_22, %c0_23] : memref<9x128x128xf32, #tpu.memory_space<vmem>>, vector<1x128x128xf32>
    %41 = vector.shape_cast %40 : vector<1x128x128xf32> to vector<128x128xf32>
    %cst_24 = arith.constant dense<0.000000e+00> : vector<256x128xf32>
    %42 = tpu.matmul %39, %41, %cst_24 {dimension_numbers = #tpu.dot_dimension_numbers<[1], [0], [0], [1], [0, 0, 1, 1], [], []>} : vector<256x128xf32>, vector<128x128xf32>, vector<256x128xf32> -> vector<256x128xf32>
    %43 = arith.addf %36, %42 : vector<256x128xf32>
    %44 = vector.extract_strided_slice %38 {offsets = [16, 0], sizes = [256, 128], strides = [1, 1]} : vector<288x128xf32> to vector<256x128xf32>
    %c5 = arith.constant 5 : index
    %c0_25 = arith.constant 0 : index
    %c0_26 = arith.constant 0 : index
    %45 = vector.load %arg3[%c5, %c0_25, %c0_26] : memref<9x128x128xf32, #tpu.memory_space<vmem>>, vector<1x128x128xf32>
    %46 = vector.shape_cast %45 : vector<1x128x128xf32> to vector<128x128xf32>
    %cst_27 = arith.constant dense<0.000000e+00> : vector<256x128xf32>
    %47 = tpu.matmul %44, %46, %cst_27 {dimension_numbers = #tpu.dot_dimension_numbers<[1], [0], [0], [1], [0, 0, 1, 1], [], []>} : vector<256x128xf32>, vector<128x128xf32>, vector<256x128xf32> -> vector<256x128xf32>
    %48 = arith.addf %43, %47 : vector<256x128xf32>
    %49 = vector.extract_strided_slice %38 {offsets = [32, 0], sizes = [256, 128], strides = [1, 1]} : vector<288x128xf32> to vector<256x128xf32>
    %c8 = arith.constant 8 : index
    %c0_28 = arith.constant 0 : index
    %c0_29 = arith.constant 0 : index
    %50 = vector.load %arg3[%c8, %c0_28, %c0_29] : memref<9x128x128xf32, #tpu.memory_space<vmem>>, vector<1x128x128xf32>
    %51 = vector.shape_cast %50 : vector<1x128x128xf32> to vector<128x128xf32>
    %cst_30 = arith.constant dense<0.000000e+00> : vector<256x128xf32>
    %52 = tpu.matmul %49, %51, %cst_30 {dimension_numbers = #tpu.dot_dimension_numbers<[1], [0], [0], [1], [0, 0, 1, 1], [], []>} : vector<256x128xf32>, vector<128x128xf32>, vector<256x128xf32> -> vector<256x128xf32>
    %53 = arith.addf %48, %52 : vector<256x128xf32>
    %cst_31 = arith.constant dense<0.000000e+00> : vector<128xf32>
    %54 = vector.multi_reduction <add>, %53, %cst_31 [0] : vector<256x128xf32> to vector<128xf32>
    %55 = vector.shape_cast %54 : vector<128xf32> to vector<1x128xf32>
    %c0_32 = arith.constant 0 : index
    %c0_33 = arith.constant 0 : index
    %c0_34 = arith.constant 0 : index
    %56 = vector.load %arg7[%c0_32, %c0_33, %c0_34] : memref<1x2x128xf32, #tpu.memory_space<vmem>>, vector<1x1x128xf32>
    %57 = vector.shape_cast %56 : vector<1x1x128xf32> to vector<1x128xf32>
    %58 = vector.shape_cast %55 : vector<1x128xf32> to vector<1x1x128xf32>
    tpu.vector_store %arg7[%c0_32, %c0_33, %c0_34], %58 {strides = array<i32>} : memref<1x2x128xf32, #tpu.memory_space<vmem>>, vector<1x1x128xf32>,
    %59 = arith.mulf %53, %53 : vector<256x128xf32>
    %cst_35 = arith.constant dense<0.000000e+00> : vector<128xf32>
    %60 = vector.multi_reduction <add>, %59, %cst_35 [0] : vector<256x128xf32> to vector<128xf32>
    %61 = vector.shape_cast %60 : vector<128xf32> to vector<1x128xf32>
    %c0_36 = arith.constant 0 : index
    %c1_37 = arith.constant 1 : index
    %c0_38 = arith.constant 0 : index
    %62 = vector.load %arg7[%c0_36, %c1_37, %c0_38] : memref<1x2x128xf32, #tpu.memory_space<vmem>>, vector<1x1x128xf32>
    %63 = vector.shape_cast %62 : vector<1x1x128xf32> to vector<1x128xf32>
    %64 = vector.shape_cast %61 : vector<1x128xf32> to vector<1x1x128xf32>
    tpu.vector_store %arg7[%c0_36, %c1_37, %c0_38], %64 {strides = array<i32>} : memref<1x2x128xf32, #tpu.memory_space<vmem>>, vector<1x1x128xf32>,
    %65 = vector.shape_cast %53 : vector<256x128xf32> to vector<16x16x128xf32>
    %cst_39 = arith.constant 0.000000e+00 : f32
    %66 = vector.broadcast %cst_39 : f32 to vector<1x18x18x128xf32>
    %c0_40 = arith.constant 0 : index
    %c0_41 = arith.constant 0 : index
    %c0_42 = arith.constant 0 : index
    %c0_43 = arith.constant 0 : index
    %67 = vector.load %arg6[%c0_40, %c0_41, %c0_42, %c0_43] : memref<1x18x18x128xf32, #tpu.memory_space<vmem>>, vector<1x18x18x128xf32>
    tpu.vector_store %arg6[%c0_40, %c0_41, %c0_42, %c0_43], %66 {strides = array<i32>} : memref<1x18x18x128xf32, #tpu.memory_space<vmem>>, vector<1x18x18x128xf32>,
    %c0_44 = arith.constant 0 : index
    %c1_45 = arith.constant 1 : index
    %c1_46 = arith.constant 1 : index
    %c0_47 = arith.constant 0 : index
    %68 = vector.load %arg6[%c0_44, %c1_45, %c1_46, %c0_47] : memref<1x18x18x128xf32, #tpu.memory_space<vmem>>, vector<1x16x16x128xf32>
    %69 = vector.shape_cast %68 : vector<1x16x16x128xf32> to vector<16x16x128xf32>
    %70 = vector.shape_cast %65 : vector<16x16x128xf32> to vector<1x16x16x128xf32>
    tpu.vector_store %arg6[%c0_44, %c1_45, %c1_46, %c0_47], %70 {strides = array<i32>} : memref<1x18x18x128xf32, #tpu.memory_space<vmem>>, vector<1x16x16x128xf32>,
    return
  }
  func.func @transform_0(%arg0: i32, %arg1: i32) -> (i32, i32, i32, i32) {
    %c0_i32 = arith.constant 0 : i32
    %c0_i32_0 = arith.constant 0 : i32
    %c0_i32_1 = arith.constant 0 : i32
    %c0_i32_2 = arith.constant 0 : i32
    return %arg0, %c0_i32, %c0_i32_0, %c0_i32_1 : i32, i32, i32, i32
  }
  func.func @transform_1(%arg0: i32, %arg1: i32) -> (i32, i32, i32) {
    %c0_i32 = arith.constant 0 : i32
    %c0_i32_0 = arith.constant 0 : i32
    %c0_i32_1 = arith.constant 0 : i32
    return %c0_i32, %c0_i32_0, %arg1 : i32, i32, i32
  }
  func.func @transform_2(%arg0: i32, %arg1: i32) -> (i32, i32) {
    %c0_i32 = arith.constant 0 : i32
    %c0_i32_0 = arith.constant 0 : i32
    %c0_i32_1 = arith.constant 0 : i32
    return %c0_i32, %c0_i32_0 : i32, i32
  }
  func.func @transform_3(%arg0: i32, %arg1: i32) -> (i32, i32) {
    %c0_i32 = arith.constant 0 : i32
    %c0_i32_0 = arith.constant 0 : i32
    %c0_i32_1 = arith.constant 0 : i32
    return %c0_i32, %c0_i32_0 : i32, i32
  }
  func.func @transform_4(%arg0: i32, %arg1: i32) -> (i32, i32, i32, i32) {
    %c0_i32 = arith.constant 0 : i32
    %c0_i32_0 = arith.constant 0 : i32
    %c0_i32_1 = arith.constant 0 : i32
    return %arg0, %c0_i32, %c0_i32_0, %arg1 : i32, i32, i32, i32
  }
  func.func @transform_5(%arg0: i32, %arg1: i32) -> (i32, i32, i32) {
    %c0_i32 = arith.constant 0 : i32
    %c0_i32_0 = arith.constant 0 : i32
    return %arg0, %c0_i32, %arg1 : i32, i32, i32
  }
}

module attributes {stable_mosaic.version = 11 : i64} {
  func.func @_conv3x3_stats_kernel(%arg0: i32, %arg1: i32, %arg2: memref<1x18x18x128xf32, #tpu.memory_space<vmem>>, %arg3: memref<9x128x128xf32, #tpu.memory_space<vmem>>, %arg4: memref<1x128xf32, #tpu.memory_space<vmem>>, %arg5: memref<1x128xf32, #tpu.memory_space<vmem>>, %arg6: memref<1x16x16x128xf32, #tpu.memory_space<vmem>>, %arg7: memref<1x2x128xf32, #tpu.memory_space<vmem>>) attributes {dimension_semantics = [#tpu.dimension_semantics<parallel>, #tpu.dimension_semantics<parallel>], iteration_bounds = array<i64: 2, 1>, scalar_prefetch = 0 : i64, scratch_operands = 0 : i64, tpu.core_type = #tpu.core_type<tc>, window_params = [{transform_indices = @transform_0, window_bounds = array<i64: 1, 18, 18, 128>}, {transform_indices = @transform_1, window_bounds = array<i64: 9, 128, 128>}, {pipeline_mode = #tpu.pipeline_mode<synchronous>, transform_indices = @transform_2, window_bounds = array<i64: 1, 128>}, {pipeline_mode = #tpu.pipeline_mode<synchronous>, transform_indices = @transform_3, window_bounds = array<i64: 1, 128>}, {transform_indices = @transform_4, window_bounds = array<i64: 1, 16, 16, 128>}, {transform_indices = @transform_5, window_bounds = array<i64: 1, 2, 128>}]} {
    %c0 = arith.constant 0 : index
    %c0_0 = arith.constant 0 : index
    %c0_1 = arith.constant 0 : index
    %c0_2 = arith.constant 0 : index
    %0 = vector.load %arg2[%c0, %c0_0, %c0_1, %c0_2] : memref<1x18x18x128xf32, #tpu.memory_space<vmem>>, vector<1x18x18x128xf32>
    %1 = vector.shape_cast %0 : vector<1x18x18x128xf32> to vector<18x18x128xf32>
    %c0_3 = arith.constant 0 : index
    %c0_4 = arith.constant 0 : index
    %2 = vector.load %arg4[%c0_3, %c0_4] : memref<1x128xf32, #tpu.memory_space<vmem>>, vector<1x128xf32>
    %3 = vector.shape_cast %2 : vector<1x128xf32> to vector<128xf32>
    %4 = vector.shape_cast %3 : vector<128xf32> to vector<1x1x128xf32>
    %5 = vector.broadcast %4 : vector<1x1x128xf32> to vector<18x18x128xf32>
    %6 = arith.mulf %1, %5 : vector<18x18x128xf32>
    %c0_5 = arith.constant 0 : index
    %c0_6 = arith.constant 0 : index
    %7 = vector.load %arg5[%c0_5, %c0_6] : memref<1x128xf32, #tpu.memory_space<vmem>>, vector<1x128xf32>
    %8 = vector.shape_cast %7 : vector<1x128xf32> to vector<128xf32>
    %9 = vector.shape_cast %8 : vector<128xf32> to vector<1x1x128xf32>
    %10 = vector.broadcast %9 : vector<1x1x128xf32> to vector<18x18x128xf32>
    %11 = arith.addf %6, %10 : vector<18x18x128xf32>
    %cst = arith.constant 0.000000e+00 : f32
    %12 = vector.broadcast %cst : f32 to vector<18x18x128xf32>
    %13 = arith.maximumf %11, %12 : vector<18x18x128xf32>
    %14 = tpu.iota {dimensions = array<i32: 0>} : vector<18x18x1xi32>
    %15 = tpu.iota {dimensions = array<i32: 1>} : vector<18x18x1xi32>
    %c1_i32 = arith.constant 1 : i32
    %16 = vector.broadcast %c1_i32 : i32 to vector<18x18x1xi32>
    %17 = arith.cmpi sge, %14, %16 : vector<18x18x1xi32>
    %c16_i32 = arith.constant 16 : i32
    %18 = vector.broadcast %c16_i32 : i32 to vector<18x18x1xi32>
    %19 = arith.cmpi sle, %14, %18 : vector<18x18x1xi32>
    %20 = arith.andi %17, %19 : vector<18x18x1xi1>
    %c1_i32_7 = arith.constant 1 : i32
    %21 = vector.broadcast %c1_i32_7 : i32 to vector<18x18x1xi32>
    %22 = arith.cmpi sge, %15, %21 : vector<18x18x1xi32>
    %23 = arith.andi %20, %22 : vector<18x18x1xi1>
    %c16_i32_8 = arith.constant 16 : i32
    %24 = vector.broadcast %c16_i32_8 : i32 to vector<18x18x1xi32>
    %25 = arith.cmpi sle, %15, %24 : vector<18x18x1xi32>
    %26 = arith.andi %23, %25 : vector<18x18x1xi1>
    %cst_9 = arith.constant 0.000000e+00 : f32
    %27 = vector.shape_cast %26 : vector<18x18x1xi1> to vector<18x18x1xi1>
    %28 = vector.broadcast %27 : vector<18x18x1xi1> to vector<18x18x128xi1>
    %29 = vector.broadcast %cst_9 : f32 to vector<18x18x128xf32>
    %30 = arith.select %28, %13, %29 : vector<18x18x128xi1>, vector<18x18x128xf32>
    %cst_10 = arith.constant 0.000000e+00 : f32
    %31 = vector.broadcast %cst_10 : f32 to vector<256x128xf32>
    %32 = vector.extract_strided_slice %30 {offsets = [0, 0, 0], sizes = [18, 16, 128], strides = [1, 1, 1]} : vector<18x18x128xf32> to vector<18x16x128xf32>
    %33 = vector.shape_cast %32 : vector<18x16x128xf32> to vector<288x128xf32>
    %34 = vector.extract_strided_slice %33 {offsets = [0, 0], sizes = [256, 128], strides = [1, 1]} : vector<288x128xf32> to vector<256x128xf32>
    %c0_11 = arith.constant 0 : index
    %c0_12 = arith.constant 0 : index
    %c0_13 = arith.constant 0 : index
    %35 = vector.load %arg3[%c0_11, %c0_12, %c0_13] : memref<9x128x128xf32, #tpu.memory_space<vmem>>, vector<1x128x128xf32>
    %36 = vector.shape_cast %35 : vector<1x128x128xf32> to vector<128x128xf32>
    %cst_14 = arith.constant dense<0.000000e+00> : vector<256x128xf32>
    %37 = tpu.matmul %34, %36, %cst_14 {dimension_numbers = #tpu.dot_dimension_numbers<[1], [0], [0], [1], [0, 0, 1, 1], [], []>} : vector<256x128xf32>, vector<128x128xf32>, vector<256x128xf32> -> vector<256x128xf32>
    %38 = arith.addf %31, %37 : vector<256x128xf32>
    %39 = vector.extract_strided_slice %33 {offsets = [16, 0], sizes = [256, 128], strides = [1, 1]} : vector<288x128xf32> to vector<256x128xf32>
    %c3 = arith.constant 3 : index
    %c0_15 = arith.constant 0 : index
    %c0_16 = arith.constant 0 : index
    %40 = vector.load %arg3[%c3, %c0_15, %c0_16] : memref<9x128x128xf32, #tpu.memory_space<vmem>>, vector<1x128x128xf32>
    %41 = vector.shape_cast %40 : vector<1x128x128xf32> to vector<128x128xf32>
    %cst_17 = arith.constant dense<0.000000e+00> : vector<256x128xf32>
    %42 = tpu.matmul %39, %41, %cst_17 {dimension_numbers = #tpu.dot_dimension_numbers<[1], [0], [0], [1], [0, 0, 1, 1], [], []>} : vector<256x128xf32>, vector<128x128xf32>, vector<256x128xf32> -> vector<256x128xf32>
    %43 = arith.addf %38, %42 : vector<256x128xf32>
    %44 = vector.extract_strided_slice %33 {offsets = [32, 0], sizes = [256, 128], strides = [1, 1]} : vector<288x128xf32> to vector<256x128xf32>
    %c6 = arith.constant 6 : index
    %c0_18 = arith.constant 0 : index
    %c0_19 = arith.constant 0 : index
    %45 = vector.load %arg3[%c6, %c0_18, %c0_19] : memref<9x128x128xf32, #tpu.memory_space<vmem>>, vector<1x128x128xf32>
    %46 = vector.shape_cast %45 : vector<1x128x128xf32> to vector<128x128xf32>
    %cst_20 = arith.constant dense<0.000000e+00> : vector<256x128xf32>
    %47 = tpu.matmul %44, %46, %cst_20 {dimension_numbers = #tpu.dot_dimension_numbers<[1], [0], [0], [1], [0, 0, 1, 1], [], []>} : vector<256x128xf32>, vector<128x128xf32>, vector<256x128xf32> -> vector<256x128xf32>
    %48 = arith.addf %43, %47 : vector<256x128xf32>
    %49 = vector.extract_strided_slice %30 {offsets = [0, 1, 0], sizes = [18, 16, 128], strides = [1, 1, 1]} : vector<18x18x128xf32> to vector<18x16x128xf32>
    %50 = vector.shape_cast %49 : vector<18x16x128xf32> to vector<288x128xf32>
    %51 = vector.extract_strided_slice %50 {offsets = [0, 0], sizes = [256, 128], strides = [1, 1]} : vector<288x128xf32> to vector<256x128xf32>
    %c1 = arith.constant 1 : index
    %c0_21 = arith.constant 0 : index
    %c0_22 = arith.constant 0 : index
    %52 = vector.load %arg3[%c1, %c0_21, %c0_22] : memref<9x128x128xf32, #tpu.memory_space<vmem>>, vector<1x128x128xf32>
    %53 = vector.shape_cast %52 : vector<1x128x128xf32> to vector<128x128xf32>
    %cst_23 = arith.constant dense<0.000000e+00> : vector<256x128xf32>
    %54 = tpu.matmul %51, %53, %cst_23 {dimension_numbers = #tpu.dot_dimension_numbers<[1], [0], [0], [1], [0, 0, 1, 1], [], []>} : vector<256x128xf32>, vector<128x128xf32>, vector<256x128xf32> -> vector<256x128xf32>
    %55 = arith.addf %48, %54 : vector<256x128xf32>
    %56 = vector.extract_strided_slice %50 {offsets = [16, 0], sizes = [256, 128], strides = [1, 1]} : vector<288x128xf32> to vector<256x128xf32>
    %c4 = arith.constant 4 : index
    %c0_24 = arith.constant 0 : index
    %c0_25 = arith.constant 0 : index
    %57 = vector.load %arg3[%c4, %c0_24, %c0_25] : memref<9x128x128xf32, #tpu.memory_space<vmem>>, vector<1x128x128xf32>
    %58 = vector.shape_cast %57 : vector<1x128x128xf32> to vector<128x128xf32>
    %cst_26 = arith.constant dense<0.000000e+00> : vector<256x128xf32>
    %59 = tpu.matmul %56, %58, %cst_26 {dimension_numbers = #tpu.dot_dimension_numbers<[1], [0], [0], [1], [0, 0, 1, 1], [], []>} : vector<256x128xf32>, vector<128x128xf32>, vector<256x128xf32> -> vector<256x128xf32>
    %60 = arith.addf %55, %59 : vector<256x128xf32>
    %61 = vector.extract_strided_slice %50 {offsets = [32, 0], sizes = [256, 128], strides = [1, 1]} : vector<288x128xf32> to vector<256x128xf32>
    %c7 = arith.constant 7 : index
    %c0_27 = arith.constant 0 : index
    %c0_28 = arith.constant 0 : index
    %62 = vector.load %arg3[%c7, %c0_27, %c0_28] : memref<9x128x128xf32, #tpu.memory_space<vmem>>, vector<1x128x128xf32>
    %63 = vector.shape_cast %62 : vector<1x128x128xf32> to vector<128x128xf32>
    %cst_29 = arith.constant dense<0.000000e+00> : vector<256x128xf32>
    %64 = tpu.matmul %61, %63, %cst_29 {dimension_numbers = #tpu.dot_dimension_numbers<[1], [0], [0], [1], [0, 0, 1, 1], [], []>} : vector<256x128xf32>, vector<128x128xf32>, vector<256x128xf32> -> vector<256x128xf32>
    %65 = arith.addf %60, %64 : vector<256x128xf32>
    %66 = vector.extract_strided_slice %30 {offsets = [0, 2, 0], sizes = [18, 16, 128], strides = [1, 1, 1]} : vector<18x18x128xf32> to vector<18x16x128xf32>
    %67 = vector.shape_cast %66 : vector<18x16x128xf32> to vector<288x128xf32>
    %68 = vector.extract_strided_slice %67 {offsets = [0, 0], sizes = [256, 128], strides = [1, 1]} : vector<288x128xf32> to vector<256x128xf32>
    %c2 = arith.constant 2 : index
    %c0_30 = arith.constant 0 : index
    %c0_31 = arith.constant 0 : index
    %69 = vector.load %arg3[%c2, %c0_30, %c0_31] : memref<9x128x128xf32, #tpu.memory_space<vmem>>, vector<1x128x128xf32>
    %70 = vector.shape_cast %69 : vector<1x128x128xf32> to vector<128x128xf32>
    %cst_32 = arith.constant dense<0.000000e+00> : vector<256x128xf32>
    %71 = tpu.matmul %68, %70, %cst_32 {dimension_numbers = #tpu.dot_dimension_numbers<[1], [0], [0], [1], [0, 0, 1, 1], [], []>} : vector<256x128xf32>, vector<128x128xf32>, vector<256x128xf32> -> vector<256x128xf32>
    %72 = arith.addf %65, %71 : vector<256x128xf32>
    %73 = vector.extract_strided_slice %67 {offsets = [16, 0], sizes = [256, 128], strides = [1, 1]} : vector<288x128xf32> to vector<256x128xf32>
    %c5 = arith.constant 5 : index
    %c0_33 = arith.constant 0 : index
    %c0_34 = arith.constant 0 : index
    %74 = vector.load %arg3[%c5, %c0_33, %c0_34] : memref<9x128x128xf32, #tpu.memory_space<vmem>>, vector<1x128x128xf32>
    %75 = vector.shape_cast %74 : vector<1x128x128xf32> to vector<128x128xf32>
    %cst_35 = arith.constant dense<0.000000e+00> : vector<256x128xf32>
    %76 = tpu.matmul %73, %75, %cst_35 {dimension_numbers = #tpu.dot_dimension_numbers<[1], [0], [0], [1], [0, 0, 1, 1], [], []>} : vector<256x128xf32>, vector<128x128xf32>, vector<256x128xf32> -> vector<256x128xf32>
    %77 = arith.addf %72, %76 : vector<256x128xf32>
    %78 = vector.extract_strided_slice %67 {offsets = [32, 0], sizes = [256, 128], strides = [1, 1]} : vector<288x128xf32> to vector<256x128xf32>
    %c8 = arith.constant 8 : index
    %c0_36 = arith.constant 0 : index
    %c0_37 = arith.constant 0 : index
    %79 = vector.load %arg3[%c8, %c0_36, %c0_37] : memref<9x128x128xf32, #tpu.memory_space<vmem>>, vector<1x128x128xf32>
    %80 = vector.shape_cast %79 : vector<1x128x128xf32> to vector<128x128xf32>
    %cst_38 = arith.constant dense<0.000000e+00> : vector<256x128xf32>
    %81 = tpu.matmul %78, %80, %cst_38 {dimension_numbers = #tpu.dot_dimension_numbers<[1], [0], [0], [1], [0, 0, 1, 1], [], []>} : vector<256x128xf32>, vector<128x128xf32>, vector<256x128xf32> -> vector<256x128xf32>
    %82 = arith.addf %77, %81 : vector<256x128xf32>
    %cst_39 = arith.constant dense<0.000000e+00> : vector<128xf32>
    %83 = vector.multi_reduction <add>, %82, %cst_39 [0] : vector<256x128xf32> to vector<128xf32>
    %84 = vector.shape_cast %83 : vector<128xf32> to vector<1x128xf32>
    %c0_40 = arith.constant 0 : index
    %c0_41 = arith.constant 0 : index
    %c0_42 = arith.constant 0 : index
    %85 = vector.load %arg7[%c0_40, %c0_41, %c0_42] : memref<1x2x128xf32, #tpu.memory_space<vmem>>, vector<1x1x128xf32>
    %86 = vector.shape_cast %85 : vector<1x1x128xf32> to vector<1x128xf32>
    %87 = vector.shape_cast %84 : vector<1x128xf32> to vector<1x1x128xf32>
    tpu.vector_store %arg7[%c0_40, %c0_41, %c0_42], %87 {strides = array<i32>} : memref<1x2x128xf32, #tpu.memory_space<vmem>>, vector<1x1x128xf32>,
    %88 = arith.mulf %82, %82 : vector<256x128xf32>
    %cst_43 = arith.constant dense<0.000000e+00> : vector<128xf32>
    %89 = vector.multi_reduction <add>, %88, %cst_43 [0] : vector<256x128xf32> to vector<128xf32>
    %90 = vector.shape_cast %89 : vector<128xf32> to vector<1x128xf32>
    %c0_44 = arith.constant 0 : index
    %c1_45 = arith.constant 1 : index
    %c0_46 = arith.constant 0 : index
    %91 = vector.load %arg7[%c0_44, %c1_45, %c0_46] : memref<1x2x128xf32, #tpu.memory_space<vmem>>, vector<1x1x128xf32>
    %92 = vector.shape_cast %91 : vector<1x1x128xf32> to vector<1x128xf32>
    %93 = vector.shape_cast %90 : vector<1x128xf32> to vector<1x1x128xf32>
    tpu.vector_store %arg7[%c0_44, %c1_45, %c0_46], %93 {strides = array<i32>} : memref<1x2x128xf32, #tpu.memory_space<vmem>>, vector<1x1x128xf32>,
    %94 = vector.shape_cast %82 : vector<256x128xf32> to vector<16x16x128xf32>
    %c0_47 = arith.constant 0 : index
    %c0_48 = arith.constant 0 : index
    %c0_49 = arith.constant 0 : index
    %c0_50 = arith.constant 0 : index
    %95 = vector.load %arg6[%c0_47, %c0_48, %c0_49, %c0_50] : memref<1x16x16x128xf32, #tpu.memory_space<vmem>>, vector<1x16x16x128xf32>
    %96 = vector.shape_cast %95 : vector<1x16x16x128xf32> to vector<16x16x128xf32>
    %97 = vector.shape_cast %94 : vector<16x16x128xf32> to vector<1x16x16x128xf32>
    tpu.vector_store %arg6[%c0_47, %c0_48, %c0_49, %c0_50], %97 {strides = array<i32>} : memref<1x16x16x128xf32, #tpu.memory_space<vmem>>, vector<1x16x16x128xf32>,
    return
  }
  func.func @transform_0(%arg0: i32, %arg1: i32) -> (i32, i32, i32, i32) {
    %c0_i32 = arith.constant 0 : i32
    %c0_i32_0 = arith.constant 0 : i32
    %c0_i32_1 = arith.constant 0 : i32
    %c0_i32_2 = arith.constant 0 : i32
    return %arg0, %c0_i32, %c0_i32_0, %c0_i32_1 : i32, i32, i32, i32
  }
  func.func @transform_1(%arg0: i32, %arg1: i32) -> (i32, i32, i32) {
    %c0_i32 = arith.constant 0 : i32
    %c0_i32_0 = arith.constant 0 : i32
    %c0_i32_1 = arith.constant 0 : i32
    return %c0_i32, %c0_i32_0, %arg1 : i32, i32, i32
  }
  func.func @transform_2(%arg0: i32, %arg1: i32) -> (i32, i32) {
    %c0_i32 = arith.constant 0 : i32
    %c0_i32_0 = arith.constant 0 : i32
    %c0_i32_1 = arith.constant 0 : i32
    return %c0_i32, %c0_i32_0 : i32, i32
  }
  func.func @transform_3(%arg0: i32, %arg1: i32) -> (i32, i32) {
    %c0_i32 = arith.constant 0 : i32
    %c0_i32_0 = arith.constant 0 : i32
    %c0_i32_1 = arith.constant 0 : i32
    return %c0_i32, %c0_i32_0 : i32, i32
  }
  func.func @transform_4(%arg0: i32, %arg1: i32) -> (i32, i32, i32, i32) {
    %c0_i32 = arith.constant 0 : i32
    %c0_i32_0 = arith.constant 0 : i32
    %c0_i32_1 = arith.constant 0 : i32
    return %arg0, %c0_i32, %c0_i32_0, %arg1 : i32, i32, i32, i32
  }
  func.func @transform_5(%arg0: i32, %arg1: i32) -> (i32, i32, i32) {
    %c0_i32 = arith.constant 0 : i32
    %c0_i32_0 = arith.constant 0 : i32
    return %arg0, %c0_i32, %arg1 : i32, i32, i32
  }
}

module attributes {stable_mosaic.version = 11 : i64} {
  func.func @_affine_kernel(%arg0: i32, %arg1: i32, %arg2: memref<1x16x16x128xf32, #tpu.memory_space<vmem>>, %arg3: memref<1x128xf32, #tpu.memory_space<vmem>>, %arg4: memref<1x128xf32, #tpu.memory_space<vmem>>, %arg5: memref<1x16x16x128xf32, #tpu.memory_space<vmem>>) attributes {dimension_semantics = [#tpu.dimension_semantics<parallel>, #tpu.dimension_semantics<parallel>], iteration_bounds = array<i64: 2, 1>, scalar_prefetch = 0 : i64, scratch_operands = 0 : i64, tpu.core_type = #tpu.core_type<tc>, window_params = [{transform_indices = @transform_0, window_bounds = array<i64: 1, 16, 16, 128>}, {transform_indices = @transform_1, window_bounds = array<i64: 1, 128>}, {transform_indices = @transform_2, window_bounds = array<i64: 1, 128>}, {transform_indices = @transform_3, window_bounds = array<i64: 1, 16, 16, 128>}]} {
    %c0 = arith.constant 0 : index
    %c0_0 = arith.constant 0 : index
    %c0_1 = arith.constant 0 : index
    %c0_2 = arith.constant 0 : index
    %0 = vector.load %arg2[%c0, %c0_0, %c0_1, %c0_2] : memref<1x16x16x128xf32, #tpu.memory_space<vmem>>, vector<1x16x16x128xf32>
    %c0_3 = arith.constant 0 : index
    %c0_4 = arith.constant 0 : index
    %1 = vector.load %arg3[%c0_3, %c0_4] : memref<1x128xf32, #tpu.memory_space<vmem>>, vector<1x128xf32>
    %2 = vector.shape_cast %1 : vector<1x128xf32> to vector<128xf32>
    %3 = vector.shape_cast %2 : vector<128xf32> to vector<1x1x1x128xf32>
    %4 = vector.broadcast %3 : vector<1x1x1x128xf32> to vector<1x16x16x128xf32>
    %5 = arith.mulf %0, %4 : vector<1x16x16x128xf32>
    %c0_5 = arith.constant 0 : index
    %c0_6 = arith.constant 0 : index
    %6 = vector.load %arg4[%c0_5, %c0_6] : memref<1x128xf32, #tpu.memory_space<vmem>>, vector<1x128xf32>
    %7 = vector.shape_cast %6 : vector<1x128xf32> to vector<128xf32>
    %8 = vector.shape_cast %7 : vector<128xf32> to vector<1x1x1x128xf32>
    %9 = vector.broadcast %8 : vector<1x1x1x128xf32> to vector<1x16x16x128xf32>
    %10 = arith.addf %5, %9 : vector<1x16x16x128xf32>
    %c0_7 = arith.constant 0 : index
    %c0_8 = arith.constant 0 : index
    %c0_9 = arith.constant 0 : index
    %c0_10 = arith.constant 0 : index
    %11 = vector.load %arg5[%c0_7, %c0_8, %c0_9, %c0_10] : memref<1x16x16x128xf32, #tpu.memory_space<vmem>>, vector<1x16x16x128xf32>
    tpu.vector_store %arg5[%c0_7, %c0_8, %c0_9, %c0_10], %10 {strides = array<i32>} : memref<1x16x16x128xf32, #tpu.memory_space<vmem>>, vector<1x16x16x128xf32>,
    return
  }
  func.func @transform_0(%arg0: i32, %arg1: i32) -> (i32, i32, i32, i32) {
    %c0_i32 = arith.constant 0 : i32
    %c0_i32_0 = arith.constant 0 : i32
    %c0_i32_1 = arith.constant 0 : i32
    return %arg0, %c0_i32, %c0_i32_0, %arg1 : i32, i32, i32, i32
  }
  func.func @transform_1(%arg0: i32, %arg1: i32) -> (i32, i32) {
    %c0_i32 = arith.constant 0 : i32
    %c0_i32_0 = arith.constant 0 : i32
    return %c0_i32, %arg1 : i32, i32
  }
  func.func @transform_2(%arg0: i32, %arg1: i32) -> (i32, i32) {
    %c0_i32 = arith.constant 0 : i32
    %c0_i32_0 = arith.constant 0 : i32
    return %c0_i32, %arg1 : i32, i32
  }
  func.func @transform_3(%arg0: i32, %arg1: i32) -> (i32, i32, i32, i32) {
    %c0_i32 = arith.constant 0 : i32
    %c0_i32_0 = arith.constant 0 : i32
    %c0_i32_1 = arith.constant 0 : i32
    return %arg0, %c0_i32, %c0_i32_0, %arg1 : i32, i32, i32, i32
  }
}

</mosaic_0001>

<bundles_post_ra>
// kernel: basic_block_forward.5
= control target key start
LH: loop header
LB: loop body
LE: loop exit
PB: predicated region body
PF: predicated region fallthrough
CT: control target
= control target key end

     0   :  { %s565_s12 = smov 0   ;;  %s567_s13 = smov 0   ;;  %s740_s0 = inlined_call_operand.vmem [shape: f32[2,16,16,128], index: 0, kind: input, shape index: {}]   ;;  %s741_s1 = inlined_call_operand.vmem [shape: f32[1,128], index: 1, kind: input, shape index: {}]   ;;  %s742_s2 = inlined_call_operand.vmem [shape: f32[1,128], index: 2, kind: input, shape index: {}]   ;;  %s743_s3 = inlined_call_operand.vmem [shape: f32[2,16,16,128], index: 3, kind: output, shape index: {}]  }
   0x1   :  { %s569_s14 = smov 0  }
   0x2 LB: > { %s25_s15 = sadd.s32 1, %s539_s13  ;;  %p486_p0 = scmp.ge.s32.totalorder %s543_s14, 1  ;;  %s543_s14 = sphi %s569_s14, %s13_s14   ;;  %s539_s13 = sphi %s567_s13, %s745_s13   ;;  %s535_s12 = sphi %s565_s12, %s744_s12  }
   0x3   : > { %p27_p1 = scmp.ge.s32.totalorder %s25_s15, 2  ;;  %p172_p2 = scmp.lt.s32.totalorder %s543_s14, 3 }
   0x5   : > { %s747_s15 = smov (%p27_p1, %s25_s15), 0  ;;  %p173_p3 = pnand %p486_p0, %p172_p2 }
   0x6   : > { %p208_p4 = scmp.lt.s32.totalorder (!%p173_p3), %s535_s12, 1  ;;  %v586_v0 = vld [vmem:[%s741_s1] ss:$0 sm:$0xff] (!%p173_p3) }
   0x7   : > { %176 = sbr.rel (%p173_p3) target bundleno = 41 (0x29), region = 32  ;;  %v596_v1 = vld [vmem:[%s742_s2] ss:$0 sm:$0xff] (!%p173_p3) }
   0xe   : > { %s749_s12 = smov (!%p208_p4, %s535_s12), 1 }
   0xf   : > { %s495_s16 = sshll.u32 %s749_s12, 8 }
  0x10   : > { %s591_s21 = scalar_lea.vmem %s740_s0, %s495_s16  ;;  %s610_s26 = scalar_lea.vmem %s743_s3, %s495_s16 }
  0x11   : > { %v230_v2 = vld [vmem:[%s591_s21] sm:$0xff]  ;;  %v231_v3 = vld [vmem:[%s591_s21 + $0x8] sm:$0xff]  ;;  %v232_v4 = vld [vmem:[%s591_s21 + $0x10] sm:$0xff] }
  0x12   : > { %v269_v5 = vmul.f32 %v586_v0, %v230_v2  ;;  %v270_v6 = vmul.f32 %v586_v0, %v231_v3  ;;  %v271_v7 = vmul.f32 %v586_v0, %v232_v4  ;;  %v233_v8 = vld [vmem:[%s591_s21 + $0x18] sm:$0xff]  ;;  %v234_v9 = vld [vmem:[%s591_s21 + $0x20] sm:$0xff]  ;;  %v235_v10 = vld [vmem:[%s591_s21 + $0x28] sm:$0xff] }
  0x13   : > { %v272_v11 = vmul.f32 %v586_v0, %v233_v8  ;;  %v273_v12 = vmul.f32 %v586_v0, %v234_v9  ;;  %v274_v13 = vmul.f32 %v586_v0, %v235_v10  ;;  %v236_v14 = vld [vmem:[%s591_s21 + $0x30] sm:$0xff]  ;;  %v237_v15 = vld [vmem:[%s591_s21 + $0x38] sm:$0xff]  ;;  %v238_v16 = vld [vmem:[%s591_s21 + $0x40] sm:$0xff] }
  0x14   : > { %v308_v17 = vadd.f32 %v596_v1, %v269_v5  ;;  %v309_v18 = vadd.f32 %v596_v1, %v270_v6  ;;  %v310_v19 = vadd.f32 %v596_v1, %v271_v7  ;;  %v275_v20 = vmul.f32 %v586_v0, %v236_v14  ;;  %v239_v21 = vld [vmem:[%s591_s21 + $0x48] sm:$0xff]  ;;  %v240_v22 = vld [vmem:[%s591_s21 + $0x50] sm:$0xff]  ;;  %v241_v23 = vld [vmem:[%s591_s21 + $0x58] sm:$0xff] }
  0x15   : > { %v311_v24 = vadd.f32 %v596_v1, %v272_v11  ;;  %v312_v25 = vadd.f32 %v596_v1, %v273_v12  ;;  %v313_v26 = vadd.f32 %v596_v1, %v274_v13  ;;  %v276_v27 = vmul.f32 %v586_v0, %v237_v15  ;;  %v242_v28 = vld [vmem:[%s591_s21 + $0x60] sm:$0xff]  ;;  %v243_v29 = vld [vmem:[%s591_s21 + $0x68] sm:$0xff]  ;;  %v244_v30 = vld [vmem:[%s591_s21 + $0x70] sm:$0xff] }
  0x16   : > { %340 = vst [vmem:[%s610_s26] sm:$0xff] %v308_v17  ;;  %341 = vst [vmem:[%s610_s26 + $0x8] sm:$0xff] %v309_v18  ;;  %v314_v31 = vadd.f32 %v596_v1, %v275_v20  ;;  %v277_v32 = vmul.f32 %v586_v0, %v238_v16  ;;  %v278_v33 = vmul.f32 %v586_v0, %v239_v21  ;;  %v245_v35 = vld [vmem:[%s591_s21 + $0x78] sm:$0xff]  ;;  %v246_v40 = vld [vmem:[%s591_s21 + $0x80] sm:$0xff] }
  0x17   : > { %342 = vst [vmem:[%s610_s26 + $0x10] sm:$0xff] %v310_v19  ;;  %v279_v34 = vmul.f32 %v586_v0, %v240_v22  ;;  %343 = vst [vmem:[%s610_s26 + $0x18] sm:$0xff] %v311_v24  ;;  %v315_v36 = vadd.f32 %v596_v1, %v276_v27  ;;  %v280_v37 = vmul.f32 %v586_v0, %v241_v23  ;;  %v247_v41 = vld [vmem:[%s591_s21 + $0x88] sm:$0xff]  ;;  %v248_v42 = vld [vmem:[%s591_s21 + $0x90] sm:$0xff] }
  0x18   : > { %344 = vst [vmem:[%s610_s26 + $0x20] sm:$0xff] %v312_v25  ;;  %345 = vst [vmem:[%s610_s26 + $0x28] sm:$0xff] %v313_v26  ;;  %v281_v38 = vmul.f32 %v586_v0, %v242_v28  ;;  %v282_v39 = vmul.f32 %v586_v0, %v243_v29  ;;  %v316_v43 = vadd.f32 %v596_v1, %v277_v32  ;;  %v249_v47 = vld [vmem:[%s591_s21 + $0x98] sm:$0xff]  ;;  %v250_v48 = vld [vmem:[%s591_s21 + $0xa0] sm:$0xff] }
  0x19   : > { %346 = vst [vmem:[%s610_s26 + $0x30] sm:$0xff] %v314_v31  ;;  %v317_v44 = vadd.f32 %v596_v1, %v278_v33  ;;  %v318_v45 = vadd.f32 %v596_v1, %v279_v34  ;;  %v283_v46 = vmul.f32 %v586_v0, %v244_v30  ;;  %v251_v49 = vld [vmem:[%s591_s21 + $0xa8] sm:$0xff]  ;;  %347 = vst [vmem:[%s610_s26 + $0x38] sm:$0xff] %v315_v36  ;;  %v252_v54 = vld [vmem:[%s591_s21 + $0xb0] sm:$0xff] }
  0x1a   : > { %v319_v50 = vadd.f32 %v596_v1, %v280_v37  ;;  %v320_v51 = vadd.f32 %v596_v1, %v281_v38  ;;  %v321_v52 = vadd.f32 %v596_v1, %v282_v39  ;;  %v284_v53 = vmul.f32 %v586_v0, %v245_v35  ;;  %348 = vst [vmem:[%s610_s26 + $0x40] sm:$0xff] %v316_v43  ;;  %v253_v59 = vld [vmem:[%s591_s21 + $0xb8] sm:$0xff]  ;;  %v254_v2 = vld [vmem:[%s591_s21 + $0xc0] sm:$0xff]  ;;  %v255_v3 = vld [vmem:[%s591_s21 + $0xc8] sm:$0xff] }
  0x1b   : > { %349 = vst [vmem:[%s610_s26 + $0x48] sm:$0xff] %v317_v44  ;;  %350 = vst [vmem:[%s610_s26 + $0x50] sm:$0xff] %v318_v45  ;;  %v322_v55 = vadd.f32 %v596_v1, %v283_v46  ;;  %v285_v56 = vmul.f32 %v586_v0, %v246_v40  ;;  %v286_v57 = vmul.f32 %v586_v0, %v247_v41  ;;  %v256_v4 = vld [vmem:[%s591_s21 + $0xd0] sm:$0xff]  ;;  %v257_v9 = vld [vmem:[%s591_s21 + $0xd8] sm:$0xff] }
  0x1c   : > { %v287_v58 = vmul.f32 %v586_v0, %v248_v42  ;;  %351 = vst [vmem:[%s610_s26 + $0x58] sm:$0xff] %v319_v50  ;;  %352 = vst [vmem:[%s610_s26 + $0x60] sm:$0xff] %v320_v51  ;;  %v323_v60 = vadd.f32 %v596_v1, %v284_v53  ;;  %v288_v61 = vmul.f32 %v586_v0, %v249_v47  ;;  %v258_v10 = vld [vmem:[%s591_s21 + $0xe0] sm:$0xff]  ;;  %v259_v11 = vld [vmem:[%s591_s21 + $0xe8] sm:$0xff] }
  0x1d   : > { %353 = vst [vmem:[%s610_s26 + $0x68] sm:$0xff] %v321_v52  ;;  %v289_v62 = vmul.f32 %v586_v0, %v250_v48  ;;  %v290_v63 = vmul.f32 %v586_v0, %v251_v49  ;;  %354 = vst [vmem:[%s610_s26 + $0x70] sm:$0xff] %v322_v55  ;;  %v324_v5 = vadd.f32 %v596_v1, %v285_v56  ;;  %v260_v16 = vld [vmem:[%s591_s21 + $0xf0] sm:$0xff]  ;;  %v261_v21 = vld [vmem:[%s591_s21 + $0xf8] sm:$0xff] }
  0x1e   : > { %v325_v6 = vadd.f32 %v596_v1, %v286_v57  ;;  %v326_v7 = vadd.f32 %v596_v1, %v287_v58  ;;  %v291_v8 = vmul.f32 %v586_v0, %v252_v54  ;;  %355 = vst [vmem:[%s610_s26 + $0x78] sm:$0xff] %v323_v60  ;;  %v327_v12 = vadd.f32 %v596_v1, %v288_v61 }
  0x1f   : > { %v328_v13 = vadd.f32 %v596_v1, %v289_v62  ;;  %v329_v14 = vadd.f32 %v596_v1, %v290_v63  ;;  %v292_v15 = vmul.f32 %v586_v0, %v253_v59  ;;  %356 = vst [vmem:[%s610_s26 + $0x80] sm:$0xff] %v324_v5  ;;  %v293_v18 = vmul.f32 %v586_v0, %v254_v2 }
  0x20   : > { %357 = vst [vmem:[%s610_s26 + $0x88] sm:$0xff] %v325_v6  ;;  %358 = vst [vmem:[%s610_s26 + $0x90] sm:$0xff] %v326_v7  ;;  %v330_v17 = vadd.f32 %v596_v1, %v291_v8  ;;  %v294_v19 = vmul.f32 %v586_v0, %v255_v3  ;;  %v295_v20 = vmul.f32 %v586_v0, %v256_v4 }
  0x21   : > { %359 = vst [vmem:[%s610_s26 + $0x98] sm:$0xff] %v327_v12  ;;  %360 = vst [vmem:[%s610_s26 + $0xa0] sm:$0xff] %v328_v13  ;;  %v331_v22 = vadd.f32 %v596_v1, %v292_v15  ;;  %v296_v23 = vmul.f32 %v586_v0, %v257_v9  ;;  %v297_v24 = vmul.f32 %v586_v0, %v258_v10 }
  0x22   : > { %361 = vst [vmem:[%s610_s26 + $0xa8] sm:$0xff] %v329_v14  ;;  %v298_v25 = vmul.f32 %v586_v0, %v259_v11  ;;  %362 = vst [vmem:[%s610_s26 + $0xb0] sm:$0xff] %v330_v17  ;;  %v332_v26 = vadd.f32 %v596_v1, %v293_v18  ;;  %v333_v27 = vadd.f32 %v596_v1, %v294_v19 }
  0x23   : > { %v334_v28 = vadd.f32 %v596_v1, %v295_v20  ;;  %v299_v29 = vmul.f32 %v586_v0, %v260_v16  ;;  %363 = vst [vmem:[%s610_s26 + $0xb8] sm:$0xff] %v331_v22  ;;  %v335_v30 = vadd.f32 %v596_v1, %v296_v23  ;;  %v336_v31 = vadd.f32 %v596_v1, %v297_v24 }
  0x24   : > { %v337_v32 = vadd.f32 %v596_v1, %v298_v25  ;;  %v300_v33 = vmul.f32 %v586_v0, %v261_v21  ;;  %364 = vst [vmem:[%s610_s26 + $0xc0] sm:$0xff] %v332_v26  ;;  %365 = vst [vmem:[%s610_s26 + $0xc8] sm:$0xff] %v333_v27 }
  0x25   : > { %366 = vst [vmem:[%s610_s26 + $0xd0] sm:$0xff] %v334_v28  ;;  %v338_v34 = vadd.f32 %v596_v1, %v299_v29  ;;  %367 = vst [vmem:[%s610_s26 + $0xd8] sm:$0xff] %v335_v30 }
  0x26   : > { %368 = vst [vmem:[%s610_s26 + $0xe0] sm:$0xff] %v336_v31  ;;  %369 = vst [vmem:[%s610_s26 + $0xe8] sm:$0xff] %v337_v32  ;;  %v339_v35 = vadd.f32 %v596_v1, %v300_v33 }
  0x27   : > { %370 = vst [vmem:[%s610_s26 + $0xf0] sm:$0xff] %v338_v34 }
  0x28   : > { %371 = vst [vmem:[%s610_s26 + $0xf8] sm:$0xff] %v339_v35 }
  0x29 PF: > { %s13_s14 = sadd.s32 1, %s543_s14   ;;  %s744_s12 = smov %s539_s13 }
  0x2a   : > { %p10_p5 = scmp.ge.s32.totalorder %s13_s14, 4   ;;  %s745_s13 = smov %s747_s15 }
  0x2c   :  { %12 = sbr.rel (!%p10_p5) target bundleno = 2 (0x2), region = 68 }

// kernel: basic_block_forward.3
= control target key start
LH: loop header
LB: loop body
LE: loop exit
PB: predicated region body
PF: predicated region fallthrough
CT: control target
= control target key end

     0   :  { %s5344_s18 = smov 0   ;;  %s5346_s19 = smov 0   ;;  %s6749_s0 = inlined_call_operand.vmem [shape: f32[2,18,18,128], index: 0, kind: input, shape index: {}]   ;;  %s6750_s1 = inlined_call_operand.vmem [shape: f32[9,128,128], index: 1, kind: input, shape index: {}]   ;;  %s6751_s2 = inlined_call_operand.vmem [shape: f32[1,128], index: 2, kind: input, shape index: {}]   ;;  %s6752_s3 = inlined_call_operand.vmem [shape: f32[1,128], index: 3, kind: input, shape index: {}]   ;;  %s6753_s4 = inlined_call_operand.vmem [shape: f32[2,18,18,128], index: 4, kind: output, shape index: {0}]   ;;  %s6754_s5 = inlined_call_operand.vmem [shape: f32[2,2,128], index: 5, kind: output, shape index: {1}]  }
   0x1   :  { %s5348_s20 = smov 0  }
   0x2 LB: > { %s28_s2 = sadd.s32 1, %s5307_s19  ;;  %p3378_p0 = scmp.ge.s32.totalorder %s5311_s20, 1  ;;  %s5311_s20 = sphi %s5348_s20, %s16_s20   ;;  %s5307_s19 = sphi %s5346_s19, %s6921_s19   ;;  %s5303_s18 = sphi %s5344_s18, %s6920_s18  }
   0x3   : > { %p30_p1 = scmp.ge.s32.totalorder %s28_s2, 2  ;;  %p215_p2 = scmp.lt.s32.totalorder %s5311_s20, 3 }
   0x5   : > { %s6923_s2 = smov (%p30_p1, %s28_s2), 0  ;;  %p216_p3 = pnand %p3378_p0, %p215_p2 }
   0x7   : > { %219 = sbr.rel (%p216_p3) target bundleno = 568 (0x238), region = 36 }
   0xe   : > { %v3382_v0 = vld [vmem:[%s6750_s1 + $0x180] sm:$0xff]  ;;  %v3383_v1 = vld [vmem:[%s6750_s1 + $0x188] sm:$0xff]  ;;  %p257_p4 = scmp.lt.s32.totalorder %s5303_s18, 1  ;;  %v3384_v5 = vld [vmem:[%s6750_s1 + $0x190] sm:$0xff]  ;;  %vm1146_vm0 = vcmask 1046528   ;;  %vm2095_vm1 = vcmask 1045504  }
   0xf   : > { %v3430_v2 = vld [vmem:[%s6750_s1 + $0x200] sm:$0xff]  ;;  %v4696_v3 = vpack.c.bf16 %v3383_v1, %v3382_v0  ;;  %v3431_v4 = vld [vmem:[%s6750_s1 + $0x208] sm:$0xff]  ;;  %v3385_v6 = vld [vmem:[%s6750_s1 + $0x198] sm:$0xff] }
  0x10   : > { %v5380_v7 = vpack.c.bf16 %v3431_v4, %v3430_v2  ;;  %v4700_v8 = vpack.c.bf16 %v3385_v6, %v3384_v5  ;;  %v3432_v9 = vld [vmem:[%s6750_s1 + $0x210] sm:$0xff]  ;;  %v3433_v10 = vld [vmem:[%s6750_s1 + $0x218] sm:$0xff]  ;;  %v3386_v11 = vld [vmem:[%s6750_s1 + $0x1a0] sm:$0xff]  ;;  %s6925_s18 = smov (!%p257_p4, %s5303_s18), 1 }
  0x11   : > { %4697 = vmatprep.subr.bf16.mxu1 %v4696_v3  ;;  %v5393_v12 = vpack.c.bf16 %v3433_v10, %v3432_v9  ;;  %v3387_v13 = vld [vmem:[%s6750_s1 + $0x1a8] sm:$0xff]  ;;  %v3434_v14 = vld [vmem:[%s6750_s1 + $0x220] sm:$0xff]  ;;  %s5256_s21 = smul.u32 432, %s6925_s18  ;;  %v3388_v18 = vld [vmem:[%s6750_s1 + $0x1b0] sm:$0xff] }
  0x12   : > { %6824 = vst [vmem:[#allocation2_spill] sm:$0xff] %v5380_v7  ;;  %v3435_v15 = vld [vmem:[%s6750_s1 + $0x228] sm:$0xff]  ;;  %4825 = vmatprep.subr.bf16.mxu0 %v5380_v7  ;;  %4699 = vmatpush3.bf16.msra.mxu1 %v4696_v3  ;;  %v4704_v16 = vpack.c.bf16 %v3387_v13, %v3386_v11  ;;  %v3389_v19 = vld [vmem:[%s6750_s1 + $0x1b8] sm:$0xff]  ;;  %v3436_v20 = vld [vmem:[%s6750_s1 + $0x230] sm:$0xff] }
  0x13   : > { %6825 = vst [vmem:[#allocation3_spill] sm:$0xff] %v5393_v12  ;;  %4827 = vmatpush3.bf16.msra.mxu0 %v5380_v7  ;;  %4701 = vmatprep.subr.bf16.mxu1 %v4700_v8  ;;  %v5408_v17 = vpack.c.bf16 %v3435_v15, %v3434_v14  ;;  %v3437_v21 = vld [vmem:[%s6750_s1 + $0x238] sm:$0xff]  ;;  %s5427_s7 = scalar_lea.vmem %s6749_s0, %s5256_s21  ;;  %v4708_v22 = vpack.c.bf16 %v3389_v19, %v3388_v18  ;;  %v3390_v24 = vld [vmem:[%s6750_s1 + $0x1c0] sm:$0xff]  ;;  %v3391_v25 = vld [vmem:[%s6750_s1 + $0x1c8] sm:$0xff]  ;;  %s6633_s12 = scalar_lea.vmem %s6753_s4, %s5256_s21 }
  0x14   : > { %4829 = vmatprep.subr.bf16.mxu0 %v5393_v12  ;;  %v5431_v23 = vpack.c.bf16 %v3437_v21, %v3436_v20  ;;  %v5440_v26 = vld [vmem:[%s5427_s7 + $0x18] sm:$0xff]  ;;  %v3438_v27 = vld [vmem:[%s6750_s1 + $0x240] sm:$0xff]  ;;  %v3439_v28 = vld [vmem:[%s6750_s1 + $0x248] sm:$0xff]  ;;  %v4712_v32 = vpack.c.bf16 %v3391_v25, %v3390_v24  ;;  %s3381_s21 = sshll.u32 %s6925_s18, 1 }
  0x15   : > { %6826 = vst [vmem:[#allocation4_spill] sm:$0xff] %v5408_v17  ;;  %4008 = vmatprep.mubr.f32.mxu1 %v5440_v26  ;;  %v5450_v29 = vld [vmem:[%s5427_s7 + $0x20] sm:$0xff]  ;;  %v1152_v30 = vrot.slane %v5440_v26, 1  ;;  %v5456_v33 = vpack.c.bf16 %v3439_v28, %v3438_v27  ;;  %v3392_v34 = vld [vmem:[%s6750_s1 + $0x1d0] sm:$0xff]  ;;  %v3393_v35 = vld [vmem:[%s6750_s1 + $0x1d8] sm:$0xff]  ;;  %s280_s15 = scalar_lea.vmem %s6754_s5, %s3381_s21 }
  0x16   : > { %4703 = vmatpush3.bf16.msra.mxu1 %v4700_v8  ;;  %6827 = vst [vmem:[#allocation5_spill] sm:$0xff] %v5431_v23  ;;  %v1153_v31 = vrot.slane %v5450_v29, 1  ;;  %v3440_v37 = vld [vmem:[%s6750_s1 + $0x250] sm:$0xff]  ;;  %v3441_v38 = vld [vmem:[%s6750_s1 + $0x258] sm:$0xff]  ;;  %v4716_v39 = vpack.c.bf16 %v3393_v35, %v3392_v34  ;;  %v3394_v41 = vld [vmem:[%s6750_s1 + $0x1e0] sm:$0xff] }
  0x17   : > { %4831 = vmatpush3.bf16.msra.mxu0 %v5393_v12  ;;  %4705 = vmatprep.subr.bf16.mxu1 %v4704_v16  ;;  %6828 = vst [vmem:[#allocation6_spill] sm:$0xff] %v5456_v33  ;;  %v5478_v40 = vpack.c.bf16 %v3441_v38, %v3440_v37  ;;  %v3395_v42 = vld [vmem:[%s6750_s1 + $0x1e8] sm:$0xff]  ;;  %v3442_v43 = vld [vmem:[%s6750_s1 + $0x260] sm:$0xff]  ;;  %v3396_v47 = vld [vmem:[%s6750_s1 + $0x1f0] sm:$0xff] }
  0x18   : > { %4833 = vmatprep.subr.bf16.mxu0 %v5408_v17  ;;  %v5467_v36 = vsel %vm1146_vm0, %v1152_v30, %v1153_v31  ;;  %v3443_v44 = vld [vmem:[%s6750_s1 + $0x268] sm:$0xff]  ;;  %v4720_v45 = vpack.c.bf16 %v3395_v42, %v3394_v41  ;;  %v3397_v48 = vld [vmem:[%s6750_s1 + $0x1f8] sm:$0xff]  ;;  %v3444_v49 = vld [vmem:[%s6750_s1 + $0x270] sm:$0xff] }
  0x19   : > { %6829 = vst [vmem:[#allocation7_spill] sm:$0xff] %v5467_v36  ;;  %4328 = vmatprep.mubr.f32.mxu0 %v5467_v36  ;;  %6830 = vst [vmem:[#allocation8_spill] sm:$0xff] %v5478_v40  ;;  %v5494_v46 = vpack.c.bf16 %v3443_v44, %v3442_v43  ;;  %v3445_v50 = vld [vmem:[%s6750_s1 + $0x278] sm:$0xff]  ;;  %v4724_v51 = vpack.c.bf16 %v3397_v48, %v3396_v47  ;;  %v335_v53 = vld [vmem:[%s6750_s1] sm:$0xff] }
  0x1a   : > { %4707 = vmatpush3.bf16.msra.mxu1 %v4704_v16  ;;  %v5510_v52 = vpack.c.bf16 %v3445_v50, %v3444_v49  ;;  %v336_v54 = vld [vmem:[%s6750_s1 + $0x8] sm:$0xff]  ;;  %v3446_v56 = vld [vmem:[%s6750_s1 + $0x380] sm:$0xff]  ;;  %v5528_v58 = vld [vmem:[%s5427_s7 + $0x30] sm:$0xff] }
  0x1b   : > { %4835 = vmatpush3.bf16.msra.mxu0 %v5408_v17  ;;  %4709 = vmatprep.subr.bf16.mxu1 %v4708_v22  ;;  %6831 = vst [vmem:[#allocation9_spill] sm:$0xff] %v5494_v46  ;;  %v5519_v55 = vld [vmem:[%s5427_s7 + $0x28] sm:$0x3]  ;;  %v5531_v59 = vld [vmem:[%s5427_s7 + $0x38] sm:$0xff]  ;;  %v4728_v60 = vpack.c.bf16 %v336_v54, %v335_v53  ;;  %v5537_v63 = vld [vmem:[%s5427_s7 + $0x40] sm:$0x3] }
  0x1c   : > { %4837 = vmatprep.subr.bf16.mxu0 %v5431_v23  ;;  %6832 = vst [vmem:[#allocation10_spill] sm:$0xff] %v5510_v52  ;;  %v3447_v57 = vld [vmem:[%s6750_s1 + $0x388] sm:$0xff]  ;;  %v1155_v61 = vrot.slane %v5519_v55, 1  ;;  %v3448_v0 = vld [vmem:[%s6750_s1 + $0x390] sm:$0xff]  ;;  %v1157_v1 = vrot.slane %v5528_v58, 1  ;;  %v1158_v2 = vrot.slane %v5531_v59, 1 }
  0x1d   : > { %v4856_v62 = vpack.c.bf16 %v3447_v57, %v3446_v56  ;;  %v3449_v3 = vld [vmem:[%s6750_s1 + $0x398] sm:$0xff]  ;;  %v5548_v4 = vld [vmem:[%s5427_s7 + $0x48] sm:$0xff]  ;;  %v5551_v5 = vld [vmem:[%s5427_s7 + $0x50] sm:$0xff]  ;;  %v1160_v10 = vrot.slane %v5537_v63, 1 }
  0x1e   : > { %4711 = vmatpush3.bf16.msra.mxu1 %v4708_v22  ;;  %v337_v6 = vld [vmem:[%s6750_s1 + $0x10] sm:$0xff]  ;;  %v338_v8 = vld [vmem:[%s6750_s1 + $0x18] sm:$0xff]  ;;  %v5563_v9 = vsel %vm1146_vm0, %v1153_v31, %v1155_v61  ;;  %v4860_v11 = vpack.c.bf16 %v3449_v3, %v3448_v0  ;;  %v1162_v13 = vrot.slane %v5548_v4, 1  ;;  %v1163_v14 = vrot.slane %v5551_v5, 1  ;;  %v3450_v16 = vld [vmem:[%s6750_s1 + $0x3a0] sm:$0xff] }
  0x1f   : > { %4839 = vmatpush3.bf16.msra.mxu0 %v5431_v23  ;;  %4713 = vmatprep.subr.bf16.mxu1 %v4712_v32  ;;  %6833 = vst [vmem:[#allocation11_spill] sm:$0xff] %v5563_v9  ;;  %v5569_v15 = vld [vmem:[%s5427_s7 + $0x58] sm:$0x3]  ;;  %v5576_v18 = vsel %vm1146_vm0, %v1157_v1, %v1158_v2  ;;  %v4732_v19 = vpack.c.bf16 %v338_v8, %v337_v6  ;;  %v3451_v20 = vld [vmem:[%s6750_s1 + $0x3a8] sm:$0xff]  ;;  %v5582_v21 = vld [vmem:[%s5427_s7 + $0x60] sm:$0xff] }
  0x20   : > { %4841 = vmatprep.subr.bf16.mxu0 %v5456_v33  ;;  %6834 = vst [vmem:[#allocation12_spill] sm:$0xff] %v5576_v18  ;;  %v5585_v22 = vld [vmem:[%s5427_s7 + $0x68] sm:$0xff]  ;;  %v339_v24 = vld [vmem:[%s6750_s1 + $0x20] sm:$0xff]  ;;  %v5596_v27 = vsel %vm1146_vm0, %v1158_v2, %v1160_v10  ;;  %v1165_v28 = vrot.slane %v5569_v15, 1  ;;  %v5601_v30 = vsel %vm1146_vm0, %v1162_v13, %v1163_v14  ;;  %v4864_v31 = vpack.c.bf16 %v3451_v20, %v3450_v16  ;;  %v5606_v35 = vld [vmem:[%s5427_s7 + $0x70] sm:$0x3] }
  0x21   : > { %v340_v25 = vld [vmem:[%s6750_s1 + $0x28] sm:$0xff]  ;;  %6835 = vst [vmem:[#allocation13_spill] sm:$0xff] %v5596_v27  ;;  %6836 = vst [vmem:[#allocation14_spill] sm:$0xff] %v5601_v30  ;;  %v1168_v34 = vrot.slane %v5585_v22, 1  ;;  %v3452_v37 = vld [vmem:[%s6750_s1 + $0x3b0] sm:$0xff]  ;;  %v1170_v47 = vrot.slane %v5606_v35, 1 }
  0x22   : > { %4715 = vmatpush3.bf16.msra.mxu1 %v4712_v32  ;;  %v1167_v32 = vrot.slane %v5582_v21, 1  ;;  %v3453_v38 = vld [vmem:[%s6750_s1 + $0x3b8] sm:$0xff]  ;;  %v5619_v41 = vld [vmem:[%s5427_s7 + $0x80] sm:$0xff]  ;;  %v4736_v42 = vpack.c.bf16 %v340_v25, %v339_v24  ;;  %v341_v43 = vld [vmem:[%s6750_s1 + $0x30] sm:$0xff] }
  0x23   : > { %4843 = vmatpush3.bf16.msra.mxu0 %v5456_v33  ;;  %4717 = vmatprep.subr.bf16.mxu1 %v4716_v39  ;;  %v342_v44 = vld [vmem:[%s6750_s1 + $0x38] sm:$0xff]  ;;  %v4868_v49 = vpack.c.bf16 %v3453_v38, %v3452_v37  ;;  %v5640_v53 = vld [vmem:[%s5427_s7 + $0x88] sm:$0x3]  ;;  %v3454_v54 = vld [vmem:[%s6750_s1 + $0x3c0] sm:$0xff]  ;;  %v5665_v1 = vsel %vm1146_vm0, %v1168_v34, %v1170_v47 }
  0x24   : > { %4845 = vmatprep.subr.bf16.mxu0 %v5478_v40  ;;  %v5635_v48 = vsel %vm1146_vm0, %v1167_v32, %v1168_v34  ;;  %v3455_v56 = vld [vmem:[%s6750_s1 + $0x3c8] sm:$0xff]  ;;  %v5650_v57 = vld [vmem:[%s5427_s7 + $0x90] sm:$0xff]  ;;  %v4740_v61 = vpack.c.bf16 %v342_v44, %v341_v43  ;;  %6839 = vst [vmem:[#allocation17_spill] sm:$0xff] %v5665_v1  ;;  %v1175_v2 = vrot.slane %v5640_v53, 1  ;;  %v346_v25 = vld [vmem:[%s6750_s1 + $0x58] sm:$0xff] }
  0x25   : > { %6838 = vst [vmem:[#allocation16_spill] sm:$0xff] %v5635_v48  ;;  %v344_v0 = vld [vmem:[%s6750_s1 + $0x48] sm:$0xff]  ;;  %v4872_v6 = vpack.c.bf16 %v3455_v56, %v3454_v54  ;;  %v1177_v8 = vrot.slane %v5650_v57, 1  ;;  %v3456_v13 = vld [vmem:[%s6750_s1 + $0x3d0] sm:$0xff]  ;;  %v3458_v43 = vld [vmem:[%s6750_s1 + $0x3e0] sm:$0xff] }
  0x26   : > { %4719 = vmatpush3.bf16.msra.mxu1 %v4716_v39  ;;  %v5616_v39 = vld [vmem:[%s5427_s7 + $0x78] sm:$0xff]  ;;  %v5684_v16 = vld [vmem:[%s5427_s7 + $0xa8] sm:$0xff]  ;;  %v345_v24 = vld [vmem:[%s6750_s1 + $0x50] sm:$0xff] }
  0x27   : > { %4847 = vmatpush3.bf16.msra.mxu0 %v5478_v40  ;;  %4721 = vmatprep.subr.bf16.mxu1 %v4720_v45  ;;  %v1172_v50 = vrot.slane %v5616_v39, 1  ;;  %v1182_v37 = vrot.slane %v5684_v16, 1  ;;  %v3459_v44 = vld [vmem:[%s6750_s1 + $0x3e8] sm:$0xff]  ;;  %v5718_v47 = vld [vmem:[%s5427_s7 + $0xc0] sm:$0xff] }
  0x28   : > { %4849 = vmatprep.subr.bf16.mxu0 %v5494_v46  ;;  %v348_v54 = vld [vmem:[%s6750_s1 + $0x68] sm:$0xff] }
  0x29   : > { %v5891_v40 = vld [vmem:[%s5427_s7 + $0xe8] sm:$0x3] }
  0x2a   : > { %4723 = vmatpush3.bf16.msra.mxu1 %v4720_v45  ;;  %v5631_v45 = vsel %vm1146_vm0, %v1163_v14, %v1165_v28  ;;  %v3457_v14 = vld [vmem:[%s6750_s1 + $0x3d8] sm:$0xff]  ;;  %6848 = vst [vmem:[#allocation26_spill] sm:$0xff] %v5891_v40 }
  0x2b   : > { %4851 = vmatpush3.bf16.msra.mxu0 %v5494_v46  ;;  %4725 = vmatprep.subr.bf16.mxu1 %v4724_v51  ;;  %6837 = vst [vmem:[#allocation15_spill] sm:$0xff] %v5631_v45  ;;  %v4876_v34 = vpack.c.bf16 %v3457_v14, %v3456_v13  ;;  %v5742_v13 = vld [vmem:[%s5427_s7 + $0xd0] sm:$0x3]  ;;  %v5866_v46 = vld [vmem:[%s5427_s7 + $0x140] sm:$0xff] }
  0x2c   : > { %4853 = vmatprep.subr.bf16.mxu0 %v5510_v52 }
  0x2e   : > { %4727 = vmatpush3.bf16.msra.mxu1 %v4724_v51  ;;  %v1173_v51 = vrot.slane %v5619_v41, 1 }
  0x2f   : > { %4855 = vmatpush3.bf16.msra.mxu0 %v5510_v52  ;;  %4729 = vmatprep.subr.bf16.mxu1 %v4728_v60  ;;  %v3473_v52 = vld [vmem:[%s6750_s1 + $0x158] sm:$0xff] }
  0x30   : > { %4857 = vmatprep.subr.bf16.mxu0 %v4856_v62  ;;  %v5669_v3 = vsel %vm1146_vm0, %v1172_v50, %v1173_v51  ;;  %v5699_v28 = vsel %vm1146_vm0, %v1173_v51, %v1175_v2  ;;  %v4748_v50 = vpack.c.bf16 %v346_v25, %v345_v24  ;;  %v347_v51 = vld [vmem:[%s6750_s1 + $0x60] sm:$0xff]  ;;  %v1187_v2 = vrot.slane %v5718_v47, 1  ;;  %v350_v24 = vld [vmem:[%s6750_s1 + $0x78] sm:$0xff] }
  0x31   : > { %4009 = vmatmul.mubr.f32.vlgmr.msra.gmra.mrb[0].mxu1 %v5450_v29  ;;  %6840 = vst [vmem:[#allocation18_spill] sm:$0xff] %v5669_v3  ;;  %6841 = vst [vmem:[#allocation19_spill] sm:$0xff] %v5699_v28  ;;  %v4752_v14 = vpack.c.bf16 %v348_v54, %v347_v51  ;;  %v3399_v51 = vld [vmem:[%s6750_s1 + $0x308] sm:$0xff] }
  0x32   : > { %4329 = vmatmul.mubr.f32.vlgmr.msra.gmra.mrb[0].mxu0 %v5563_v9  ;;  %4731 = vmatpush3.bf16.msra.mxu1 %v4728_v60  ;;  %v5653_v60 = vld [vmem:[%s5427_s7 + $0x98] sm:$0xff] }
  0x33   : > { %4859 = vmatpush3.bf16.msra.mxu0 %v4856_v62  ;;  %4011 = vmatprep.mubr.f32.mxu1 %v5528_v58  ;;  %v343_v62 = vld [vmem:[%s6750_s1 + $0x40] sm:$0xff]  ;;  %v1178_v10 = vrot.slane %v5653_v60, 1 }
  0x34   : > { %4331 = vmatprep.mubr.f32.mxu0 %v5576_v18  ;;  %4861 = vmatprep.subr.bf16.mxu0 %v4860_v11  ;;  %v4744_v20 = vpack.c.bf16 %v344_v0, %v343_v62  ;;  %v4880_v0 = vpack.c.bf16 %v3459_v44, %v3458_v43 }
  0x35   : > { %4012 = vmatmul.mubr.f32.gmra.mrb[2].mxu1 %v5531_v59  ;;  %4733 = vmatprep.subr.bf16.mxu1 %v4732_v19  ;;  %v5703_v32 = vsel %vm1146_vm0, %v1177_v8, %v1178_v10 }
  0x36   : > { %4332 = vmatmul.mubr.f32.gmra.mrb[2].mxu0 %v5596_v27  ;;  %4014 = vmatprep.mubr.f32.mxu1 %v5548_v4  ;;  %6842 = vst [vmem:[#allocation20_spill] sm:$0xff] %v5703_v32 }
  0x37   : > { %4863 = vmatpush3.bf16.msra.mxu0 %v4860_v11  ;;  %4334 = vmatprep.mubr.f32.mxu0 %v5601_v30  ;;  %v5674_v11 = vld [vmem:[%s5427_s7 + $0xa0] sm:$0x3] }
  0x38   : > { %4865 = vmatprep.subr.bf16.mxu0 %v4864_v31  ;;  %4735 = vmatpush3.bf16.msra.mxu1 %v4732_v19  ;;  %v5687_v19 = vld [vmem:[%s5427_s7 + $0xb0] sm:$0xff] }
  0x39   : > { %4015 = vmatmul.mubr.f32.gmra.mrb[4].mxu1 %v5551_v5  ;;  %4737 = vmatprep.subr.bf16.mxu1 %v4736_v42  ;;  %v1183_v38 = vrot.slane %v5687_v19, 1 }
  0x3a   : > { %4335 = vmatmul.mubr.f32.gmra.mrb[4].mxu0 %v5631_v45  ;;  %4017 = vmatprep.mubr.f32.mxu1 %v5582_v21 }
  0x3b   : > { %4867 = vmatpush3.bf16.msra.mxu0 %v4864_v31  ;;  %4337 = vmatprep.mubr.f32.mxu0 %v5635_v48  ;;  %v1180_v31 = vrot.slane %v5674_v11, 1  ;;  %v5737_v62 = vsel %vm1146_vm0, %v1182_v37, %v1183_v38 }
  0x3c   : > { %4869 = vmatprep.subr.bf16.mxu0 %v4868_v49  ;;  %4739 = vmatpush3.bf16.msra.mxu1 %v4736_v42  ;;  %v5708_v42 = vld [vmem:[%s5427_s7 + $0xb8] sm:$0x3]  ;;  %6844 = vst [vmem:[#allocation22_spill] sm:$0xff] %v5737_v62 }
  0x3d   : > { %4018 = vmatmul.mubr.f32.gmra.mrb[6].mxu1 %v5585_v22  ;;  %4741 = vmatprep.subr.bf16.mxu1 %v4740_v61  ;;  %v5733_v56 = vsel %vm1146_vm0, %v1178_v10, %v1180_v31  ;;  %v3461_v10 = vld [vmem:[%s6750_s1 + $0x3f8] sm:$0xff]  ;;  %v1190_v31 = vrot.slane %v5742_v13, 1 }
  0x3e   : > { %4338 = vmatmul.mubr.f32.gmra.mrb[6].mxu0 %v5665_v1  ;;  %4020 = vmatprep.mubr.f32.mxu1 %v5616_v39  ;;  %6843 = vst [vmem:[#allocation21_spill] sm:$0xff] %v5733_v56 }
  0x3f   : > { %4871 = vmatpush3.bf16.msra.mxu0 %v4868_v49  ;;  %4340 = vmatprep.mubr.f32.mxu0 %v5669_v3  ;;  %v5721_v49 = vld [vmem:[%s5427_s7 + $0xc8] sm:$0xff] }
  0x40   : > { %4873 = vmatprep.subr.bf16.mxu0 %v4872_v6  ;;  %4743 = vmatpush3.bf16.msra.mxu1 %v4740_v61  ;;  %v1185_v61 = vrot.slane %v5708_v42, 1  ;;  %v1188_v8 = vrot.slane %v5721_v49, 1 }
  0x41   : > { %4021 = vmatmul.mubr.f32.gmra.mrb[8].mxu1 %v5619_v41  ;;  %4745 = vmatprep.subr.bf16.mxu1 %v4744_v20 }
  0x42   : > { %4341 = vmatmul.mubr.f32.gmra.mrb[8].mxu0 %v5699_v28  ;;  %4023 = vmatprep.mubr.f32.mxu1 %v5650_v57  ;;  %v5761_v25 = vsel %vm1146_vm0, %v1183_v38, %v1185_v61  ;;  %v5765_v37 = vsel %vm1146_vm0, %v1187_v2, %v1188_v8  ;;  %v3463_v38 = vld [vmem:[%s6750_s1 + $0x108] sm:$0xff]  ;;  %v5784_v54 = vsel %vm1146_vm0, %v1188_v8, %v1190_v31  ;;  %v5787_v61 = vld [vmem:[%s5427_s7 + $0xd8] sm:$0xff]  ;;  %v5801_v8 = vld [vmem:[%s5427_s7 + $0xe0] sm:$0xff] }
  0x43   : > { %4875 = vmatpush3.bf16.msra.mxu0 %v4872_v6  ;;  %4343 = vmatprep.mubr.f32.mxu0 %v5703_v32  ;;  %v3460_v6 = vld [vmem:[%s6750_s1 + $0x3f0] sm:$0xff]  ;;  %6845 = vst [vmem:[#allocation23_spill] sm:$0xff] %v5761_v25  ;;  %6846 = vst [vmem:[#allocation24_spill] sm:$0xff] %v5765_v37  ;;  %v3467_v31 = vld [vmem:[%s6750_s1 + $0x128] sm:$0xff] }
  0x44   : > { %4877 = vmatprep.subr.bf16.mxu0 %v4876_v34  ;;  %4747 = vmatpush3.bf16.msra.mxu1 %v4744_v20  ;;  %v349_v20 = vld [vmem:[%s6750_s1 + $0x70] sm:$0xff]  ;;  %v4884_v43 = vpack.c.bf16 %v3461_v10, %v3460_v6  ;;  %6847 = vst [vmem:[#allocation25_spill] sm:$0xff] %v5784_v54 }
  0x45   : > { %4024 = vmatmul.mubr.f32.gmra.mrb[10].mxu1 %v5653_v60  ;;  %4749 = vmatprep.subr.bf16.mxu1 %v4748_v50  ;;  %v4756_v44 = vpack.c.bf16 %v350_v24, %v349_v20  ;;  %v3464_v6 = vld [vmem:[%s6750_s1 + $0x110] sm:$0xff]  ;;  %v3466_v24 = vld [vmem:[%s6750_s1 + $0x120] sm:$0xff] }
  0x46   : > { %4344 = vmatmul.mubr.f32.gmra.mrb[10].mxu0 %v5733_v56  ;;  %4026 = vmatprep.mubr.f32.mxu1 %v5684_v16 }
  0x47   : > { %4879 = vmatpush3.bf16.msra.mxu0 %v4876_v34  ;;  %4346 = vmatprep.mubr.f32.mxu0 %v5737_v62  ;;  %v3462_v34 = vld [vmem:[%s6750_s1 + $0x100] sm:$0xff] }
  0x48   : > { %4881 = vmatprep.subr.bf16.mxu0 %v4880_v0  ;;  %4751 = vmatpush3.bf16.msra.mxu1 %v4748_v50  ;;  %v3398_v50 = vld [vmem:[%s6750_s1 + $0x300] sm:$0xff]  ;;  %v4888_v2 = vpack.c.bf16 %v3463_v38, %v3462_v34  ;;  %v5822_v34 = vld [vmem:[%s5427_s7 + $0x108] sm:$0xff]  ;;  %v4896_v38 = vpack.c.bf16 %v3467_v31, %v3466_v24  ;;  %v5854_v31 = vld [vmem:[%s5427_s7 + $0x138] sm:$0xff] }
  0x49   : > { %4027 = vmatmul.mubr.f32.gmra.mrb[12].mxu1 %v5687_v19  ;;  %4753 = vmatprep.subr.bf16.mxu1 %v4752_v14  ;;  %v5796_v10 = vpack.c.bf16 %v3399_v51, %v3398_v50  ;;  %v3469_v50 = vld [vmem:[%s6750_s1 + $0x138] sm:$0xff]  ;;  %v5834_v51 = vld [vmem:[%s5427_s7 + $0x110] sm:$0xff]  ;;  %v3471_v24 = vld [vmem:[%s6750_s1 + $0x148] sm:$0xff] }
  0x4a   : > { %4347 = vmatmul.mubr.f32.gmra.mrb[12].mxu0 %v5761_v25  ;;  %4029 = vmatprep.mubr.f32.mxu1 %v5718_v47 }
  0x4b   : > { %4883 = vmatpush3.bf16.msra.mxu0 %v4880_v0  ;;  %4349 = vmatprep.mubr.f32.mxu0 %v5765_v37  ;;  %v3465_v0 = vld [vmem:[%s6750_s1 + $0x118] sm:$0xff] }
  0x4c   : > { %4885 = vmatprep.subr.bf16.mxu0 %v4884_v43  ;;  %4755 = vmatpush3.bf16.msra.mxu1 %v4752_v14  ;;  %v5805_v14 = vld [vmem:[%s5427_s7 + $0xf0] sm:$0xff]  ;;  %v4892_v20 = vpack.c.bf16 %v3465_v0, %v3464_v6  ;;  %v3470_v0 = vld [vmem:[%s6750_s1 + $0x140] sm:$0xff] }
  0x4d   : > { %4030 = vmatmul.mubr.f32.gmra.mrb[14].mxu1 %v5721_v49  ;;  %4757 = vmatprep.subr.bf16.mxu1 %v4756_v44  ;;  %v1197_v33 = vrot.slane %v5805_v14, 1 }
  0x4e   : > { %4350 = vmatmul.mubr.f32.gmra.mrb[14].mxu0 %v5784_v54  ;;  %4032 = vmatprep.mubr.f32.mxu1 %v5787_v61 }
  0x4f   : > { %4887 = vmatpush3.bf16.msra.mxu0 %v4884_v43  ;;  %4408 = vmatprep.mubr.f32.mxu0 %v5576_v18  ;;  %v5818_v43 = vld [vmem:[%s5427_s7 + $0xf8] sm:$0xff] }
  0x50   : > { %4889 = vmatprep.subr.bf16.mxu0 %v4888_v2  ;;  %4759 = vmatpush3.bf16.msra.mxu1 %v4756_v44  ;;  %v3468_v44 = vld [vmem:[%s6750_s1 + $0x130] sm:$0xff]  ;;  %v5945_v18 = vld [vmem:[%s5427_s7 + $0x118] sm:$0x3] }
  0x51   : > { %4033 = vmatmul.mubr.f32.gmra.mrb[16].mxu1 %v5801_v8  ;;  %4761 = vmatprep.subr.bf16.mxu1 %v5796_v10  ;;  %v4900_v6 = vpack.c.bf16 %v3469_v50, %v3468_v44  ;;  %v4904_v44 = vpack.c.bf16 %v3471_v24, %v3470_v0  ;;  %v3472_v50 = vld [vmem:[%s6750_s1 + $0x150] sm:$0xff]  ;;  %v3474_v24 = vld [vmem:[%s6750_s1 + $0x160] sm:$0xff]  ;;  %v1205_v12 = vrot.slane %v5945_v18, 1 }
  0x52   : > { %4409 = vmatmul.mubr.f32.vlgmr.msra.gmra.mrb[0].mxu0 %v5596_v27  ;;  %4035 = vmatprep.mubr.f32.mxu1 %v5805_v14  ;;  %v4908_v0 = vpack.c.bf16 %v3473_v52, %v3472_v50  ;;  %v5886_v52 = vld [vmem:[%s5427_s7 + $0x168] sm:$0xff]  ;;  %v1193_v50 = vrot.slane %v5801_v8, 1  ;;  %v1203_v27 = vrot.slane %v5834_v51, 1 }
  0x53   : > { %4891 = vmatpush3.bf16.msra.mxu0 %v4888_v2  ;;  %4411 = vmatprep.mubr.f32.mxu0 %v5601_v30  ;;  %v5838_v2 = vld [vmem:[%s5427_s7 + $0x120] sm:$0xff]  ;;  %v1202_v30 = vrot.slane %v5822_v34, 1 }
  0x54   : > { %4893 = vmatprep.subr.bf16.mxu0 %v4892_v20 }
  0x55   : > { %4036 = vmatmul.mubr.f32.gmra.mrb[18].mxu1 %v5818_v43  ;;  %v5970_v9 = vsel %vm1146_vm0, %v1202_v30, %v1203_v27  ;;  %v3402_v30 = vld [vmem:[%s6750_s1 + $0x320] sm:$0xff] }
  0x56   : > { %4412 = vmatmul.mubr.f32.gmra.mrb[2].mxu0 %v5631_v45  ;;  %4038 = vmatprep.mubr.f32.mxu1 %v5822_v34  ;;  %6856 = vst [vmem:[#allocation34_spill] sm:$0xff] %v5970_v9 }
  0x57   : > { %4414 = vmatprep.mubr.f32.mxu0 %v5635_v48  ;;  %4895 = vmatpush3.bf16.msra.mxu0 %v4892_v20  ;;  %v5850_v20 = vld [vmem:[%s5427_s7 + $0x128] sm:$0xff]  ;;  %v5916_v48 = vld [vmem:[%s5427_s7 + $0x100] sm:$0x3] }
  0x58   : > { %4897 = vmatprep.subr.bf16.mxu0 %v4896_v38  ;;  %6851 = vst [vmem:[#allocation29_spill] sm:$0xff] %v5916_v48  ;;  %v1200_v23 = vrot.slane %v5916_v48, 1  ;;  %v1208_v7 = vrot.slane %v5850_v20, 1 }
  0x59   : > { %4039 = vmatmul.mubr.f32.gmra.mrb[20].mxu1 %v5834_v51 }
  0x5a   : > { %4415 = vmatmul.mubr.f32.gmra.mrb[4].mxu0 %v5665_v1  ;;  %4041 = vmatprep.mubr.f32.mxu1 %v5838_v2 }
  0x5b   : > { %4417 = vmatprep.mubr.f32.mxu0 %v5669_v3  ;;  %4899 = vmatpush3.bf16.msra.mxu0 %v4896_v38  ;;  %v5870_v38 = vld [vmem:[%s5427_s7 + $0x150] sm:$0xff] }
  0x5c   : > { %4901 = vmatprep.subr.bf16.mxu0 %v4900_v6  ;;  %v3476_v3 = vld [vmem:[%s6750_s1 + $0x170] sm:$0xff] }
  0x5d   : > { %4042 = vmatmul.mubr.f32.gmra.mrb[22].mxu1 %v5850_v20 }
  0x5e   : > { %4418 = vmatmul.mubr.f32.gmra.mrb[6].mxu0 %v5699_v28  ;;  %4044 = vmatprep.mubr.f32.mxu1 %v5854_v31  ;;  %v3475_v28 = vld [vmem:[%s6750_s1 + $0x168] sm:$0xff] }
  0x5f   : > { %4420 = vmatprep.mubr.f32.mxu0 %v5703_v32  ;;  %4903 = vmatpush3.bf16.msra.mxu0 %v4900_v6  ;;  %v5882_v32 = vld [vmem:[%s5427_s7 + $0x158] sm:$0xff]  ;;  %v1192_v6 = vrot.slane %v5787_v61, 1 }
  0x60   : > { %4905 = vmatprep.subr.bf16.mxu0 %v4904_v44 }
  0x61   : > { %4045 = vmatmul.mubr.f32.gmra.mrb[24].mxu1 %v5866_v46  ;;  %v5911_v1 = vsel %vm1146_vm0, %v1192_v6, %v1193_v50  ;;  %v5928_v6 = vld [vmem:[%s5427_s7 + $0x188] sm:$0xff] }
  0x62   : > { %4421 = vmatmul.mubr.f32.gmra.mrb[8].mxu0 %v5733_v56  ;;  %4047 = vmatprep.mubr.f32.mxu1 %v5870_v38  ;;  %v4912_v56 = vpack.c.bf16 %v3475_v28, %v3474_v24  ;;  %v5907_v28 = vld [vmem:[%s5427_s7 + $0x180] sm:$0xff]  ;;  %v1195_v24 = vrot.slane %v5891_v40, 1  ;;  %6850 = vst [vmem:[#allocation28_spill] sm:$0xff] %v5911_v1  ;;  %6852 = vst [vmem:[#allocation30_spill] sm:$0xff] %v5928_v6  ;;  %v5977_v40 = vld [vmem:[%s5427_s7 + $0x130] sm:$0x3] }
  0x63   : > { %4423 = vmatprep.mubr.f32.mxu0 %v5737_v62  ;;  %4907 = vmatpush3.bf16.msra.mxu0 %v4904_v44  ;;  %v3477_v62 = vld [vmem:[%s6750_s1 + $0x178] sm:$0xff]  ;;  %v5903_v44 = vld [vmem:[%s5427_s7 + $0x170] sm:$0xff]  ;;  %6849 = vst [vmem:[#allocation27_spill] sm:$0xff] %v5907_v28 }
  0x64   : > { %4909 = vmatprep.subr.bf16.mxu0 %v4908_v0  ;;  %v4916_v45 = vpack.c.bf16 %v3477_v62, %v3476_v3  ;;  %v5932_v3 = vsel %vm1146_vm0, %v1193_v50, %v1195_v24  ;;  %v5935_v62 = vld [vmem:[%s5427_s7] sm:$0xff]  ;;  %v5951_v24 = vld [vmem:[%s5427_s7 + $0x8] sm:$0xff] }
  0x65   : > { %4048 = vmatmul.mubr.f32.gmra.mrb[26].mxu1 %v5882_v32  ;;  %6853 = vst [vmem:[#allocation31_spill] sm:$0xff] %v5932_v3 }
  0x66   : > { %4424 = vmatmul.mubr.f32.gmra.mrb[10].mxu0 %v5761_v25  ;;  %4050 = vmatprep.mubr.f32.mxu1 %v5886_v52  ;;  %v1198_v25 = vrot.slane %v5818_v43, 1 }
  0x67   : > { %4426 = vmatprep.mubr.f32.mxu0 %v5765_v37  ;;  %4911 = vmatpush3.bf16.msra.mxu0 %v4908_v0  ;;  %v3478_v37 = vld [vmem:[%s6750_s1 + $0x280] sm:$0xff]  ;;  %v3479_v0 = vld [vmem:[%s6750_s1 + $0x288] sm:$0xff] }
  0x68   : > { %4913 = vmatprep.subr.bf16.mxu0 %v4912_v56  ;;  %v5942_v17 = vsel %vm1146_vm0, %v1197_v33, %v1198_v25  ;;  %v5947_v50 = vpack.c.bf16 %v3479_v0, %v3478_v37  ;;  %v5962_v33 = vld [vmem:[%s5427_s7 + $0x10] sm:$0x3]  ;;  %v1148_v37 = vrot.slane %v5951_v24, 1  ;;  %v5967_v0 = vsel %vm1146_vm0, %v1198_v25, %v1200_v23 }
  0x69   : > { %4051 = vmatmul.mubr.f32.gmra.mrb[28].mxu1 %v5903_v44  ;;  %6854 = vst [vmem:[#allocation32_spill] sm:$0xff] %v5942_v17  ;;  %6855 = vst [vmem:[#allocation33_spill] sm:$0xff] %v5967_v0  ;;  %v1150_v36 = vrot.slane %v5962_v33, 1  ;;  %v5998_v25 = vsel %vm1146_vm0, %v1203_v27, %v1205_v12  ;;  %v3404_v12 = vld [vmem:[%s6750_s1 + $0x330] sm:$0xff]  ;;  %v3405_v27 = vld [vmem:[%s6750_s1 + $0x338] sm:$0xff] }
  0x6a   : > { %4427 = vmatmul.mubr.f32.gmra.mrb[12].mxu0 %v5784_v54  ;;  %4053 = vmatprep.mubr.f32.mxu1 %v5907_v28  ;;  %v1147_v54 = vrot.slane %v5935_v62, 1  ;;  %6859 = vst [vmem:[#allocation37_spill] sm:$0xff] %v5998_v25 }
  0x6b   : > { %4429 = vmatprep.mubr.f32.mxu0 %v5911_v1  ;;  %4915 = vmatpush3.bf16.msra.mxu0 %v4912_v56  ;;  %v3400_v1 = vld [vmem:[%s6750_s1 + $0x310] sm:$0xff]  ;;  %v3401_v56 = vld [vmem:[%s6750_s1 + $0x318] sm:$0xff] }
  0x6c   : > { %4917 = vmatprep.subr.bf16.mxu0 %v4916_v45  ;;  %v4764_v48 = vpack.c.bf16 %v3401_v56, %v3400_v1  ;;  %v5981_v23 = vsel %vm1146_vm0, %v1147_v54, %v1148_v37  ;;  %v5991_v1 = vsel %vm1146_vm0, %v1148_v37, %v1150_v36  ;;  %v1210_v54 = vrot.slane %v5977_v40, 1 }
  0x6d   : > { %4054 = vmatmul.mubr.f32.gmra.mrb[30].mxu1 %v5928_v6  ;;  %6857 = vst [vmem:[#allocation35_spill] sm:$0xff] %v5981_v23  ;;  %6858 = vst [vmem:[#allocation36_spill] sm:$0xff] %v5991_v1  ;;  %v1212_v36 = vrot.slane %v5854_v31, 1  ;;  %v1213_v37 = vrot.slane %v5866_v46, 1  ;;  %v4772_v1 = vpack.c.bf16 %v3405_v27, %v3404_v12  ;;  %v1222_v27 = vrot.slane %v5886_v52, 1 }
  0x6e   : > { %4430 = vmatmul.mubr.f32.gmra.mrb[14].mxu0 %v5932_v3  ;;  %4088 = vmatprep.mubr.f32.mxu1 %v5935_v62  ;;  %v1207_v3 = vrot.slane %v5838_v2, 1  ;;  %v6051_v23 = vld [vmem:[%s5427_s7 + $0x178] sm:$0x3] }
  0x6f   : > { %4432 = vmatprep.mubr.f32.mxu0 %v5942_v17  ;;  %4919 = vmatpush3.bf16.msra.mxu0 %v4916_v45  ;;  %v3403_v45 = vld [vmem:[%s6750_s1 + $0x328] sm:$0xff]  ;;  %v1218_v17 = vrot.slane %v5882_v32, 1  ;;  %6866 = vst [vmem:[#allocation44_spill] sm:$0xff] %v6051_v23 }
  0x70   : > { %4921 = vmatprep.subr.bf16.mxu0 %v5947_v50  ;;  %v6002_v56 = vsel %vm1146_vm0, %v1207_v3, %v1208_v7  ;;  %v6020_v3 = vsel %vm1146_vm0, %v1208_v7, %v1210_v54  ;;  %v3406_v7 = vld [vmem:[%s6750_s1 + $0x340] sm:$0xff] }
  0x71   : > { %4089 = vmatmul.mubr.f32.vlgmr.msra.gmra.mrb[0].mxu1 %v5951_v24  ;;  %6860 = vst [vmem:[#allocation38_spill] sm:$0xff] %v6002_v56  ;;  %6861 = vst [vmem:[#allocation39_spill] sm:$0xff] %v6020_v3 }
  0x72   : > { %4433 = vmatmul.mubr.f32.gmra.mrb[16].mxu0 %v5967_v0  ;;  %4763 = vmatpush3.bf16.msra.mxu1 %v5796_v10  ;;  %v6007_v0 = vld [vmem:[%s5427_s7 + $0x148] sm:$0x3]  ;;  %v4768_v10 = vpack.c.bf16 %v3403_v45, %v3402_v30  ;;  %v6024_v45 = vsel %vm1146_vm0, %v1212_v36, %v1213_v37 }
  0x73   : > { %4091 = vmatprep.mubr.f32.mxu1 %v5440_v26  ;;  %4435 = vmatprep.mubr.f32.mxu0 %v5970_v9  ;;  %v1215_v30 = vrot.slane %v6007_v0, 1  ;;  %6862 = vst [vmem:[#allocation40_spill] sm:$0xff] %v6024_v45  ;;  %v1217_v9 = vrot.slane %v5870_v38, 1 }
  0x74   : > { %4765 = vmatprep.subr.bf16.mxu1 %v4764_v48 }
  0x75   : > { %4092 = vmatmul.mubr.f32.gmra.mrb[2].mxu1 %v5450_v29  ;;  %v6042_v54 = vsel %vm1146_vm0, %v1213_v37, %v1215_v30  ;;  %v6046_v12 = vsel %vm1146_vm0, %v1217_v9, %v1218_v17  ;;  %v3408_v37 = vld [vmem:[%s6750_s1 + $0x350] sm:$0xff]  ;;  %v3409_v9 = vld [vmem:[%s6750_s1 + $0x358] sm:$0xff]  ;;  %v1225_v30 = vrot.slane %v6051_v23, 1  ;;  %v6101_v23 = vld [vmem:[%s5427_s7 + $0x1a8] sm:$0x3] }
  0x76   : > { %4436 = vmatmul.mubr.f32.gmra.mrb[18].mxu0 %v5998_v25  ;;  %4094 = vmatprep.mubr.f32.mxu1 %v5528_v58  ;;  %v6029_v25 = vld [vmem:[%s5427_s7 + $0x160] sm:$0x3]  ;;  %6864 = vst [vmem:[#allocation42_spill] sm:$0xff] %v6042_v54  ;;  %6865 = vst [vmem:[#allocation43_spill] sm:$0xff] %v6046_v12 }
  0x77   : > { %4438 = vmatprep.mubr.f32.mxu0 %v6002_v56  ;;  %4767 = vmatpush3.bf16.msra.mxu1 %v4764_v48  ;;  %6863 = vst [vmem:[#allocation41_spill] sm:$0xff] %v6029_v25  ;;  %v3407_v48 = vld [vmem:[%s6750_s1 + $0x348] sm:$0xff]  ;;  %v1220_v36 = vrot.slane %v6029_v25, 1  ;;  %v1223_v56 = vrot.slane %v5903_v44, 1  ;;  %v6073_v25 = vld [vmem:[%s5427_s7 + $0x190] sm:$0x3] }
  0x78   : > { %4769 = vmatprep.subr.bf16.mxu1 %v4768_v10  ;;  %6869 = vst [vmem:[#allocation47_spill] sm:$0xff] %v6073_v25 }
  0x79   : > { %4095 = vmatmul.mubr.f32.gmra.mrb[4].mxu1 %v5531_v59 }
  0x7a   : > { %4439 = vmatmul.mubr.f32.gmra.mrb[20].mxu0 %v6020_v3  ;;  %4097 = vmatprep.mubr.f32.mxu1 %v5548_v4  ;;  %v4776_v3 = vpack.c.bf16 %v3407_v48, %v3406_v7  ;;  %v6068_v7 = vsel %vm1146_vm0, %v1222_v27, %v1223_v56  ;;  %v1227_v48 = vrot.slane %v5907_v28, 1  ;;  %v6092_v27 = vsel %vm1146_vm0, %v1223_v56, %v1225_v30  ;;  %v3412_v56 = vld [vmem:[%s6750_s1 + $0x370] sm:$0xff] }
  0x7b   : > { %4441 = vmatprep.mubr.f32.mxu0 %v6024_v45  ;;  %4771 = vmatpush3.bf16.msra.mxu1 %v4768_v10  ;;  %v6064_v10 = vsel %vm1146_vm0, %v1218_v17, %v1220_v36  ;;  %6868 = vst [vmem:[#allocation46_spill] sm:$0xff] %v6068_v7  ;;  %v1228_v45 = vrot.slane %v5928_v6, 1  ;;  %v6080_v17 = vld [vmem:[%s5427_s7 + $0x1a0] sm:$0xff]  ;;  %v3411_v36 = vld [vmem:[%s6750_s1 + $0x368] sm:$0xff] }
  0x7c   : > { %4773 = vmatprep.subr.bf16.mxu1 %v4772_v1  ;;  %6867 = vst [vmem:[#allocation45_spill] sm:$0xff] %v6064_v10  ;;  %v1233_v28 = vrot.slane %v6080_v17, 1 }
  0x7d   : > { %4098 = vmatmul.mubr.f32.gmra.mrb[6].mxu1 %v5551_v5 }
  0x7e   : > { %4442 = vmatmul.mubr.f32.gmra.mrb[22].mxu0 %v6042_v54  ;;  %4100 = vmatprep.mubr.f32.mxu1 %v5582_v21  ;;  %v6076_v54 = vld [vmem:[%s5427_s7 + $0x198] sm:$0xff] }
  0x7f   : > { %4444 = vmatprep.mubr.f32.mxu0 %v6046_v12  ;;  %4775 = vmatpush3.bf16.msra.mxu1 %v4772_v1  ;;  %v4780_v12 = vpack.c.bf16 %v3409_v9, %v3408_v37  ;;  %v3410_v1 = vld [vmem:[%s6750_s1 + $0x360] sm:$0xff]  ;;  %v1230_v37 = vrot.slane %v6073_v25, 1  ;;  %v6096_v9 = vsel %vm1146_vm0, %v1227_v48, %v1228_v45  ;;  %v1232_v6 = vrot.slane %v6076_v54, 1 }
  0x80   : > { %4777 = vmatprep.subr.bf16.mxu1 %v4776_v3  ;;  %6870 = vst [vmem:[#allocation48_spill] sm:$0xff] %v6096_v9  ;;  %v1235_v48 = vrot.slane %v6101_v23, 1 }
  0x81   : > { %4101 = vmatmul.mubr.f32.gmra.mrb[8].mxu1 %v5585_v22  ;;  %v6114_v30 = vsel %vm1146_vm0, %v1228_v45, %v1230_v37  ;;  %v3415_v45 = vld [vmem:[%s6750_s1 + $0x88] sm:$0xff]  ;;  %v2102_v37 = vrot.slane %v5450_v29, 2  ;;  %v2104_v29 = vrot.slane %v5519_v55, 2 }
  0x82   : > { %4445 = vmatmul.mubr.f32.gmra.mrb[24].mxu0 %v6064_v10  ;;  %4103 = vmatprep.mubr.f32.mxu1 %v5616_v39  ;;  %v4784_v10 = vpack.c.bf16 %v3411_v36, %v3410_v1  ;;  %6871 = vst [vmem:[#allocation49_spill] sm:$0xff] %v6114_v30  ;;  %v2096_v1 = vrot.slane %v5935_v62, 2  ;;  %v1234_v36 = vsel %vm1146_vm0, %v1232_v6, %v1233_v28  ;;  %v2099_v62 = vrot.slane %v5962_v33, 2  ;;  %v3483_v55 = vld [vmem:[%s6750_s1 + $0x2a8] sm:$0xff] }
  0x83   : > { %4447 = vmatprep.mubr.f32.mxu0 %v6068_v7  ;;  %4779 = vmatpush3.bf16.msra.mxu1 %v4776_v3  ;;  %v3413_v3 = vld [vmem:[%s6750_s1 + $0x378] sm:$0xff]  ;;  %v2097_v7 = vrot.slane %v5951_v24, 2  ;;  %v1236_v6 = vsel %vm1146_vm0, %v1233_v28, %v1235_v48 }
  0x84   : > { %4781 = vmatprep.subr.bf16.mxu1 %v4780_v12  ;;  %v4788_v25 = vpack.c.bf16 %v3413_v3, %v3412_v56  ;;  %v3480_v3 = vld [vmem:[%s6750_s1 + $0x290] sm:$0xff]  ;;  %v3481_v28 = vld [vmem:[%s6750_s1 + $0x298] sm:$0xff] }
  0x85   : > { %4104 = vmatmul.mubr.f32.gmra.mrb[10].mxu1 %v5619_v41  ;;  %v2098_v24 = vsel %vm2095_vm1, %v2096_v1, %v2097_v7  ;;  %v4924_v48 = vpack.c.bf16 %v3481_v28, %v3480_v3  ;;  %v3482_v1 = vld [vmem:[%s6750_s1 + $0x2a0] sm:$0xff]  ;;  %v3487_v3 = vld [vmem:[%s6750_s1 + $0x2c8] sm:$0xff]  ;;  %v2121_v28 = vrot.slane %v5616_v39, 2 }
  0x86   : > { %4448 = vmatmul.mubr.f32.gmra.mrb[26].mxu0 %v6092_v27  ;;  %4106 = vmatprep.mubr.f32.mxu1 %v5650_v57 }
  0x87   : > { %4450 = vmatprep.mubr.f32.mxu0 %v6096_v9  ;;  %4783 = vmatpush3.bf16.msra.mxu1 %v4780_v12  ;;  %v3414_v9 = vld [vmem:[%s6750_s1 + $0x80] sm:$0xff]  ;;  %v2101_v12 = vrot.slane %v5440_v26, 2  ;;  %v2100_v26 = vsel %vm2095_vm1, %v2097_v7, %v2099_v62  ;;  %v2111_v7 = vrot.slane %v5548_v4, 2  ;;  %v2114_v4 = vrot.slane %v5569_v15, 2 }
  0x88   : > { %4785 = vmatprep.subr.bf16.mxu1 %v4784_v10  ;;  %v6134_v56 = vpack.c.bf16 %v3415_v45, %v3414_v9  ;;  %v2107_v9 = vrot.slane %v5531_v59, 2  ;;  %v2109_v59 = vrot.slane %v5537_v63, 2  ;;  %v4928_v45 = vpack.c.bf16 %v3483_v55, %v3482_v1 }
  0x89   : > { %4107 = vmatmul.mubr.f32.gmra.mrb[12].mxu1 %v5653_v60  ;;  %v6147_v33 = vsel %vm2095_vm1, %v2101_v12, %v2102_v37  ;;  %v2116_v62 = vrot.slane %v5582_v21, 2  ;;  %v2119_v21 = vrot.slane %v5606_v35, 2  ;;  %v3489_v35 = vld [vmem:[%s6750_s1 + $0x2d8] sm:$0xff]  ;;  %v2126_v1 = vrot.slane %v5650_v57, 2 }
  0x8a   : > { %4451 = vmatmul.mubr.f32.gmra.mrb[28].mxu0 %v6114_v30  ;;  %4109 = vmatprep.mubr.f32.mxu1 %v5684_v16  ;;  %v6182_v63 = vsel %vm2095_vm1, %v2107_v9, %v2109_v59  ;;  %v2127_v55 = vrot.slane %v5653_v60, 2  ;;  %v5287_v30 = vld [vmem:[%s5427_s7 + $0x68] sm:$0xff] }
  0x8b   : > { %4453 = vmatprep.mubr.f32.mxu0 %v1234_v36  ;;  %4787 = vmatpush3.bf16.msra.mxu1 %v4784_v10  ;;  %v2106_v10 = vrot.slane %v5528_v58, 2  ;;  %v6163_v58 = vsel %vm2095_vm1, %v2102_v37, %v2104_v29  ;;  %v2112_v36 = vrot.slane %v5551_v5, 2  ;;  %v3486_v37 = vld [vmem:[%s6750_s1 + $0x2c0] sm:$0xff] }
  0x8c   : > { %4789 = vmatprep.subr.bf16.mxu1 %v4788_v25  ;;  %v4936_v29 = vpack.c.bf16 %v3487_v3, %v3486_v37  ;;  %v2134_v37 = vrot.slane %v5708_v42, 2  ;;  %v3495_v42 = vld [vmem:[%s6750_s1 + $0x408] sm:$0xff] }
  0x8d   : > { %4110 = vmatmul.mubr.f32.gmra.mrb[14].mxu1 %v5687_v19  ;;  %v6186_v5 = vsel %vm2095_vm1, %v2111_v7, %v2112_v36  ;;  %v6201_v15 = vsel %vm2095_vm1, %v2112_v36, %v2114_v4  ;;  %v3490_v7 = vld [vmem:[%s6750_s1 + $0x2e0] sm:$0xff]  ;;  %v2132_v4 = vrot.slane %v5687_v19, 2 }
  0x8e   : > { %4454 = vmatmul.mubr.f32.gmra.mrb[30].mxu0 %v1236_v6  ;;  %4112 = vmatprep.mubr.f32.mxu1 %v5718_v47  ;;  %v3485_v6 = vld [vmem:[%s6750_s1 + $0x2b8] sm:$0xff] }
  0x8f   : > { %4488 = vmatprep.mubr.f32.mxu0 %v2098_v24  ;;  %4791 = vmatpush3.bf16.msra.mxu1 %v4788_v25  ;;  %v6167_v25 = vsel %vm2095_vm1, %v2106_v10, %v2107_v9  ;;  %v2117_v24 = vrot.slane %v5585_v22, 2  ;;  %v3488_v10 = vld [vmem:[%s6750_s1 + $0x2d0] sm:$0xff]  ;;  %v2124_v9 = vrot.slane %v5640_v53, 2  ;;  %v3491_v53 = vld [vmem:[%s6750_s1 + $0x2e8] sm:$0xff] }
  0x90   : > { %4793 = vmatprep.subr.bf16.mxu1 %v6134_v56  ;;  %v4940_v59 = vpack.c.bf16 %v3489_v35, %v3488_v10  ;;  %v6277_v10 = vsel %vm2095_vm1, %v2132_v4, %v2134_v37  ;;  %v2139_v35 = vrot.slane %v5742_v13, 2  ;;  %v3417_v13 = vld [vmem:[%s6750_s1 + $0x98] sm:$0xff] }
  0x91   : > { %4113 = vmatmul.mubr.f32.gmra.mrb[16].mxu1 %v5721_v49  ;;  %v6205_v22 = vsel %vm2095_vm1, %v2116_v62, %v2117_v24  ;;  %v4944_v62 = vpack.c.bf16 %v3491_v53, %v3490_v7  ;;  %v3416_v7 = vld [vmem:[%s6750_s1 + $0x90] sm:$0xff] }
  0x92   : > { %4489 = vmatmul.mubr.f32.vlgmr.msra.gmra.mrb[0].mxu0 %v2100_v26  ;;  %4115 = vmatprep.mubr.f32.mxu1 %v5787_v61  ;;  %v2122_v26 = vrot.slane %v5619_v41, 2  ;;  %v6220_v41 = vsel %vm2095_vm1, %v2117_v24, %v2119_v21  ;;  %v3492_v24 = vld [vmem:[%s6750_s1 + $0x2f0] sm:$0xff]  ;;  %v2136_v21 = vrot.slane %v5718_v47, 2  ;;  %v4796_v37 = vpack.c.bf16 %v3417_v13, %v3416_v7 }
  0x93   : > { %4923 = vmatpush3.bf16.msra.mxu0 %v5947_v50  ;;  %4491 = vmatprep.mubr.f32.mxu0 %v6147_v33  ;;  %v3484_v50 = vld [vmem:[%s6750_s1 + $0x2b0] sm:$0xff]  ;;  %v2151_v13 = vrot.slane %v5822_v34, 2 }
  0x94   : > { %4925 = vmatprep.subr.bf16.mxu0 %v4924_v48  ;;  %v4932_v12 = vpack.c.bf16 %v3485_v6, %v3484_v50  ;;  %v6239_v36 = vsel %vm2095_vm1, %v2122_v26, %v2124_v9  ;;  %v6243_v50 = vsel %vm2095_vm1, %v2126_v1, %v2127_v55  ;;  %v2131_v6 = vrot.slane %v5684_v16, 2  ;;  %v5282_v53 = vld [vmem:[%s5427_s7 + $0x30] sm:$0xff] }
  0x95   : > { %4116 = vmatmul.mubr.f32.gmra.mrb[18].mxu1 %v5801_v8  ;;  %v2141_v1 = vrot.slane %v5787_v61, 2 }
  0x96   : > { %4492 = vmatmul.mubr.f32.gmra.mrb[2].mxu0 %v6163_v58  ;;  %4118 = vmatprep.mubr.f32.mxu1 %v5805_v14  ;;  %v6262_v3 = vsel %vm2095_vm1, %v2131_v6, %v2132_v4  ;;  %v6872_v6 = vld [vmem:[#allocation26_spill] sm:$0xff] }
  0x97   : > { %4494 = vmatprep.mubr.f32.mxu0 %v6167_v25  ;;  %4927 = vmatpush3.bf16.msra.mxu0 %v4924_v48  ;;  %v6224_v48 = vsel %vm2095_vm1, %v2121_v28, %v2122_v26  ;;  %v2137_v28 = vrot.slane %v5721_v49, 2  ;;  %v2144_v4 = vrot.slane %v6872_v6, 2 }
  0x98   : > { %4929 = vmatprep.subr.bf16.mxu0 %v4928_v45 }
  0x99   : > { %4119 = vmatmul.mubr.f32.gmra.mrb[20].mxu1 %v5818_v43  ;;  %v6281_v9 = vsel %vm2095_vm1, %v2136_v21, %v2137_v28  ;;  %v5283_v21 = vld [vmem:[%s5427_s7 + $0x38] sm:$0xff] }
  0x9a   : > { %4495 = vmatmul.mubr.f32.gmra.mrb[4].mxu0 %v6182_v63  ;;  %4121 = vmatprep.mubr.f32.mxu1 %v5822_v34 }
  0x9b   : > { %4497 = vmatprep.mubr.f32.mxu0 %v6186_v5  ;;  %4931 = vmatpush3.bf16.msra.mxu0 %v4928_v45  ;;  %v2129_v45 = vrot.slane %v5674_v11, 2  ;;  %v3493_v11 = vld [vmem:[%s6750_s1 + $0x2f8] sm:$0xff] }
  0x9c   : > { %4933 = vmatprep.subr.bf16.mxu0 %v4932_v12  ;;  %v4948_v26 = vpack.c.bf16 %v3493_v11, %v3492_v24  ;;  %v2146_v24 = vrot.slane %v5805_v14, 2  ;;  %v2147_v11 = vrot.slane %v5818_v43, 2 }
  0x9d   : > { %4122 = vmatmul.mubr.f32.gmra.mrb[22].mxu1 %v5834_v51 }
  0x9e   : > { %4498 = vmatmul.mubr.f32.gmra.mrb[6].mxu0 %v6201_v15  ;;  %4124 = vmatprep.mubr.f32.mxu1 %v5838_v2  ;;  %v6323_v7 = vsel %vm2095_vm1, %v2146_v24, %v2147_v11 }
  0x9f   : > { %4500 = vmatprep.mubr.f32.mxu0 %v6205_v22  ;;  %4935 = vmatpush3.bf16.msra.mxu0 %v4932_v12  ;;  %v6258_v12 = vsel %vm2095_vm1, %v2127_v55, %v2129_v45  ;;  %v2142_v55 = vrot.slane %v5801_v8, 2  ;;  %v6298_v45 = vsel %vm2095_vm1, %v2137_v28, %v2139_v35  ;;  %v3418_v28 = vld [vmem:[%s6750_s1 + $0xa0] sm:$0xff]  ;;  %v6873_v35 = vld [vmem:[#allocation29_spill] sm:$0xff] }
  0xa0   : > { %4937 = vmatprep.subr.bf16.mxu0 %v4936_v29 }
  0xa1   : > { %4125 = vmatmul.mubr.f32.gmra.mrb[24].mxu1 %v5850_v20 }
  0xa2   : > { %4501 = vmatmul.mubr.f32.gmra.mrb[8].mxu0 %v6220_v41  ;;  %4127 = vmatprep.mubr.f32.mxu1 %v5854_v31 }
  0xa3   : > { %4503 = vmatprep.mubr.f32.mxu0 %v6224_v48  ;;  %4939 = vmatpush3.bf16.msra.mxu0 %v4936_v29  ;;  %v3494_v29 = vld [vmem:[%s6750_s1 + $0x400] sm:$0xff] }
  0xa4   : > { %4941 = vmatprep.subr.bf16.mxu0 %v4940_v59 }
  0xa5   : > { %4128 = vmatmul.mubr.f32.gmra.mrb[26].mxu1 %v5866_v46 }
  0xa6   : > { %4504 = vmatmul.mubr.f32.gmra.mrb[10].mxu0 %v6239_v36  ;;  %4130 = vmatprep.mubr.f32.mxu1 %v5870_v38 }
  0xa7   : > { %4506 = vmatprep.mubr.f32.mxu0 %v6243_v50  ;;  %4943 = vmatpush3.bf16.msra.mxu0 %v4940_v59  ;;  %v6285_v59 = vpack.c.bf16 %v3495_v42, %v3494_v29  ;;  %v5284_v29 = vld [vmem:[%s5427_s7 + $0x48] sm:$0xff]  ;;  %v6319_v42 = vsel %vm2095_vm1, %v2142_v55, %v2144_v4  ;;  %v5286_v4 = vld [vmem:[%s5427_s7 + $0x60] sm:$0xff] }
  0xa8   : > { %4945 = vmatprep.subr.bf16.mxu0 %v4944_v62 }
  0xa9   : > { %4131 = vmatmul.mubr.f32.gmra.mrb[28].mxu1 %v5882_v32 }
  0xaa   : > { %4507 = vmatmul.mubr.f32.gmra.mrb[12].mxu0 %v6258_v12  ;;  %4133 = vmatprep.mubr.f32.mxu1 %v5886_v52 }
  0xab   : > { %4509 = vmatprep.mubr.f32.mxu0 %v6262_v3  ;;  %4947 = vmatpush3.bf16.msra.mxu0 %v4944_v62  ;;  %v6302_v62 = vsel %vm2095_vm1, %v2141_v1, %v2142_v55  ;;  %v2149_v1 = vrot.slane %v6873_v35, 2  ;;  %v3421_v55 = vld [vmem:[%s6750_s1 + $0xb8] sm:$0xff]  ;;  %v2157_v35 = vrot.slane %v5850_v20, 2 }
  0xac   : > { %4949 = vmatprep.subr.bf16.mxu0 %v4948_v26 }
  0xad   : > { %4134 = vmatmul.mubr.f32.gmra.mrb[30].mxu1 %v5903_v44  ;;  %v6338_v24 = vsel %vm2095_vm1, %v2147_v11, %v2149_v1  ;;  %v3422_v11 = vld [vmem:[%s6750_s1 + $0xc0] sm:$0xff]  ;;  %v2159_v1 = vrot.slane %v5977_v40, 2  ;;  %v3425_v40 = vld [vmem:[%s6750_s1 + $0xd8] sm:$0xff] }
  0xae   : > { %4510 = vmatmul.mubr.f32.gmra.mrb[14].mxu0 %v6277_v10  ;;  %4168 = vmatprep.mubr.f32.mxu1 %v5282_v53  ;;  %v2152_v53 = vrot.slane %v5834_v51, 2 }
  0xaf   : > { %4512 = vmatprep.mubr.f32.mxu0 %v6281_v9  ;;  %4951 = vmatpush3.bf16.msra.mxu0 %v4948_v26  ;;  %v3419_v26 = vld [vmem:[%s6750_s1 + $0xa8] sm:$0xff] }
  0xb0   : > { %4953 = vmatprep.subr.bf16.mxu0 %v6285_v59  ;;  %v4800_v6 = vpack.c.bf16 %v3419_v26, %v3418_v28  ;;  %v2154_v28 = vrot.slane %v5945_v18, 2  ;;  %v6342_v26 = vsel %vm2095_vm1, %v2151_v13, %v2152_v53  ;;  %v3423_v18 = vld [vmem:[%s6750_s1 + $0xc8] sm:$0xff]  ;;  %v2161_v13 = vrot.slane %v5854_v31, 2 }
  0xb1   : > { %4169 = vmatmul.mubr.f32.vlgmr.msra.gmra.mrb[0].mxu1 %v5283_v21  ;;  %v3420_v21 = vld [vmem:[%s6750_s1 + $0xb0] sm:$0xff] }
  0xb2   : > { %4513 = vmatmul.mubr.f32.gmra.mrb[16].mxu0 %v6298_v45  ;;  %4795 = vmatpush3.bf16.msra.mxu1 %v6134_v56  ;;  %v5285_v56 = vld [vmem:[%s5427_s7 + $0x50] sm:$0xff] }
  0xb3   : > { %4171 = vmatprep.mubr.f32.mxu1 %v5284_v29  ;;  %4515 = vmatprep.mubr.f32.mxu0 %v6302_v62  ;;  %v2156_v29 = vrot.slane %v5838_v2, 2 }
  0xb4   : > { %4797 = vmatprep.subr.bf16.mxu1 %v4796_v37 }
  0xb5   : > { %4172 = vmatmul.mubr.f32.gmra.mrb[2].mxu1 %v5285_v56  ;;  %v4804_v56 = vpack.c.bf16 %v3421_v55, %v3420_v21  ;;  %v2162_v21 = vrot.slane %v5866_v46, 2  ;;  %v4808_v55 = vpack.c.bf16 %v3423_v18, %v3422_v11  ;;  %v2167_v11 = vrot.slane %v5882_v32, 2 }
  0xb6   : > { %4516 = vmatmul.mubr.f32.gmra.mrb[18].mxu0 %v6319_v42  ;;  %4174 = vmatprep.mubr.f32.mxu1 %v5286_v4  ;;  %v5288_v4 = vld [vmem:[%s5427_s7 + $0x80] sm:$0xff] }
  0xb7   : > { %4518 = vmatprep.mubr.f32.mxu0 %v6323_v7  ;;  %4799 = vmatpush3.bf16.msra.mxu1 %v4796_v37  ;;  %v6357_v37 = vsel %vm2095_vm1, %v2152_v53, %v2154_v28  ;;  %v6376_v53 = vsel %vm2095_vm1, %v2157_v35, %v2159_v1  ;;  %v6380_v28 = vsel %vm2095_vm1, %v2161_v13, %v2162_v21  ;;  %v2171_v13 = vrot.slane %v5886_v52, 2 }
  0xb8   : > { %4801 = vmatprep.subr.bf16.mxu1 %v4800_v6 }
  0xb9   : > { %4175 = vmatmul.mubr.f32.gmra.mrb[4].mxu1 %v5287_v30  ;;  %v6361_v30 = vsel %vm2095_vm1, %v2156_v29, %v2157_v35  ;;  %v2166_v29 = vrot.slane %v5870_v38, 2 }
  0xba   : > { %4519 = vmatmul.mubr.f32.gmra.mrb[20].mxu0 %v6338_v24  ;;  %4177 = vmatprep.mubr.f32.mxu1 %v5616_v39  ;;  %v3424_v39 = vld [vmem:[%s6750_s1 + $0xd0] sm:$0xff] }
  0xbb   : > { %4521 = vmatprep.mubr.f32.mxu0 %v6342_v26  ;;  %4803 = vmatpush3.bf16.msra.mxu1 %v4800_v6  ;;  %v2164_v6 = vrot.slane %v6007_v0, 2  ;;  %v4812_v18 = vpack.c.bf16 %v3425_v40, %v3424_v39  ;;  %v3427_v0 = vld [vmem:[%s6750_s1 + $0xe8] sm:$0xff]  ;;  %v6875_v40 = vld [vmem:[#allocation44_spill] sm:$0xff] }
  0xbc   : > { %4805 = vmatprep.subr.bf16.mxu1 %v4804_v56 }
  0xbd   : > { %4178 = vmatmul.mubr.f32.gmra.mrb[6].mxu1 %v5288_v4  ;;  %v6395_v35 = vsel %vm2095_vm1, %v2162_v21, %v2164_v6  ;;  %v2172_v4 = vrot.slane %v5903_v44, 2  ;;  %v3429_v21 = vld [vmem:[%s6750_s1 + $0xf8] sm:$0xff]  ;;  %v2174_v6 = vrot.slane %v6875_v40, 2  ;;  %v6884_v40 = vld [vmem:[#allocation12_spill] sm:$0xff] }
  0xbe   : > { %4522 = vmatmul.mubr.f32.gmra.mrb[22].mxu0 %v6357_v37  ;;  %4180 = vmatprep.mubr.f32.mxu1 %v5650_v57  ;;  %v3426_v57 = vld [vmem:[%s6750_s1 + $0xe0] sm:$0xff] }
  0xbf   : > { %4524 = vmatprep.mubr.f32.mxu0 %v6361_v30  ;;  %4807 = vmatpush3.bf16.msra.mxu1 %v4804_v56  ;;  %v6874_v56 = vld [vmem:[#allocation41_spill] sm:$0xff]  ;;  %v4816_v39 = vpack.c.bf16 %v3427_v0, %v3426_v57  ;;  %v3499_v57 = vld [vmem:[%s6750_s1 + $0x428] sm:$0xff] }
  0xc0   : > { %4809 = vmatprep.subr.bf16.mxu1 %v4808_v55  ;;  %v2169_v1 = vrot.slane %v6874_v56, 2  ;;  %v3507_v0 = vld [vmem:[%s6750_s1 + $0x468] sm:$0xff]  ;;  %v3509_v56 = vld [vmem:[%s6750_s1 + $0x478] sm:$0xff] }
  0xc1   : > { %4181 = vmatmul.mubr.f32.gmra.mrb[8].mxu1 %v5653_v60  ;;  %v6399_v60 = vsel %vm2095_vm1, %v2166_v29, %v2167_v11 }
  0xc2   : > { %4525 = vmatmul.mubr.f32.gmra.mrb[24].mxu0 %v6376_v53  ;;  %4183 = vmatprep.mubr.f32.mxu1 %v5684_v16  ;;  %v3428_v16 = vld [vmem:[%s6750_s1 + $0xf0] sm:$0xff] }
  0xc3   : > { %4527 = vmatprep.mubr.f32.mxu0 %v6380_v28  ;;  %4811 = vmatpush3.bf16.msra.mxu1 %v4808_v55  ;;  %v6414_v55 = vsel %vm2095_vm1, %v2167_v11, %v2169_v1  ;;  %v4820_v29 = vpack.c.bf16 %v3429_v21, %v3428_v16  ;;  %v3496_v11 = vld [vmem:[%s6750_s1 + $0x410] sm:$0xff]  ;;  %v6877_v1 = vld [vmem:[#allocation27_spill] sm:$0xff] }
  0xc4   : > { %4813 = vmatprep.subr.bf16.mxu1 %v4812_v18  ;;  %v6882_v16 = vld [vmem:[#allocation3_spill] sm:$0xff] }
  0xc5   : > { %4184 = vmatmul.mubr.f32.gmra.mrb[10].mxu1 %v5687_v19  ;;  %v6418_v19 = vsel %vm2095_vm1, %v2171_v13, %v2172_v4  ;;  %v6878_v13 = vld [vmem:[#allocation30_spill] sm:$0xff]  ;;  %v6883_v21 = vld [vmem:[#allocation11_spill] sm:$0xff] }
  0xc6   : > { %4528 = vmatmul.mubr.f32.gmra.mrb[26].mxu0 %v6395_v35  ;;  %4186 = vmatprep.mubr.f32.mxu1 %v5718_v47  ;;  %v6425_v47 = vsel %vm2095_vm1, %v2172_v4, %v2174_v6  ;;  %v6880_v4 = vld [vmem:[#allocation36_spill] sm:$0xff] }
  0xc7   : > { %4530 = vmatprep.mubr.f32.mxu0 %v6399_v60  ;;  %4815 = vmatpush3.bf16.msra.mxu1 %v4812_v18  ;;  %v6876_v18 = vld [vmem:[#allocation2_spill] sm:$0xff]  ;;  %v6885_v6 = vld [vmem:[#allocation4_spill] sm:$0xff] }
  0xc8   : > { %4817 = vmatprep.subr.bf16.mxu1 %v4816_v39 }
  0xc9   : > { %4187 = vmatmul.mubr.f32.gmra.mrb[12].mxu1 %v5721_v49  ;;  %v3497_v49 = vld [vmem:[%s6750_s1 + $0x418] sm:$0xff] }
  0xca   : > { %4531 = vmatmul.mubr.f32.gmra.mrb[28].mxu0 %v6414_v55  ;;  %4189 = vmatprep.mubr.f32.mxu1 %v5787_v61  ;;  %v4956_v61 = vpack.c.bf16 %v3497_v49, %v3496_v11  ;;  %v6887_v11 = vld [vmem:[#allocation14_spill] sm:$0xff]  ;;  %v6888_v49 = vld [vmem:[#allocation5_spill] sm:$0xff] }
  0xcb   : > { %4533 = vmatprep.mubr.f32.mxu0 %v6418_v19  ;;  %4819 = vmatpush3.bf16.msra.mxu1 %v4816_v39  ;;  %v6881_v39 = vld [vmem:[#allocation7_spill] sm:$0xff] }
  0xcc   : > { %4821 = vmatprep.subr.bf16.mxu1 %v4820_v29 }
  0xcd   : > { %4190 = vmatmul.mubr.f32.gmra.mrb[14].mxu1 %v5801_v8  ;;  %v3498_v8 = vld [vmem:[%s6750_s1 + $0x420] sm:$0xff] }
  0xce   : > { %4534 = vmatmul.mubr.f32.gmra.mrb[30].mxu0 %v6425_v47  ;;  %4192 = vmatprep.mubr.f32.mxu1 %v5805_v14  ;;  %v4960_v14 = vpack.c.bf16 %v3499_v57, %v3498_v8  ;;  %v6891_v8 = vld [vmem:[#allocation6_spill] sm:$0xff]  ;;  %v6892_v57 = vld [vmem:[#allocation17_spill] sm:$0xff] }
  0xcf   : > { %4568 = vmatprep.mubr.f32.mxu0 %v6147_v33  ;;  %4823 = vmatpush3.bf16.msra.mxu1 %v4820_v29  ;;  %v3501_v33 = vld [vmem:[%s6750_s1 + $0x438] sm:$0xff] }
  0xd0   : > { %4984 = vmatprep.subr.bf16.mxu1 %v6876_v18  ;;  %v6886_v29 = vld [vmem:[#allocation13_spill] sm:$0xff] }
  0xd1   : > { %4193 = vmatmul.mubr.f32.gmra.mrb[16].mxu1 %v5818_v43  ;;  %v3500_v43 = vld [vmem:[%s6750_s1 + $0x430] sm:$0xff] }
  0xd2   : > { %4569 = vmatmul.mubr.f32.vlgmr.msra.gmra.mrb[0].mxu0 %v6163_v58  ;;  %4195 = vmatprep.mubr.f32.mxu1 %v5822_v34  ;;  %v4964_v34 = vpack.c.bf16 %v3501_v33, %v3500_v43  ;;  %v3503_v58 = vld [vmem:[%s6750_s1 + $0x448] sm:$0xff]  ;;  %v2176_v43 = vrot.slane %v6877_v1, 2  ;;  %v2177_v33 = vrot.slane %v6878_v13, 2 }
  0xd3   : > { %4955 = vmatpush3.bf16.msra.mxu0 %v6285_v59  ;;  %4571 = vmatprep.mubr.f32.mxu0 %v6167_v25  ;;  %v3505_v59 = vld [vmem:[%s6750_s1 + $0x458] sm:$0xff] }
  0xd4   : > { %4957 = vmatprep.subr.bf16.mxu0 %v4956_v61 }
  0xd5   : > { %4196 = vmatmul.mubr.f32.gmra.mrb[18].mxu1 %v5834_v51  ;;  %v3502_v51 = vld [vmem:[%s6750_s1 + $0x440] sm:$0xff] }
  0xd6   : > { %4572 = vmatmul.mubr.f32.gmra.mrb[2].mxu0 %v6182_v63  ;;  %4198 = vmatprep.mubr.f32.mxu1 %v5838_v2  ;;  %v4968_v2 = vpack.c.bf16 %v3503_v58, %v3502_v51  ;;  %v6895_v51 = vld [vmem:[#allocation19_spill] sm:$0xff]  ;;  %v6896_v58 = vld [vmem:[#allocation20_spill] sm:$0xff] }
  0xd7   : > { %4574 = vmatprep.mubr.f32.mxu0 %v6186_v5  ;;  %4959 = vmatpush3.bf16.msra.mxu0 %v4956_v61  ;;  %v6889_v61 = vld [vmem:[#allocation15_spill] sm:$0xff] }
  0xd8   : > { %4961 = vmatprep.subr.bf16.mxu0 %v4960_v14 }
  0xd9   : > { %4199 = vmatmul.mubr.f32.gmra.mrb[20].mxu1 %v5850_v20  ;;  %v3504_v20 = vld [vmem:[%s6750_s1 + $0x450] sm:$0xff] }
  0xda   : > { %4575 = vmatmul.mubr.f32.gmra.mrb[4].mxu0 %v6201_v15  ;;  %4201 = vmatprep.mubr.f32.mxu1 %v5854_v31  ;;  %v4972_v31 = vpack.c.bf16 %v3505_v59, %v3504_v20  ;;  %v6546_v59 = vsel %vm2095_vm1, %v2176_v43, %v2177_v33 }
  0xdb   : > { %4577 = vmatprep.mubr.f32.mxu0 %v6205_v22  ;;  %4963 = vmatpush3.bf16.msra.mxu0 %v4960_v14  ;;  %v6893_v14 = vld [vmem:[#allocation18_spill] sm:$0xff] }
  0xdc   : > { %4965 = vmatprep.subr.bf16.mxu0 %v4964_v34 }
  0xdd   : > { %4202 = vmatmul.mubr.f32.gmra.mrb[22].mxu1 %v5866_v46  ;;  %v3506_v46 = vld [vmem:[%s6750_s1 + $0x460] sm:$0xff] }
  0xde   : > { %4578 = vmatmul.mubr.f32.gmra.mrb[6].mxu0 %v6220_v41  ;;  %4204 = vmatprep.mubr.f32.mxu1 %v5870_v38  ;;  %v4976_v38 = vpack.c.bf16 %v3507_v0, %v3506_v46  ;;  %v6899_v46 = vld [vmem:[#allocation21_spill] sm:$0xff]  ;;  %v6900_v0 = vld [vmem:[#allocation22_spill] sm:$0xff] }
  0xdf   : > { %4580 = vmatprep.mubr.f32.mxu0 %v6224_v48  ;;  %4967 = vmatpush3.bf16.msra.mxu0 %v4964_v34  ;;  %v6894_v34 = vld [vmem:[#allocation8_spill] sm:$0xff] }
  0xe0   : > { %4969 = vmatprep.subr.bf16.mxu0 %v4968_v2 }
  0xe1   : > { %4205 = vmatmul.mubr.f32.gmra.mrb[24].mxu1 %v5882_v32  ;;  %v3508_v32 = vld [vmem:[%s6750_s1 + $0x470] sm:$0xff] }
  0xe2   : > { %4581 = vmatmul.mubr.f32.gmra.mrb[8].mxu0 %v6239_v36  ;;  %4207 = vmatprep.mubr.f32.mxu1 %v5886_v52  ;;  %v4980_v52 = vpack.c.bf16 %v3509_v56, %v3508_v32  ;;  %v6901_v32 = vld [vmem:[#allocation10_spill] sm:$0xff]  ;;  %v6902_v56 = vld [vmem:[#allocation23_spill] sm:$0xff] }
  0xe3   : > { %4583 = vmatprep.mubr.f32.mxu0 %v6243_v50  ;;  %4971 = vmatpush3.bf16.msra.mxu0 %v4968_v2  ;;  %v6897_v2 = vld [vmem:[#allocation47_spill] sm:$0xff] }
  0xe4   : > { %4973 = vmatprep.subr.bf16.mxu0 %v4972_v31  ;;  %v2179_v20 = vrot.slane %v6897_v2, 2 }
  0xe5   : > { %4208 = vmatmul.mubr.f32.gmra.mrb[26].mxu1 %v5903_v44  ;;  %v6879_v44 = vld [vmem:[#allocation35_spill] sm:$0xff] }
  0xe6   : > { %4584 = vmatmul.mubr.f32.gmra.mrb[10].mxu0 %v6258_v12  ;;  %4210 = vmatprep.mubr.f32.mxu1 %v6877_v1  ;;  %v6903_v1 = vld [vmem:[#allocation24_spill] sm:$0xff] }
  0xe7   : > { %4586 = vmatprep.mubr.f32.mxu0 %v6262_v3  ;;  %4975 = vmatpush3.bf16.msra.mxu0 %v4972_v31  ;;  %v6898_v31 = vld [vmem:[#allocation9_spill] sm:$0xff] }
  0xe8   : > { %4977 = vmatprep.subr.bf16.mxu0 %v4976_v38 }
  0xe9   : > { %4211 = vmatmul.mubr.f32.gmra.mrb[28].mxu1 %v6878_v13  ;;  %v6905_v13 = vld [vmem:[#allocation28_spill] sm:$0xff] }
  0xea   : > { %4587 = vmatmul.mubr.f32.gmra.mrb[12].mxu0 %v6277_v10  ;;  %4213 = vmatprep.mubr.f32.mxu1 %v6076_v54 }
  0xeb   : > { %4589 = vmatprep.mubr.f32.mxu0 %v6281_v9  ;;  %4979 = vmatpush3.bf16.msra.mxu0 %v4976_v38  ;;  %v6554_v38 = vsel %vm2095_vm1, %v2177_v33, %v2179_v20 }
  0xec   : > { %4981 = vmatprep.subr.bf16.mxu0 %v4980_v52 }
  0xed   : > { %4214 = vmatmul.mubr.f32.gmra.mrb[30].mxu1 %v6080_v17 }
  0xee   : > { %4590 = vmatmul.mubr.f32.gmra.mrb[14].mxu0 %v6298_v45  ;;  %4248 = vmatprep.mubr.f32.mxu1 %v6879_v44  ;;  %v6906_v44 = vld [vmem:[#allocation31_spill] sm:$0xff] }
  0xef   : > { %4592 = vmatprep.mubr.f32.mxu0 %v6302_v62  ;;  %4983 = vmatpush3.bf16.msra.mxu0 %v4980_v52  ;;  %v6904_v52 = vld [vmem:[#allocation25_spill] sm:$0xff] }
  0xf1   : > { %4249 = vmatmul.mubr.f32.vlgmr.msra.gmra.mrb[0].mxu1 %v6880_v4  ;;  %v6907_v4 = vld [vmem:[#allocation32_spill] sm:$0xff] }
  0xf2   : > { %4593 = vmatmul.mubr.f32.gmra.mrb[16].mxu0 %v6319_v42  ;;  %4992 = vmatpush3.bf16.msra.mxu1 %v6876_v18  ;;  %v6890_v18 = vld [vmem:[#allocation16_spill] sm:$0xff] }
  0xf3   : > { %4251 = vmatprep.mubr.f32.mxu1 %v6881_v39  ;;  %4595 = vmatprep.mubr.f32.mxu0 %v6323_v7  ;;  %v6908_v39 = vld [vmem:[#allocation33_spill] sm:$0xff] }
  0xf4   : > { %4985 = vmatprep.subr.bf16.mxu1 %v6882_v16 }
  0xf5   : > { %4252 = vmatmul.mubr.f32.gmra.mrb[2].mxu1 %v6883_v21 }
  0xf6   : > { %4596 = vmatmul.mubr.f32.gmra.mrb[18].mxu0 %v6338_v24  ;;  %4254 = vmatprep.mubr.f32.mxu1 %v6884_v40 }
  0xf7   : > { %4598 = vmatprep.mubr.f32.mxu0 %v6342_v26  ;;  %4993 = vmatpush3.bf16.msra.mxu1 %v6882_v16 }
  0xf8   : > { %4986 = vmatprep.subr.bf16.mxu1 %v6885_v6 }
  0xf9   : > { %4255 = vmatmul.mubr.f32.gmra.mrb[4].mxu1 %v6886_v29 }
  0xfa   : > { %4599 = vmatmul.mubr.f32.gmra.mrb[20].mxu0 %v6357_v37  ;;  %4257 = vmatprep.mubr.f32.mxu1 %v6887_v11 }
  0xfb   : > { %4601 = vmatprep.mubr.f32.mxu0 %v6361_v30  ;;  %4994 = vmatpush3.bf16.msra.mxu1 %v6885_v6 }
  0xfc   : > { %4987 = vmatprep.subr.bf16.mxu1 %v6888_v49 }
  0xfd   : > { %4258 = vmatmul.mubr.f32.gmra.mrb[6].mxu1 %v6889_v61 }
  0xfe   : > { %4602 = vmatmul.mubr.f32.gmra.mrb[22].mxu0 %v6376_v53  ;;  %4260 = vmatprep.mubr.f32.mxu1 %v6890_v18 }
  0xff   : > { %4604 = vmatprep.mubr.f32.mxu0 %v6380_v28  ;;  %4995 = vmatpush3.bf16.msra.mxu1 %v6888_v49 }
 0x100   : > { %4988 = vmatprep.subr.bf16.mxu1 %v6891_v8 }
 0x101   : > { %4261 = vmatmul.mubr.f32.gmra.mrb[8].mxu1 %v6892_v57 }
 0x102   : > { %4605 = vmatmul.mubr.f32.gmra.mrb[24].mxu0 %v6395_v35  ;;  %4263 = vmatprep.mubr.f32.mxu1 %v6893_v14 }
 0x103   : > { %4607 = vmatprep.mubr.f32.mxu0 %v6399_v60  ;;  %4996 = vmatpush3.bf16.msra.mxu1 %v6891_v8 }
 0x104   : > { %4989 = vmatprep.subr.bf16.mxu1 %v6894_v34 }
 0x105   : > { %4264 = vmatmul.mubr.f32.gmra.mrb[10].mxu1 %v6895_v51 }
 0x106   : > { %4608 = vmatmul.mubr.f32.gmra.mrb[26].mxu0 %v6414_v55  ;;  %4266 = vmatprep.mubr.f32.mxu1 %v6896_v58 }
 0x107   : > { %4610 = vmatprep.mubr.f32.mxu0 %v6418_v19  ;;  %4997 = vmatpush3.bf16.msra.mxu1 %v6894_v34 }
 0x108   : > { %4990 = vmatprep.subr.bf16.mxu1 %v6898_v31 }
 0x109   : > { %4267 = vmatmul.mubr.f32.gmra.mrb[12].mxu1 %v6899_v46 }
 0x10a   : > { %4611 = vmatmul.mubr.f32.gmra.mrb[28].mxu0 %v6425_v47  ;;  %4269 = vmatprep.mubr.f32.mxu1 %v6900_v0 }
 0x10b   : > { %4613 = vmatprep.mubr.f32.mxu0 %v6546_v59  ;;  %4998 = vmatpush3.bf16.msra.mxu1 %v6898_v31 }
 0x10c   : > { %4991 = vmatprep.subr.bf16.mxu1 %v6901_v32 }
 0x10d   : > { %4270 = vmatmul.mubr.f32.gmra.mrb[14].mxu1 %v6902_v56 }
 0x10e   : > { %4614 = vmatmul.mubr.f32.gmra.mrb[30].mxu0 %v6554_v38  ;;  %4272 = vmatprep.mubr.f32.mxu1 %v6903_v1 }
 0x10f   : > { %4648 = vmatprep.mubr.f32.mxu0 %v6167_v25  ;;  %4999 = vmatpush3.bf16.msra.mxu1 %v6901_v32  ;;  %v6909_v25 = vld [vmem:[#allocation34_spill] sm:$0xff] }
 0x111   : > { %4273 = vmatmul.mubr.f32.gmra.mrb[16].mxu1 %v6904_v52 }
 0x112   : > { %4649 = vmatmul.mubr.f32.vlgmr.msra.gmra.mrb[0].mxu0 %v6182_v63  ;;  %4275 = vmatprep.mubr.f32.mxu1 %v6905_v13  ;;  %v6910_v63 = vld [vmem:[#allocation37_spill] sm:$0xff] }
 0x113   : > { %4651 = vmatprep.mubr.f32.mxu0 %v6186_v5  ;;  %v6911_v5 = vld [vmem:[#allocation38_spill] sm:$0xff] }
 0x115   : > { %4276 = vmatmul.mubr.f32.gmra.mrb[18].mxu1 %v6906_v44 }
 0x116   : > { %4652 = vmatmul.mubr.f32.gmra.mrb[2].mxu0 %v6201_v15  ;;  %4278 = vmatprep.mubr.f32.mxu1 %v6907_v4  ;;  %v6912_v15 = vld [vmem:[#allocation39_spill] sm:$0xff] }
 0x117   : > { %4654 = vmatprep.mubr.f32.mxu0 %v6205_v22  ;;  %v6913_v22 = vld [vmem:[#allocation40_spill] sm:$0xff] }
 0x119   : > { %4279 = vmatmul.mubr.f32.gmra.mrb[20].mxu1 %v6908_v39 }
 0x11a   : > { %4655 = vmatmul.mubr.f32.gmra.mrb[4].mxu0 %v6220_v41  ;;  %4281 = vmatprep.mubr.f32.mxu1 %v6909_v25  ;;  %v6914_v41 = vld [vmem:[#allocation42_spill] sm:$0xff] }
 0x11b   : > { %4657 = vmatprep.mubr.f32.mxu0 %v6224_v48  ;;  %v6915_v48 = vld [vmem:[#allocation43_spill] sm:$0xff] }
 0x11d   : > { %4282 = vmatmul.mubr.f32.gmra.mrb[22].mxu1 %v6910_v63 }
 0x11e   : > { %4658 = vmatmul.mubr.f32.gmra.mrb[6].mxu0 %v6239_v36  ;;  %4284 = vmatprep.mubr.f32.mxu1 %v6911_v5  ;;  %v6916_v36 = vld [vmem:[#allocation45_spill] sm:$0xff] }
 0x11f   : > { %4660 = vmatprep.mubr.f32.mxu0 %v6243_v50  ;;  %v6917_v50 = vld [vmem:[#allocation46_spill] sm:$0xff] }
 0x121   : > { %4285 = vmatmul.mubr.f32.gmra.mrb[24].mxu1 %v6912_v15 }
 0x122   : > { %4661 = vmatmul.mubr.f32.gmra.mrb[8].mxu0 %v6258_v12  ;;  %4287 = vmatprep.mubr.f32.mxu1 %v6913_v22  ;;  %v2181_v12 = vrot.slane %v6076_v54, 2 }
 0x123   : > { %4663 = vmatprep.mubr.f32.mxu0 %v6262_v3  ;;  %v2182_v3 = vrot.slane %v6080_v17, 2  ;;  %v6919_v17 = vld [vmem:[#allocation49_spill] sm:$0xff] }
 0x125   : > { %4288 = vmatmul.mubr.f32.gmra.mrb[26].mxu1 %v6914_v41 }
 0x126   : > { %4664 = vmatmul.mubr.f32.gmra.mrb[10].mxu0 %v6277_v10  ;;  %4290 = vmatprep.mubr.f32.mxu1 %v6915_v48  ;;  %v2184_v10 = vrot.slane %v6101_v23, 2  ;;  %v5313_v23 = vmov 0.0  }
 0x127   : > { %4666 = vmatprep.mubr.f32.mxu0 %v6281_v9  ;;  %v2183_v9 = vsel %vm2095_vm1, %v2181_v12, %v2182_v3  ;;  %3156 = vst [vmem:[%s6633_s12 + $0x20] sm:$0xff] %v5313_v23  ;;  %3157 = vst [vmem:[%s6633_s12 + $0x28] sm:$0x3] %v5313_v23 }
 0x128   : > { %v2185_v54 = vsel %vm2095_vm1, %v2182_v3, %v2184_v10  ;;  %3152 = vst [vmem:[%s6633_s12] sm:$0xff] %v5313_v23  ;;  %3153 = vst [vmem:[%s6633_s12 + $0x8] sm:$0xff] %v5313_v23 }
 0x129   : > { %4291 = vmatmul.mubr.f32.gmra.mrb[28].mxu1 %v6916_v36  ;;  %3154 = vst [vmem:[%s6633_s12 + $0x10] sm:$0x3] %v5313_v23  ;;  %3155 = vst [vmem:[%s6633_s12 + $0x18] sm:$0xff] %v5313_v23 }
 0x12a   : > { %4667 = vmatmul.mubr.f32.gmra.mrb[12].mxu0 %v6298_v45  ;;  %4293 = vmatprep.mubr.f32.mxu1 %v6917_v50  ;;  %v6918_v45 = vld [vmem:[#allocation48_spill] sm:$0xff]  ;;  %3158 = vst [vmem:[%s6633_s12 + $0x30] sm:$0xff] %v5313_v23  ;;  %3159 = vst [vmem:[%s6633_s12 + $0x38] sm:$0xff] %v5313_v23 }
 0x12b   : > { %4669 = vmatprep.mubr.f32.mxu0 %v6302_v62  ;;  %3160 = vst [vmem:[%s6633_s12 + $0x40] sm:$0x3] %v5313_v23  ;;  %3161 = vst [vmem:[%s6633_s12 + $0x48] sm:$0xff] %v5313_v23 }
 0x12c   : > { %3162 = vst [vmem:[%s6633_s12 + $0x50] sm:$0xff] %v5313_v23  ;;  %3163 = vst [vmem:[%s6633_s12 + $0x58] sm:$0x3] %v5313_v23 }
 0x12d   : > { %4294 = vmatmul.mubr.f32.gmra.mrb[30].mxu1 %v6092_v27  ;;  %3164 = vst [vmem:[%s6633_s12 + $0x60] sm:$0xff] %v5313_v23  ;;  %3165 = vst [vmem:[%s6633_s12 + $0x68] sm:$0xff] %v5313_v23 }
 0x12e   : > { %4670 = vmatmul.mubr.f32.gmra.mrb[14].mxu0 %v6319_v42  ;;  %4352 = vmatprep.mubr.f32.mxu1 %v6905_v13  ;;  %3166 = vst [vmem:[%s6633_s12 + $0x70] sm:$0x3] %v5313_v23  ;;  %3167 = vst [vmem:[%s6633_s12 + $0x78] sm:$0xff] %v5313_v23 }
 0x12f   : > { %4672 = vmatprep.mubr.f32.mxu0 %v6323_v7  ;;  %3168 = vst [vmem:[%s6633_s12 + $0x80] sm:$0xff] %v5313_v23  ;;  %3169 = vst [vmem:[%s6633_s12 + $0x88] sm:$0x3] %v5313_v23 }
 0x130   : > { %3170 = vst [vmem:[%s6633_s12 + $0x90] sm:$0xff] %v5313_v23  ;;  %3171 = vst [vmem:[%s6633_s12 + $0x98] sm:$0xff] %v5313_v23 }
 0x131   : > { %4353 = vmatmul.mubr.f32.vlgmr.msra.gmra.mrb[16].mxu1 %v6906_v44  ;;  %3172 = vst [vmem:[%s6633_s12 + $0xa0] sm:$0x3] %v5313_v23  ;;  %3173 = vst [vmem:[%s6633_s12 + $0xa8] sm:$0xff] %v5313_v23 }
 0x132   : > { %4673 = vmatmul.mubr.f32.gmra.mrb[16].mxu0 %v6338_v24  ;;  %4355 = vmatprep.mubr.f32.mxu1 %v6907_v4  ;;  %3174 = vst [vmem:[%s6633_s12 + $0xb0] sm:$0xff] %v5313_v23  ;;  %3175 = vst [vmem:[%s6633_s12 + $0xb8] sm:$0x3] %v5313_v23 }
 0x133   : > { %4675 = vmatprep.mubr.f32.mxu0 %v6342_v26  ;;  %3176 = vst [vmem:[%s6633_s12 + $0xc0] sm:$0xff] %v5313_v23  ;;  %3177 = vst [vmem:[%s6633_s12 + $0xc8] sm:$0xff] %v5313_v23 }
 0x134   : > { %3178 = vst [vmem:[%s6633_s12 + $0xd0] sm:$0x3] %v5313_v23  ;;  %3179 = vst [vmem:[%s6633_s12 + $0xd8] sm:$0xff] %v5313_v23 }
 0x135   : > { %4356 = vmatmul.mubr.f32.gmra.mrb[18].mxu1 %v6908_v39  ;;  %3180 = vst [vmem:[%s6633_s12 + $0xe0] sm:$0xff] %v5313_v23  ;;  %3181 = vst [vmem:[%s6633_s12 + $0xe8] sm:$0x3] %v5313_v23 }
 0x136   : > { %4676 = vmatmul.mubr.f32.gmra.mrb[18].mxu0 %v6357_v37  ;;  %4358 = vmatprep.mubr.f32.mxu1 %v6909_v25  ;;  %3182 = vst [vmem:[%s6633_s12 + $0xf0] sm:$0xff] %v5313_v23  ;;  %3183 = vst [vmem:[%s6633_s12 + $0xf8] sm:$0xff] %v5313_v23 }
 0x137   : > { %4678 = vmatprep.mubr.f32.mxu0 %v6361_v30  ;;  %3184 = vst [vmem:[%s6633_s12 + $0x100] sm:$0x3] %v5313_v23  ;;  %3185 = vst [vmem:[%s6633_s12 + $0x108] sm:$0xff] %v5313_v23 }
 0x138   : > { %3186 = vst [vmem:[%s6633_s12 + $0x110] sm:$0xff] %v5313_v23  ;;  %3187 = vst [vmem:[%s6633_s12 + $0x118] sm:$0x3] %v5313_v23 }
 0x139   : > { %4359 = vmatmul.mubr.f32.gmra.mrb[20].mxu1 %v6910_v63  ;;  %3188 = vst [vmem:[%s6633_s12 + $0x120] sm:$0xff] %v5313_v23  ;;  %3189 = vst [vmem:[%s6633_s12 + $0x128] sm:$0xff] %v5313_v23 }
 0x13a   : > { %4679 = vmatmul.mubr.f32.gmra.mrb[20].mxu0 %v6376_v53  ;;  %4361 = vmatprep.mubr.f32.mxu1 %v6911_v5  ;;  %3190 = vst [vmem:[%s6633_s12 + $0x130] sm:$0x3] %v5313_v23  ;;  %3191 = vst [vmem:[%s6633_s12 + $0x138] sm:$0xff] %v5313_v23 }
 0x13b   : > { %4681 = vmatprep.mubr.f32.mxu0 %v6380_v28  ;;  %3192 = vst [vmem:[%s6633_s12 + $0x140] sm:$0xff] %v5313_v23  ;;  %3193 = vst [vmem:[%s6633_s12 + $0x148] sm:$0x3] %v5313_v23 }
 0x13c   : > { %3194 = vst [vmem:[%s6633_s12 + $0x150] sm:$0xff] %v5313_v23  ;;  %3195 = vst [vmem:[%s6633_s12 + $0x158] sm:$0xff] %v5313_v23 }
 0x13d   : > { %4362 = vmatmul.mubr.f32.gmra.mrb[22].mxu1 %v6912_v15  ;;  %3196 = vst [vmem:[%s6633_s12 + $0x160] sm:$0x3] %v5313_v23  ;;  %3197 = vst [vmem:[%s6633_s12 + $0x168] sm:$0xff] %v5313_v23 }
 0x13e   : > { %4682 = vmatmul.mubr.f32.gmra.mrb[22].mxu0 %v6395_v35  ;;  %4364 = vmatprep.mubr.f32.mxu1 %v6913_v22  ;;  %3198 = vst [vmem:[%s6633_s12 + $0x170] sm:$0xff] %v5313_v23  ;;  %3199 = vst [vmem:[%s6633_s12 + $0x178] sm:$0x3] %v5313_v23 }
 0x13f   : > { %4684 = vmatprep.mubr.f32.mxu0 %v6399_v60  ;;  %3200 = vst [vmem:[%s6633_s12 + $0x180] sm:$0xff] %v5313_v23  ;;  %3201 = vst [vmem:[%s6633_s12 + $0x188] sm:$0xff] %v5313_v23 }
 0x140   : > { %3202 = vst [vmem:[%s6633_s12 + $0x190] sm:$0x3] %v5313_v23  ;;  %3203 = vst [vmem:[%s6633_s12 + $0x198] sm:$0xff] %v5313_v23 }
 0x141   : > { %4365 = vmatmul.mubr.f32.gmra.mrb[24].mxu1 %v6914_v41  ;;  %3204 = vst [vmem:[%s6633_s12 + $0x1a0] sm:$0xff] %v5313_v23  ;;  %3205 = vst [vmem:[%s6633_s12 + $0x1a8] sm:$0x3] %v5313_v23 }
 0x142   : > { %4685 = vmatmul.mubr.f32.gmra.mrb[24].mxu0 %v6414_v55  ;;  %4367 = vmatprep.mubr.f32.mxu1 %v6915_v48 }
 0x143   : > { %4687 = vmatprep.mubr.f32.mxu0 %v6418_v19 }
 0x145   : > { %4368 = vmatmul.mubr.f32.gmra.mrb[26].mxu1 %v6916_v36 }
 0x146   : > { %4688 = vmatmul.mubr.f32.gmra.mrb[26].mxu0 %v6425_v47  ;;  %4370 = vmatprep.mubr.f32.mxu1 %v6917_v50 }
 0x147   : > { %4690 = vmatprep.mubr.f32.mxu0 %v6546_v59 }
 0x149   : > { %4371 = vmatmul.mubr.f32.gmra.mrb[28].mxu1 %v6092_v27 }
 0x14a   : > { %4691 = vmatmul.mubr.f32.gmra.mrb[28].mxu0 %v6554_v38  ;;  %4373 = vmatprep.mubr.f32.mxu1 %v6918_v45 }
 0x14b   : > { %4693 = vmatprep.mubr.f32.mxu0 %v2183_v9 }
 0x14d   : > { %4374 = vmatmul.mubr.f32.gmra.mrb[30].mxu1 %v6919_v17 }
 0x14e   : > { %4694 = vmatmul.mubr.f32.gmra.mrb[30].mxu0 %v2185_v54 }
 0x1c4   : > { %v4250_v27 = vpop.f32.mrb[0].mxu1 }
 0x1c5   : > { %v1356_v62 = vpop.f32.mrb[1].mxu1 }
 0x1c8   : > { %v4253_v42 = vpop.f32.mrb[2].mxu1 }
 0x1c9   : > { %v1366_v7 = vpop.f32.mrb[3].mxu1 }
 0x1cc   : > { %v4256_v24 = vpop.f32.mrb[4].mxu1 }
 0x1cd   : > { %v1376_v26 = vpop.f32.mrb[5].mxu1 }
 0x1d0   : > { %v4259_v37 = vpop.f32.mrb[6].mxu1 }
 0x1d1   : > { %v1386_v30 = vpop.f32.mrb[7].mxu1 }
 0x1d4   : > { %v4262_v53 = vpop.f32.mrb[8].mxu1 }
 0x1d5   : > { %v1396_v28 = vpop.f32.mrb[9].mxu1 }
 0x1d8   : > { %v4265_v35 = vpop.f32.mrb[10].mxu1 }
 0x1d9   : > { %v6689_v60 = vpop.f32.mrb[11].mxu1 }
 0x1dc   : > { %v6691_v55 = vpop.f32.mrb[12].mxu1 }
 0x1dd   : > { %v6693_v19 = vpop.f32.mrb[13].mxu1 }
 0x1e0   : > { %v6695_v47 = vpop.f32.mrb[14].mxu1 }
 0x1e1   : > { %v6697_v16 = vpop.f32.mrb[15].mxu1 }
 0x1e5   : > { %v4650_v21 = vpop.f32.mrb[0].mxu0 }
 0x1e6   : > { %v5000_v40 = vadd.f32 %v4650_v21, %v4250_v27  ;;  %v2853_v6 = vpop.f32.mrb[1].mxu0 }
 0x1e7   : > { %v5001_v29 = vadd.f32 %v2853_v6, %v1356_v62 }
 0x1e8   : > { %v3083_v11 = vmul.f32 %v5000_v40, %v5000_v40  ;;  %3511 = vst [vmem:[%s6633_s12 + $0x21] sm:$0xff] %v5000_v40 }
 0x1e9   : > { %v3044_v49 = vadd.f32 %v5001_v29, %v5000_v40  ;;  %v3082_v61 = vmul.f32 %v5001_v29, %v5001_v29  ;;  %3510 = vst [vmem:[%s6633_s12 + $0x19] sm:$0xff] %v5001_v29  ;;  %v4653_v18 = vpop.f32.mrb[2].mxu0 }
 0x1ea   : > { %v5002_v8 = vadd.f32 %v4653_v18, %v4253_v42  ;;  %v2863_v57 = vpop.f32.mrb[3].mxu0 }
 0x1eb   : > { %v3114_v14 = vadd.f32 %v3083_v11, %v3082_v61  ;;  %v5003_v43 = vadd.f32 %v2863_v57, %v1366_v7 }
 0x1ec   : > { %3513 = vst [vmem:[%s6633_s12 + $0x39] sm:$0xff] %v5002_v8  ;;  %v3085_v20 = vmul.f32 %v5002_v8, %v5002_v8 }
 0x1ed   : > { %v3045_v33 = vadd.f32 %v5003_v43, %v3044_v49  ;;  %v3084_v34 = vmul.f32 %v5003_v43, %v5003_v43  ;;  %3512 = vst [vmem:[%s6633_s12 + $0x31] sm:$0xff] %v5003_v43  ;;  %v4656_v51 = vpop.f32.mrb[4].mxu0 }
 0x1ee   : > { %v5004_v58 = vadd.f32 %v4656_v51, %v4256_v24  ;;  %v2873_v2 = vpop.f32.mrb[5].mxu0 }
 0x1ef   : > { %v3115_v59 = vadd.f32 %v3114_v14, %v3084_v34  ;;  %v5005_v31 = vadd.f32 %v2873_v2, %v1376_v26  ;;  %v3046_v46 = vadd.f32 %v5002_v8, %v3045_v33 }
 0x1f0   : > { %3515 = vst [vmem:[%s6633_s12 + $0x51] sm:$0xff] %v5004_v58  ;;  %v3087_v13 = vmul.f32 %v5004_v58, %v5004_v58 }
 0x1f1   : > { %v3047_v0 = vadd.f32 %v5005_v31, %v3046_v46  ;;  %v3086_v38 = vmul.f32 %v5005_v31, %v5005_v31  ;;  %v3116_v32 = vadd.f32 %v3115_v59, %v3085_v20  ;;  %3514 = vst [vmem:[%s6633_s12 + $0x49] sm:$0xff] %v5005_v31  ;;  %v4659_v56 = vpop.f32.mrb[6].mxu0 }
 0x1f2   : > { %v5006_v1 = vadd.f32 %v4659_v56, %v4259_v37  ;;  %v2883_v52 = vpop.f32.mrb[7].mxu0 }
 0x1f3   : > { %v3117_v44 = vadd.f32 %v3116_v32, %v3086_v38  ;;  %v5007_v4 = vadd.f32 %v2883_v52, %v1386_v30  ;;  %v3048_v39 = vadd.f32 %v5004_v58, %v3047_v0 }
 0x1f4   : > { %3517 = vst [vmem:[%s6633_s12 + $0x69] sm:$0xff] %v5006_v1  ;;  %v3089_v48 = vmul.f32 %v5006_v1, %v5006_v1 }
 0x1f5   : > { %v3049_v25 = vadd.f32 %v5007_v4, %v3048_v39  ;;  %v3088_v63 = vmul.f32 %v5007_v4, %v5007_v4  ;;  %v3118_v5 = vadd.f32 %v3117_v44, %v3087_v13  ;;  %3516 = vst [vmem:[%s6633_s12 + $0x61] sm:$0xff] %v5007_v4  ;;  %v4662_v15 = vpop.f32.mrb[8].mxu0 }
 0x1f6   : > { %v5008_v22 = vadd.f32 %v4662_v15, %v4262_v53  ;;  %v2893_v41 = vpop.f32.mrb[9].mxu0 }
 0x1f7   : > { %v3119_v36 = vadd.f32 %v3118_v5, %v3088_v63  ;;  %v5009_v50 = vadd.f32 %v2893_v41, %v1396_v28  ;;  %v3050_v12 = vadd.f32 %v5006_v1, %v3049_v25 }
 0x1f8   : > { %3519 = vst [vmem:[%s6633_s12 + $0x81] sm:$0xff] %v5008_v22  ;;  %v3091_v23 = vmul.f32 %v5008_v22, %v5008_v22 }
 0x1f9   : > { %v3051_v3 = vadd.f32 %v5009_v50, %v3050_v12  ;;  %v3090_v10 = vmul.f32 %v5009_v50, %v5009_v50  ;;  %v3120_v9 = vadd.f32 %v3119_v36, %v3089_v48  ;;  %3518 = vst [vmem:[%s6633_s12 + $0x79] sm:$0xff] %v5009_v50  ;;  %v4665_v45 = vpop.f32.mrb[10].mxu0 }
 0x1fa   : > { %v5010_v54 = vadd.f32 %v4665_v45, %v4265_v35  ;;  %v2903_v17 = vpop.f32.mrb[11].mxu0 }
 0x1fb   : > { %v3121_v27 = vadd.f32 %v3120_v9, %v3090_v10  ;;  %v5011_v62 = vadd.f32 %v2903_v17, %v6689_v60  ;;  %v3052_v42 = vadd.f32 %v5008_v22, %v3051_v3 }
 0x1fc   : > { %3521 = vst [vmem:[%s6633_s12 + $0x99] sm:$0xff] %v5010_v54  ;;  %v3093_v28 = vmul.f32 %v5010_v54, %v5010_v54 }
 0x1fd   : > { %v3053_v7 = vadd.f32 %v5011_v62, %v3052_v42  ;;  %v3092_v24 = vmul.f32 %v5011_v62, %v5011_v62  ;;  %v3122_v26 = vadd.f32 %v3121_v27, %v3091_v23  ;;  %3520 = vst [vmem:[%s6633_s12 + $0x91] sm:$0xff] %v5011_v62  ;;  %v4668_v37 = vpop.f32.mrb[12].mxu0 }
 0x1fe   : > { %v5012_v30 = vadd.f32 %v4668_v37, %v6691_v55  ;;  %v2913_v53 = vpop.f32.mrb[13].mxu0 }
 0x1ff   : > { %v3123_v35 = vadd.f32 %v3122_v26, %v3092_v24  ;;  %v5013_v21 = vadd.f32 %v2913_v53, %v6693_v19  ;;  %v3054_v40 = vadd.f32 %v5010_v54, %v3053_v7 }
 0x200   : > { %3523 = vst [vmem:[%s6633_s12 + $0xb1] sm:$0xff] %v5012_v30  ;;  %v3095_v18 = vmul.f32 %v5012_v30, %v5012_v30 }
 0x201   : > { %v3055_v6 = vadd.f32 %v5013_v21, %v3054_v40  ;;  %v3094_v60 = vmul.f32 %v5013_v21, %v5013_v21  ;;  %v3124_v29 = vadd.f32 %v3123_v35, %v3093_v28  ;;  %3522 = vst [vmem:[%s6633_s12 + $0xa9] sm:$0xff] %v5013_v21  ;;  %v4671_v11 = vpop.f32.mrb[14].mxu0 }
 0x202   : > { %v5014_v49 = vadd.f32 %v4671_v11, %v6695_v47  ;;  %v2923_v61 = vpop.f32.mrb[15].mxu0 }
 0x203   : > { %v3125_v8 = vadd.f32 %v3124_v29, %v3094_v60  ;;  %v5015_v55 = vadd.f32 %v2923_v61, %v6697_v16  ;;  %v3056_v57 = vadd.f32 %v5012_v30, %v3055_v6 }
 0x204   : > { %3525 = vst [vmem:[%s6633_s12 + $0xc9] sm:$0xff] %v5014_v49  ;;  %v4354_v14 = vpop.f32.mrb[16].mxu1  ;;  %v3097_v20 = vmul.f32 %v5014_v49, %v5014_v49 }
 0x205   : > { %v3057_v19 = vadd.f32 %v5015_v55, %v3056_v57  ;;  %v3096_v43 = vmul.f32 %v5015_v55, %v5015_v55  ;;  %v3126_v33 = vadd.f32 %v3125_v8, %v3095_v18  ;;  %3524 = vst [vmem:[%s6633_s12 + $0xc1] sm:$0xff] %v5015_v55  ;;  %v4674_v34 = vpop.f32.mrb[16].mxu0  ;;  %v1710_v51 = vpop.f32.mrb[17].mxu1 }
 0x206   : > { %v5016_v58 = vadd.f32 %v4674_v34, %v4354_v14  ;;  %v2933_v2 = vpop.f32.mrb[17].mxu0 }
 0x207   : > { %v3127_v47 = vadd.f32 %v3126_v33, %v3096_v43  ;;  %v5017_v59 = vadd.f32 %v2933_v2, %v1710_v51  ;;  %v3058_v31 = vadd.f32 %v5014_v49, %v3057_v19 }
 0x208   : > { %3527 = vst [vmem:[%s6633_s12 + $0xe1] sm:$0xff] %v5016_v58  ;;  %v4357_v16 = vpop.f32.mrb[18].mxu1  ;;  %v3099_v13 = vmul.f32 %v5016_v58, %v5016_v58 }
 0x209   : > { %v3059_v46 = vadd.f32 %v5017_v59, %v3058_v31  ;;  %v3098_v0 = vmul.f32 %v5017_v59, %v5017_v59  ;;  %v3128_v38 = vadd.f32 %v3127_v47, %v3097_v20  ;;  %3526 = vst [vmem:[%s6633_s12 + $0xd9] sm:$0xff] %v5017_v59  ;;  %v4677_v32 = vpop.f32.mrb[18].mxu0  ;;  %v1720_v56 = vpop.f32.mrb[19].mxu1 }
 0x20a   : > { %v5018_v1 = vadd.f32 %v4677_v32, %v4357_v16  ;;  %v2943_v52 = vpop.f32.mrb[19].mxu0 }
 0x20b   : > { %v3129_v44 = vadd.f32 %v3128_v38, %v3098_v0  ;;  %v5019_v4 = vadd.f32 %v2943_v52, %v1720_v56  ;;  %v3060_v39 = vadd.f32 %v5016_v58, %v3059_v46 }
 0x20c   : > { %3529 = vst [vmem:[%s6633_s12 + $0xf9] sm:$0xff] %v5018_v1  ;;  %v4360_v25 = vpop.f32.mrb[20].mxu1  ;;  %v3101_v50 = vmul.f32 %v5018_v1, %v5018_v1 }
 0x20d   : > { %v3061_v63 = vadd.f32 %v5019_v4, %v3060_v39  ;;  %v3100_v5 = vmul.f32 %v5019_v4, %v5019_v4  ;;  %v3130_v15 = vadd.f32 %v3129_v44, %v3099_v13  ;;  %3528 = vst [vmem:[%s6633_s12 + $0xf1] sm:$0xff] %v5019_v4  ;;  %v4680_v22 = vpop.f32.mrb[20].mxu0  ;;  %v1730_v41 = vpop.f32.mrb[21].mxu1 }
 0x20e   : > { %v5020_v48 = vadd.f32 %v4680_v22, %v4360_v25  ;;  %v2953_v36 = vpop.f32.mrb[21].mxu0 }
 0x20f   : > { %v3131_v12 = vadd.f32 %v3130_v15, %v3100_v5  ;;  %v5021_v3 = vadd.f32 %v2953_v36, %v1730_v41  ;;  %v3062_v10 = vadd.f32 %v5018_v1, %v3061_v63 }
 0x210   : > { %3531 = vst [vmem:[%s6633_s12 + $0x111] sm:$0xff] %v5020_v48  ;;  %v4363_v9 = vpop.f32.mrb[22].mxu1  ;;  %v3103_v7 = vmul.f32 %v5020_v48, %v5020_v48 }
 0x211   : > { %v3063_v45 = vadd.f32 %v5021_v3, %v3062_v10  ;;  %v3102_v54 = vmul.f32 %v5021_v3, %v5021_v3  ;;  %v3132_v17 = vadd.f32 %v3131_v12, %v3101_v50  ;;  %3530 = vst [vmem:[%s6633_s12 + $0x109] sm:$0xff] %v5021_v3  ;;  %v4683_v23 = vpop.f32.mrb[22].mxu0  ;;  %v1740_v27 = vpop.f32.mrb[23].mxu1 }
 0x212   : > { %v5022_v62 = vadd.f32 %v4683_v23, %v4363_v9  ;;  %v2963_v42 = vpop.f32.mrb[23].mxu0 }
 0x213   : > { %v3133_v24 = vadd.f32 %v3132_v17, %v3102_v54  ;;  %v5023_v26 = vadd.f32 %v2963_v42, %v1740_v27  ;;  %v3064_v37 = vadd.f32 %v5020_v48, %v3063_v45 }
 0x214   : > { %3533 = vst [vmem:[%s6633_s12 + $0x129] sm:$0xff] %v5022_v62  ;;  %v4366_v30 = vpop.f32.mrb[24].mxu1  ;;  %v3105_v29 = vmul.f32 %v5022_v62, %v5022_v62 }
 0x215   : > { %v3065_v53 = vadd.f32 %v5023_v26, %v3064_v37  ;;  %v3104_v28 = vmul.f32 %v5023_v26, %v5023_v26  ;;  %v3134_v35 = vadd.f32 %v3133_v24, %v3103_v7  ;;  %3532 = vst [vmem:[%s6633_s12 + $0x121] sm:$0xff] %v5023_v26  ;;  %v4686_v21 = vpop.f32.mrb[24].mxu0  ;;  %v1750_v40 = vpop.f32.mrb[25].mxu1 }
 0x216   : > { %v5024_v6 = vadd.f32 %v4686_v21, %v4366_v30  ;;  %v2973_v60 = vpop.f32.mrb[25].mxu0 }
 0x217   : > { %v3135_v11 = vadd.f32 %v3134_v35, %v3104_v28  ;;  %v5025_v49 = vadd.f32 %v2973_v60, %v1750_v40  ;;  %v3066_v61 = vadd.f32 %v5022_v62, %v3065_v53 }
 0x218   : > { %3535 = vst [vmem:[%s6633_s12 + $0x141] sm:$0xff] %v5024_v6  ;;  %v4369_v18 = vpop.f32.mrb[26].mxu1  ;;  %v3107_v34 = vmul.f32 %v5024_v6, %v5024_v6 }
 0x219   : > { %v3067_v8 = vadd.f32 %v5025_v49, %v3066_v61  ;;  %v3106_v55 = vmul.f32 %v5025_v49, %v5025_v49  ;;  %v3136_v57 = vadd.f32 %v3135_v11, %v3105_v29  ;;  %3534 = vst [vmem:[%s6633_s12 + $0x139] sm:$0xff] %v5025_v49  ;;  %v4689_v14 = vpop.f32.mrb[26].mxu0  ;;  %v1760_v19 = vpop.f32.mrb[27].mxu1 }
 0x21a   : > { %v5026_v43 = vadd.f32 %v4689_v14, %v4369_v18  ;;  %v2983_v33 = vpop.f32.mrb[27].mxu0 }
 0x21b   : > { %v3137_v51 = vadd.f32 %v3136_v57, %v3106_v55  ;;  %v5027_v58 = vadd.f32 %v2983_v33, %v1760_v19  ;;  %v3068_v2 = vadd.f32 %v5024_v6, %v3067_v8 }
 0x21c   : > { %3537 = vst [vmem:[%s6633_s12 + $0x159] sm:$0xff] %v5026_v43  ;;  %v4372_v20 = vpop.f32.mrb[28].mxu1  ;;  %v3109_v32 = vmul.f32 %v5026_v43, %v5026_v43 }
 0x21d   : > { %v3069_v47 = vadd.f32 %v5027_v58, %v3068_v2  ;;  %v3108_v59 = vmul.f32 %v5027_v58, %v5027_v58  ;;  %v3138_v31 = vadd.f32 %v3137_v51, %v3107_v34  ;;  %3536 = vst [vmem:[%s6633_s12 + $0x151] sm:$0xff] %v5027_v58  ;;  %v4692_v16 = vpop.f32.mrb[28].mxu0  ;;  %v1770_v46 = vpop.f32.mrb[29].mxu1 }
 0x21e   : > { %v5028_v0 = vadd.f32 %v4692_v16, %v4372_v20  ;;  %v2993_v38 = vpop.f32.mrb[29].mxu0 }
 0x21f   : > { %v3139_v56 = vadd.f32 %v3138_v31, %v3108_v59  ;;  %v5029_v1 = vadd.f32 %v2993_v38, %v1770_v46  ;;  %v3070_v52 = vadd.f32 %v5026_v43, %v3069_v47 }
 0x220   : > { %3539 = vst [vmem:[%s6633_s12 + $0x171] sm:$0xff] %v5028_v0  ;;  %v4375_v13 = vpop.f32.mrb[30].mxu1  ;;  %v3111_v22 = vmul.f32 %v5028_v0, %v5028_v0 }
 0x221   : > { %v3071_v44 = vadd.f32 %v5029_v1, %v3070_v52  ;;  %v3110_v4 = vmul.f32 %v5029_v1, %v5029_v1  ;;  %v3140_v39 = vadd.f32 %v3139_v56, %v3109_v32  ;;  %3538 = vst [vmem:[%s6633_s12 + $0x169] sm:$0xff] %v5029_v1  ;;  %v4695_v25 = vpop.f32.mrb[30].mxu0  ;;  %v1780_v63 = vpop.f32.mrb[31].mxu1 }
 0x222   : > { %v5030_v5 = vadd.f32 %v4695_v25, %v4375_v13  ;;  %v3003_v15 = vpop.f32.mrb[31].mxu0 }
 0x223   : > { %v3141_v41 = vadd.f32 %v3140_v39, %v3110_v4  ;;  %v5031_v48 = vadd.f32 %v3003_v15, %v1780_v63  ;;  %v3072_v36 = vadd.f32 %v5028_v0, %v3071_v44 }
 0x224   : > { %3541 = vst [vmem:[%s6633_s12 + $0x189] sm:$0xff] %v5030_v5  ;;  %v3113_v10 = vmul.f32 %v5030_v5, %v5030_v5 }
 0x225   : > { %v3073_v50 = vadd.f32 %v5031_v48, %v3072_v36  ;;  %v3112_v12 = vmul.f32 %v5031_v48, %v5031_v48  ;;  %v3142_v3 = vadd.f32 %v3141_v41, %v3111_v22  ;;  %3540 = vst [vmem:[%s6633_s12 + $0x181] sm:$0xff] %v5031_v48 }
 0x227   : > { %v3074_v9 = vadd.f32 %v5030_v5, %v3073_v50  ;;  %v3143_v45 = vadd.f32 %v3142_v3, %v3112_v12 }
 0x229   : > { %v3075_v54 = vrot.slane %v3074_v9, 4  ;;  %v3144_v17 = vadd.f32 %v3143_v45, %v3113_v10 }
 0x22b   : > { %v3076_v23 = vadd.f32 %v3075_v54, %v3074_v9  ;;  %v3145_v27 = vrot.slane %v3144_v17, 4 }
 0x22d   : > { %v3077_v62 = vrot.slane %v3076_v23, 2  ;;  %v3146_v42 = vadd.f32 %v3145_v27, %v3144_v17 }
 0x22f   : > { %v3078_v7 = vadd.f32 %v3077_v62, %v3076_v23  ;;  %v3147_v24 = vrot.slane %v3146_v42, 2 }
 0x231   : > { %v3079_v26 = vrot.slane %v3078_v7, 1  ;;  %v3148_v37 = vadd.f32 %v3147_v24, %v3146_v42 }
 0x233   : > { %v3080_v30 = vadd.f32 %v3079_v26, %v3078_v7  ;;  %v3149_v53 = vrot.slane %v3148_v37, 1 }
 0x235   : > { %3081 = vst [vmem:[%s280_s15] sm:$0x1] %v3080_v30  ;;  %v3150_v28 = vadd.f32 %v3149_v53, %v3148_v37 }
 0x237   : > { %3151 = vst [vmem:[%s280_s15 + $0x1] sm:$0x1] %v3150_v28 }
 0x238 PF: > { %s16_s20 = sadd.s32 1, %s5311_s20   ;;  %s6920_s18 = smov %s5307_s19 }
 0x239   : > { %p13_p5 = scmp.ge.s32.totalorder %s16_s20, 4   ;;  %s6921_s19 = smov %s6923_s2 }
 0x23b   :  { %15 = sbr.rel (!%p13_p5) target bundleno = 2 (0x2), region = 90 }

// kernel: basic_block_forward.4
= control target key start
LH: loop header
LB: loop body
LE: loop exit
PB: predicated region body
PF: predicated region fallthrough
CT: control target
= control target key end

     0   :  { %s5566_s18 = smov 0   ;;  %s5568_s19 = smov 0   ;;  %s7215_s0 = inlined_call_operand.vmem [shape: f32[2,18,18,128], index: 0, kind: input, shape index: {}]   ;;  %s7216_s1 = inlined_call_operand.vmem [shape: f32[9,128,128], index: 1, kind: input, shape index: {}]   ;;  %s7217_s2 = inlined_call_operand.vmem [shape: f32[1,128], index: 2, kind: input, shape index: {}]   ;;  %s7218_s3 = inlined_call_operand.vmem [shape: f32[1,128], index: 3, kind: input, shape index: {}]   ;;  %s7219_s4 = inlined_call_operand.vmem [shape: f32[2,16,16,128], index: 4, kind: output, shape index: {0}]   ;;  %s7220_s5 = inlined_call_operand.vmem [shape: f32[2,2,128], index: 5, kind: output, shape index: {1}]  }
   0x1   :  { %s5570_s20 = smov 0  }
   0x2 LB: > { %s28_s21 = sadd.s32 1, %s5529_s19  ;;  %p3587_p0 = scmp.ge.s32.totalorder %s5533_s20, 1  ;;  %s5533_s20 = sphi %s5570_s20, %s16_s20   ;;  %s5529_s19 = sphi %s5568_s19, %s7463_s19   ;;  %s5525_s18 = sphi %s5566_s18, %s7462_s18  }
   0x3   : > { %p30_p1 = scmp.ge.s32.totalorder %s28_s21, 2  ;;  %p215_p2 = scmp.lt.s32.totalorder %s5533_s20, 3 }
   0x5   : > { %s7465_s21 = smov (%p30_p1, %s28_s21), 0  ;;  %p216_p3 = pnand %p3587_p0, %p215_p2 }
   0x7   : > { %219 = sbr.rel (%p216_p3) target bundleno = 568 (0x238), region = 36 }
   0xe   : > { %v3594_v0 = vld [vmem:[%s7216_s1 + $0x180] sm:$0xff]  ;;  %v3595_v1 = vld [vmem:[%s7216_s1 + $0x188] sm:$0xff]  ;;  %p257_p4 = scmp.lt.s32.totalorder %s5525_s18, 1  ;;  %v3596_v5 = vld [vmem:[%s7216_s1 + $0x190] sm:$0xff]  ;;  %v511_v16 = vlaneseq  ;;  %vm1410_vm0 = vcmask 1046528   ;;  %vm2359_vm3 = vcmask 1045504  }
   0xf   : > { %v3688_v2 = vld [vmem:[%s7216_s1 + $0x200] sm:$0xff]  ;;  %v4923_v3 = vpack.c.bf16 %v3595_v1, %v3594_v0  ;;  %v3689_v4 = vld [vmem:[%s7216_s1 + $0x208] sm:$0xff]  ;;  %v3597_v6 = vld [vmem:[%s7216_s1 + $0x198] sm:$0xff] }
  0x10   : > { %v5602_v7 = vpack.c.bf16 %v3689_v4, %v3688_v2  ;;  %v4927_v8 = vpack.c.bf16 %v3597_v6, %v3596_v5  ;;  %v3690_v9 = vld [vmem:[%s7216_s1 + $0x210] sm:$0xff]  ;;  %v3691_v10 = vld [vmem:[%s7216_s1 + $0x218] sm:$0xff]  ;;  %v3598_v11 = vld [vmem:[%s7216_s1 + $0x1a0] sm:$0xff]  ;;  %s7467_s18 = smov (!%p257_p4, %s5525_s18), 1  ;;  %v5649_v23 = vshrl.u32 %v511_v16, 7 }
  0x11   : > { %4924 = vmatprep.subr.bf16.mxu1 %v4923_v3  ;;  %v5615_v12 = vpack.c.bf16 %v3691_v10, %v3690_v9  ;;  %v3599_v13 = vld [vmem:[%s7216_s1 + $0x1a8] sm:$0xff]  ;;  %v3692_v14 = vld [vmem:[%s7216_s1 + $0x220] sm:$0xff]  ;;  %s5483_s25 = smul.u32 432, %s7467_s18  ;;  %v3600_v19 = vld [vmem:[%s7216_s1 + $0x1b0] sm:$0xff]  ;;  %s3770_s9 = sshll.u32 %s7467_s18, 8 }
  0x12   : > { %7322 = vst [vmem:[#allocation2_spill] sm:$0xff] %v5602_v7  ;;  %v3693_v15 = vld [vmem:[%s7216_s1 + $0x228] sm:$0xff]  ;;  %5052 = vmatprep.subr.bf16.mxu0 %v5602_v7  ;;  %4926 = vmatpush3.bf16.msra.mxu1 %v4923_v3  ;;  %v4931_v17 = vpack.c.bf16 %v3599_v13, %v3598_v11  ;;  %v3601_v20 = vld [vmem:[%s7216_s1 + $0x1b8] sm:$0xff]  ;;  %v3694_v21 = vld [vmem:[%s7216_s1 + $0x230] sm:$0xff]  ;;  %v5686_v38 = vadd.s32 16, %v5649_v23  ;;  %vm515_vm1 = vcmp.ge.s32.totalorder %v5649_v23, 1  ;;  %s7162_s13 = scalar_lea.vmem %s7219_s4, %s3770_s9 }
  0x13   : > { %7323 = vst [vmem:[#allocation3_spill] sm:$0xff] %v5615_v12  ;;  %5054 = vmatpush3.bf16.msra.mxu0 %v5602_v7  ;;  %4928 = vmatprep.subr.bf16.mxu1 %v4927_v8  ;;  %v5630_v18 = vpack.c.bf16 %v3693_v15, %v3692_v14  ;;  %v3695_v22 = vld [vmem:[%s7216_s1 + $0x238] sm:$0xff]  ;;  %s5647_s11 = scalar_lea.vmem %s7215_s0, %s5483_s25  ;;  %v4935_v24 = vpack.c.bf16 %v3601_v20, %v3600_v19  ;;  %v3602_v25 = vld [vmem:[%s7216_s1 + $0x1c0] sm:$0xff]  ;;  %v3603_v26 = vld [vmem:[%s7216_s1 + $0x1c8] sm:$0xff]  ;;  %s3591_s14 = sshll.u32 %s7467_s18, 1 }
  0x14   : > { %5056 = vmatprep.subr.bf16.mxu0 %v5615_v12  ;;  %v5659_v27 = vpack.c.bf16 %v3695_v22, %v3694_v21  ;;  %v3696_v28 = vld [vmem:[%s7216_s1 + $0x240] sm:$0xff]  ;;  %v3697_v29 = vld [vmem:[%s7216_s1 + $0x248] sm:$0xff]  ;;  %v284_v30 = vld [vmem:[%s5647_s11 + $0x18] sm:$0xff]  ;;  %v4939_v39 = vpack.c.bf16 %v3603_v26, %v3602_v25  ;;  %vm526_vm2 = vcmp.le.s32.totalorder %v5686_v38, 16  ;;  %s280_s17 = scalar_lea.vmem %s7220_s5, %s3591_s14 }
  0x15   : > { %7324 = vst [vmem:[#allocation4_spill] sm:$0xff] %v5630_v18  ;;  %v5671_v31 = vld [vmem:[%s7217_s2] ss:$0 sm:$0xff]  ;;  %v3604_v34 = vld [vmem:[%s7216_s1 + $0x1d0] sm:$0xff]  ;;  %v286_v37 = vld [vmem:[%s5647_s11 + $0x28] sm:$0x3]  ;;  %v5698_v44 = vpack.c.bf16 %v3697_v29, %v3696_v28 }
  0x16   : > { %4930 = vmatpush3.bf16.msra.mxu1 %v4927_v8  ;;  %7325 = vst [vmem:[#allocation5_spill] sm:$0xff] %v5659_v27  ;;  %v5676_v32 = vld [vmem:[%s7218_s3] ss:$0 sm:$0xff]  ;;  %v345_v35 = vmul.f32 %v5671_v31, %v284_v30  ;;  %v3605_v40 = vld [vmem:[%s7216_s1 + $0x1d8] sm:$0xff]  ;;  %v3698_v41 = vld [vmem:[%s7216_s1 + $0x250] sm:$0xff]  ;;  %v347_v42 = vmul.f32 %v5671_v31, %v286_v37 }
  0x17   : > { %5058 = vmatpush3.bf16.msra.mxu0 %v5615_v12  ;;  %4932 = vmatprep.subr.bf16.mxu1 %v4931_v17  ;;  %v285_v33 = vld [vmem:[%s5647_s11 + $0x20] sm:$0xff]  ;;  %v287_v43 = vld [vmem:[%s5647_s11 + $0x30] sm:$0xff]  ;;  %7326 = vst [vmem:[#allocation6_spill] sm:$0xff] %v5698_v44  ;;  %v3699_v45 = vld [vmem:[%s7216_s1 + $0x258] sm:$0xff]  ;;  %v4943_v58 = vpack.c.bf16 %v3605_v40, %v3604_v34 }
  0x18   : > { %5060 = vmatprep.subr.bf16.mxu0 %v5630_v18  ;;  %v346_v36 = vmul.f32 %v5671_v31, %v285_v33  ;;  %v406_v46 = vadd.f32 %v5676_v32, %v345_v35  ;;  %v348_v48 = vmul.f32 %v5671_v31, %v287_v43  ;;  %v288_v49 = vld [vmem:[%s5647_s11 + $0x38] sm:$0xff]  ;;  %v289_v50 = vld [vmem:[%s5647_s11 + $0x40] sm:$0x3]  ;;  %v408_v51 = vadd.f32 %v5676_v32, %v347_v42  ;;  %v290_v57 = vld [vmem:[%s5647_s11 + $0x48] sm:$0xff] }
  0x19   : > { %v349_v52 = vmul.f32 %v5671_v31, %v288_v49  ;;  %v350_v53 = vmul.f32 %v5671_v31, %v289_v50  ;;  %v5720_v59 = vpack.c.bf16 %v3699_v45, %v3698_v41  ;;  %v291_v62 = vld [vmem:[%s5647_s11 + $0x50] sm:$0xff]  ;;  %v3606_v63 = vld [vmem:[%s7216_s1 + $0x1e0] sm:$0xff]  ;;  %v3607_v0 = vld [vmem:[%s7216_s1 + $0x1e8] sm:$0xff]  ;;  %v351_v9 = vmul.f32 %v5671_v31, %v290_v57 }
  0x1a   : > { %4934 = vmatpush3.bf16.msra.mxu1 %v4931_v17  ;;  %v407_v47 = vadd.f32 %v5676_v32, %v346_v36  ;;  %v5712_v54 = vmax.f32 %v406_v46, 0.0  ;;  %v409_v56 = vadd.f32 %v5676_v32, %v348_v48  ;;  %v462_v60 = vmax.f32 %v408_v51, 0.0  ;;  %v3700_v5 = vld [vmem:[%s7216_s1 + $0x260] sm:$0xff]  ;;  %v3701_v6 = vld [vmem:[%s7216_s1 + $0x268] sm:$0xff]  ;;  %v3608_v10 = vld [vmem:[%s7216_s1 + $0x1f0] sm:$0xff] }
  0x1b   : > { %5062 = vmatpush3.bf16.msra.mxu0 %v5630_v18  ;;  %4936 = vmatprep.subr.bf16.mxu1 %v4935_v24  ;;  %7327 = vst [vmem:[#allocation7_spill] sm:$0xff] %v5720_v59  ;;  %v410_v61 = vadd.f32 %v5676_v32, %v349_v52  ;;  %v411_v4 = vadd.f32 %v5676_v32, %v350_v53  ;;  %v3609_v11 = vld [vmem:[%s7216_s1 + $0x1f8] sm:$0xff]  ;;  %v3702_v16 = vld [vmem:[%s7216_s1 + $0x270] sm:$0xff]  ;;  %v293_v21 = vld [vmem:[%s5647_s11 + $0x60] sm:$0xff] }
  0x1c   : > { %5064 = vmatprep.subr.bf16.mxu0 %v5659_v27  ;;  %v5714_v55 = vmax.f32 %v407_v47, 0.0  ;;  %4235 = vmatprep.mubr.msk.f32.mxu1 %vm515_vm1, %v5712_v54  ;;  %v5737_v1 = vsel %vm515_vm1, %v5712_v54, 0.0  ;;  %v5740_v3 = vmax.f32 %v409_v56, 0.0  ;;  %v352_v13 = vmul.f32 %v5671_v31, %v291_v62  ;;  %v292_v14 = vld [vmem:[%s5647_s11 + $0x58] sm:$0x3]  ;;  %v294_v28 = vld [vmem:[%s5647_s11 + $0x68] sm:$0xff] }
  0x1d   : > { %v1416_v8 = vrot.slane %v5737_v1, 1  ;;  %v4947_v15 = vpack.c.bf16 %v3607_v0, %v3606_v63  ;;  %v3703_v17 = vld [vmem:[%s7216_s1 + $0x278] sm:$0xff]  ;;  %v5773_v20 = vsel %vm526_vm2, %v462_v60, 0.0  ;;  %v5777_v22 = vpack.c.bf16 %v3701_v6, %v3700_v5  ;;  %v295_v29 = vld [vmem:[%s5647_s11 + $0x70] sm:$0x3]  ;;  %v297_v41 = vld [vmem:[%s5647_s11 + $0x80] sm:$0xff] }
  0x1e   : > { %4938 = vmatpush3.bf16.msra.mxu1 %v4935_v24  ;;  %v1417_v2 = vrot.slane %v5714_v55, 1  ;;  %v5780_v24 = vmax.f32 %v410_v61, 0.0  ;;  %v5785_v25 = vsel %vm515_vm1, %v5740_v3, 0.0  ;;  %v465_v26 = vmax.f32 %v411_v4, 0.0  ;;  %v296_v35 = vld [vmem:[%s5647_s11 + $0x78] sm:$0xff]  ;;  %v599_v42 = vld [vmem:[%s7216_s1] sm:$0xff] }
  0x1f   : > { %5066 = vmatpush3.bf16.msra.mxu0 %v5659_v27  ;;  %4940 = vmatprep.subr.bf16.mxu1 %v4939_v39  ;;  %7329 = vst [vmem:[#allocation9_spill] sm:$0xff] %v5777_v22  ;;  %v4951_v30 = vpack.c.bf16 %v3609_v11, %v3608_v10  ;;  %v412_v33 = vadd.f32 %v5676_v32, %v351_v9  ;;  %v1419_v37 = vrot.slane %v5773_v20, 1  ;;  %v1421_v43 = vrot.slane %v5785_v25, 1  ;;  %v600_v48 = vld [vmem:[%s7216_s1 + $0x8] sm:$0xff]  ;;  %v3704_v49 = vld [vmem:[%s7216_s1 + $0x380] sm:$0xff]  ;;  %v3707_v60 = vld [vmem:[%s7216_s1 + $0x398] sm:$0xff] }
  0x20   : > { %5068 = vmatprep.subr.bf16.mxu0 %v5698_v44  ;;  %v5769_v19 = vsel %vm1410_vm0, %v1416_v8, %v1417_v2  ;;  %v353_v34 = vmul.f32 %v5671_v31, %v292_v14  ;;  %v5792_v36 = vpack.c.bf16 %v3703_v17, %v3702_v16  ;;  %v354_v40 = vmul.f32 %v5671_v31, %v293_v21  ;;  %v298_v56 = vld [vmem:[%s5647_s11 + $0x88] sm:$0x3]  ;;  %v601_v0 = vld [vmem:[%s7216_s1 + $0x10] sm:$0xff]  ;;  %v602_v4 = vld [vmem:[%s7216_s1 + $0x18] sm:$0xff] }
  0x21   : > { %7328 = vst [vmem:[#allocation8_spill] sm:$0xff] %v5769_v19  ;;  %4555 = vmatprep.mubr.f32.mxu0 %v5769_v19  ;;  %v355_v46 = vmul.f32 %v5671_v31, %v294_v28  ;;  %v356_v47 = vmul.f32 %v5671_v31, %v295_v29  ;;  %v1422_v50 = vrot.slane %v5780_v24, 1  ;;  %v5816_v51 = vsel %vm526_vm2, %v465_v26, 0.0  ;;  %v3705_v57 = vld [vmem:[%s7216_s1 + $0x388] sm:$0xff]  ;;  %v3708_v26 = vld [vmem:[%s7216_s1 + $0x3a0] sm:$0xff]  ;;  %v308_v18 = vld [vmem:[%s5647_s11 + $0xd8] sm:$0xff] }
  0x22   : > { %4942 = vmatpush3.bf16.msra.mxu1 %v4939_v39  ;;  %7330 = vst [vmem:[#allocation10_spill] sm:$0xff] %v5792_v36  ;;  %v413_v39 = vadd.f32 %v5676_v32, %v352_v13  ;;  %v414_v45 = vadd.f32 %v5676_v32, %v353_v34  ;;  %v415_v52 = vadd.f32 %v5676_v32, %v354_v40  ;;  %v5830_v61 = vmax.f32 %v412_v33, 0.0  ;;  %v3709_v28 = vld [vmem:[%s7216_s1 + $0x3a8] sm:$0xff] }
  0x23   : > { %5070 = vmatpush3.bf16.msra.mxu0 %v5698_v44  ;;  %4944 = vmatprep.subr.bf16.mxu1 %v4943_v58  ;;  %v357_v53 = vmul.f32 %v5671_v31, %v296_v35  ;;  %v358_v63 = vmul.f32 %v5671_v31, %v297_v41  ;;  %v416_v6 = vadd.f32 %v5676_v32, %v355_v46  ;;  %v1424_v11 = vrot.slane %v5816_v51, 1  ;;  %v299_v35 = vld [vmem:[%s5647_s11 + $0x90] sm:$0xff]  ;;  %v612_v12 = vld [vmem:[%s7216_s1 + $0x68] sm:$0xff] }
  0x24   : > { %5072 = vmatprep.subr.bf16.mxu0 %v5720_v59  ;;  %v468_v62 = vmax.f32 %v414_v45, 0.0  ;;  %v5839_v5 = vmax.f32 %v415_v52, 0.0  ;;  %v417_v8 = vadd.f32 %v5676_v32, %v356_v47  ;;  %v4955_v10 = vpack.c.bf16 %v600_v48, %v599_v42  ;;  %v302_v45 = vld [vmem:[%s5647_s11 + $0xa8] sm:$0xff] }
  0x25   : > { %v418_v9 = vadd.f32 %v5676_v32, %v357_v53  ;;  %v5846_v13 = vmax.f32 %v413_v39, 0.0  ;;  %v359_v14 = vmul.f32 %v5671_v31, %v298_v56  ;;  %v5083_v16 = vpack.c.bf16 %v3705_v57, %v3704_v49  ;;  %v301_v39 = vld [vmem:[%s5647_s11 + $0xa0] sm:$0x3]  ;;  %v303_v57 = vld [vmem:[%s5647_s11 + $0xb0] sm:$0xff] }
  0x26   : > { %4946 = vmatpush3.bf16.msra.mxu1 %v4943_v58  ;;  %v3706_v58 = vld [vmem:[%s7216_s1 + $0x390] sm:$0xff]  ;;  %v5856_v17 = vsel %vm1410_vm0, %v1421_v43, %v1422_v50  ;;  %v5871_v29 = vpack.c.bf16 %v602_v4, %v601_v0  ;;  %v5875_v33 = vsel %vm526_vm2, %v468_v62, 0.0  ;;  %v419_v34 = vadd.f32 %v5676_v32, %v358_v63  ;;  %v3711_v62 = vld [vmem:[%s7216_s1 + $0x3b8] sm:$0xff]  ;;  %v603_v0 = vld [vmem:[%s7216_s1 + $0x20] sm:$0xff] }
  0x27   : > { %5074 = vmatpush3.bf16.msra.mxu0 %v5720_v59  ;;  %4948 = vmatprep.subr.bf16.mxu1 %v4947_v15  ;;  %7332 = vst [vmem:[#allocation12_spill] sm:$0xff] %v5856_v17  ;;  %v5858_v21 = vpack.c.bf16 %v3707_v60, %v3706_v58  ;;  %7333 = vst [vmem:[#allocation13_spill] sm:$0xff] %v5875_v33  ;;  %v5881_v40 = vmax.f32 %v416_v6, 0.0  ;;  %v5886_v41 = vsel %vm515_vm1, %v5839_v5, 0.0  ;;  %v471_v42 = vmax.f32 %v417_v8, 0.0  ;;  %v3710_v60 = vld [vmem:[%s7216_s1 + $0x3b0] sm:$0xff] }
  0x28   : > { %5076 = vmatprep.subr.bf16.mxu0 %v5777_v22  ;;  %7334 = vst [vmem:[#allocation14_spill] sm:$0xff] %v5886_v41  ;;  %v5888_v43 = vmax.f32 %v418_v9, 0.0  ;;  %v5893_v46 = vsel %vm1410_vm0, %v1422_v50, %v1424_v11  ;;  %v5896_v47 = vpack.c.bf16 %v3709_v28, %v3708_v26  ;;  %v420_v48 = vadd.f32 %v5676_v32, %v359_v14  ;;  %v604_v11 = vld [vmem:[%s7216_s1 + $0x28] sm:$0xff]  ;;  %v304_v26 = vld [vmem:[%s5647_s11 + $0xb8] sm:$0x3] }
  0x29   : > { %7335 = vst [vmem:[#allocation15_spill] sm:$0xff] %v5893_v46  ;;  %v360_v52 = vmul.f32 %v5671_v31, %v299_v35  ;;  %v362_v56 = vmul.f32 %v5671_v31, %v301_v39  ;;  %v1429_v50 = vrot.slane %v5875_v33, 1  ;;  %v1431_v58 = vrot.slane %v5886_v41, 1  ;;  %v322_v33 = vld [vmem:[%s5647_s11 + $0x148] sm:$0x3] }
  0x2a   : > { %4950 = vmatpush3.bf16.msra.mxu1 %v4947_v15  ;;  %v5853_v15 = vsel %vm1410_vm0, %v1417_v2, %v1419_v37  ;;  %v5869_v2 = vsel %vm515_vm1, %v5830_v61, 0.0  ;;  %v300_v37 = vld [vmem:[%s5647_s11 + $0x98] sm:$0xff]  ;;  %v5913_v63 = vmax.f32 %v419_v34, 0.0  ;;  %v363_v4 = vmul.f32 %v5671_v31, %v302_v45 }
  0x2b   : > { %5078 = vmatpush3.bf16.msra.mxu0 %v5777_v22  ;;  %4952 = vmatprep.subr.bf16.mxu1 %v4951_v30  ;;  %7331 = vst [vmem:[#allocation11_spill] sm:$0xff] %v5853_v15  ;;  %v1426_v49 = vrot.slane %v5869_v2, 1  ;;  %v361_v53 = vmul.f32 %v5671_v31, %v300_v37  ;;  %v1432_v6 = vrot.slane %v5881_v40, 1  ;;  %v5923_v8 = vsel %vm526_vm2, %v471_v42, 0.0  ;;  %v305_v37 = vld [vmem:[%s5647_s11 + $0xc0] sm:$0xff] }
  0x2c   : > { %5080 = vmatprep.subr.bf16.mxu0 %v5792_v36  ;;  %7336 = vst [vmem:[#allocation16_spill] sm:$0xff] %v5923_v8  ;;  %v5928_v9 = vsel %vm515_vm1, %v5888_v43, 0.0  ;;  %v421_v14 = vadd.f32 %v5676_v32, %v360_v52  ;;  %v423_v34 = vadd.f32 %v5676_v32, %v362_v56  ;;  %v364_v35 = vmul.f32 %v5671_v31, %v303_v57  ;;  %v306_v56 = vld [vmem:[%s5647_s11 + $0xc8] sm:$0xff] }
  0x2d   : > { %7337 = vst [vmem:[#allocation17_spill] sm:$0xff] %v5928_v9  ;;  %v422_v28 = vadd.f32 %v5676_v32, %v361_v53  ;;  %v424_v45 = vadd.f32 %v5676_v32, %v363_v4  ;;  %v1434_v52 = vrot.slane %v5923_v8, 1  ;;  %v4963_v53 = vpack.c.bf16 %v604_v11, %v603_v0  ;;  %v307_v4 = vld [vmem:[%s5647_s11 + $0xd0] sm:$0x3]  ;;  %v3712_v11 = vld [vmem:[%s7216_s1 + $0x3c0] sm:$0xff] }
  0x2e   : > { %4954 = vmatpush3.bf16.msra.mxu1 %v4951_v30  ;;  %v1427_v30 = vrot.slane %v5846_v13, 1  ;;  %v5949_v42 = vmax.f32 %v421_v14, 0.0  ;;  %v5965_v57 = vsel %vm1410_vm0, %v1431_v58, %v1432_v6  ;;  %v366_v0 = vmul.f32 %v5671_v31, %v305_v37  ;;  %v3713_v14 = vld [vmem:[%s7216_s1 + $0x3c8] sm:$0xff]  ;;  %v316_v8 = vld [vmem:[%s5647_s11 + $0x118] sm:$0x3] }
  0x2f   : > { %5082 = vmatpush3.bf16.msra.mxu0 %v5792_v36  ;;  %4956 = vmatprep.subr.bf16.mxu1 %v4955_v10  ;;  %7340 = vst [vmem:[#allocation20_spill] sm:$0xff] %v5965_v57  ;;  %v477_v37 = vmax.f32 %v423_v34, 0.0  ;;  %v425_v36 = vadd.f32 %v5676_v32, %v364_v35  ;;  %v367_v59 = vmul.f32 %v5671_v31, %v306_v56 }
  0x30   : > { %5084 = vmatprep.subr.bf16.mxu0 %v5083_v16  ;;  %v5945_v39 = vsel %vm1410_vm0, %v1426_v49, %v1427_v30  ;;  %v365_v49 = vmul.f32 %v5671_v31, %v304_v26  ;;  %v5989_v26 = vmax.f32 %v422_v28, 0.0  ;;  %v427_v34 = vadd.f32 %v5676_v32, %v366_v0 }
  0x31   : > { %4236 = vmatmul.mubr.f32.vlgmr.msra.gmra.mrb[0].mxu1 %v5714_v55  ;;  %7338 = vst [vmem:[#allocation18_spill] sm:$0xff] %v5945_v39  ;;  %v368_v35 = vmul.f32 %v5671_v31, %v307_v4  ;;  %v5099_v56 = vpack.c.bf16 %v3713_v14, %v3712_v11  ;;  %v6031_v0 = vmax.f32 %v425_v36, 0.0  ;;  %v607_v4 = vld [vmem:[%s7216_s1 + $0x40] sm:$0xff]  ;;  %v428_v36 = vadd.f32 %v5676_v32, %v367_v59 }
  0x32   : > { %4556 = vmatmul.mubr.f32.vlgmr.msra.gmra.mrb[0].mxu0 %v5853_v15  ;;  %4958 = vmatpush3.bf16.msra.mxu1 %v4955_v10  ;;  %v474_v10 = vmax.f32 %v420_v48, 0.0  ;;  %v5955_v48 = vsel %vm1410_vm0, %v1427_v30, %v1429_v50  ;;  %v1437_v30 = vrot.slane %v5913_v63, 1  ;;  %v605_v50 = vld [vmem:[%s7216_s1 + $0x30] sm:$0xff]  ;;  %v426_v22 = vadd.f32 %v5676_v32, %v365_v49 }
  0x33   : > { %5086 = vmatpush3.bf16.msra.mxu0 %v5083_v16  ;;  %4238 = vmatprep.mubr.msk.f32.mxu1 %vm515_vm1, %v5740_v3  ;;  %v5947_v16 = vpack.c.bf16 %v3711_v62, %v3710_v60  ;;  %7339 = vst [vmem:[#allocation19_spill] sm:$0xff] %v5955_v48  ;;  %v1436_v60 = vrot.slane %v5928_v9, 1  ;;  %v606_v62 = vld [vmem:[%s7216_s1 + $0x38] sm:$0xff]  ;;  %v6048_v44 = vmax.f32 %v427_v34, 0.0 }
  0x34   : > { %4558 = vmatprep.mubr.f32.mxu0 %v5856_v17  ;;  %5088 = vmatprep.subr.bf16.mxu0 %v5858_v21  ;;  %v5981_v58 = vsel %vm526_vm2, %v474_v10, 0.0  ;;  %v5999_v10 = vmax.f32 %v424_v45, 0.0  ;;  %v4967_v28 = vpack.c.bf16 %v606_v62, %v605_v50  ;;  %v3714_v50 = vld [vmem:[%s7216_s1 + $0x3d0] sm:$0xff]  ;;  %v3715_v62 = vld [vmem:[%s7216_s1 + $0x3d8] sm:$0xff]  ;;  %v480_v14 = vmax.f32 %v426_v22, 0.0 }
  0x35   : > { %4239 = vmatmul.mubr.f32.gmra.mrb[2].mxu1 %v5780_v24  ;;  %4960 = vmatprep.subr.bf16.mxu1 %v5871_v29  ;;  %7341 = vst [vmem:[#allocation21_spill] sm:$0xff] %v5981_v58  ;;  %v6014_v45 = vsel %vm1410_vm0, %v1436_v60, %v1437_v30  ;;  %v1439_v49 = vrot.slane %v5981_v58, 1  ;;  %v6029_v60 = vsel %vm526_vm2, %v477_v37, 0.0  ;;  %v429_v37 = vadd.f32 %v5676_v32, %v368_v35  ;;  %v3641_v58 = vld [vmem:[%s7216_s1 + $0x300] sm:$0xff] }
  0x36   : > { %4559 = vmatmul.mubr.f32.gmra.mrb[2].mxu0 %v5893_v46  ;;  %4241 = vmatprep.mubr.msk.f32.mxu1 %vm515_vm1, %v5830_v61  ;;  %7344 = vst [vmem:[#allocation24_spill] sm:$0xff] %v6014_v45  ;;  %7345 = vst [vmem:[#allocation25_spill] sm:$0xff] %v6029_v60  ;;  %v6043_v11 = vsel %vm515_vm1, %v5999_v10, 0.0  ;;  %v1444_v34 = vrot.slane %v6029_v60, 1 }
  0x37   : > { %5090 = vmatpush3.bf16.msra.mxu0 %v5858_v21  ;;  %4561 = vmatprep.mubr.f32.mxu0 %v5945_v39  ;;  %v5997_v21 = vsel %vm515_vm1, %v5949_v42, 0.0  ;;  %7346 = vst [vmem:[#allocation26_spill] sm:$0xff] %v6043_v11  ;;  %v6057_v59 = vsel %vm1410_vm0, %v1437_v30, %v1439_v49  ;;  %v1446_v35 = vrot.slane %v6043_v11, 1  ;;  %v1447_v30 = vrot.slane %v6031_v0, 1 }
  0x38   : > { %5092 = vmatprep.subr.bf16.mxu0 %v5896_v47  ;;  %4962 = vmatpush3.bf16.msra.mxu1 %v5871_v29  ;;  %7342 = vst [vmem:[#allocation22_spill] sm:$0xff] %v5997_v21  ;;  %v6011_v29 = vsel %vm1410_vm0, %v1432_v6, %v1434_v52  ;;  %v1441_v6 = vrot.slane %v5997_v21, 1  ;;  %v1442_v52 = vrot.slane %v5989_v26, 1  ;;  %7347 = vst [vmem:[#allocation27_spill] sm:$0xff] %v6057_v59  ;;  %v6074_v49 = vsel %vm526_vm2, %v480_v14, 0.0  ;;  %v317_v21 = vld [vmem:[%s5647_s11 + $0x120] sm:$0xff] }
  0x39   : > { %4242 = vmatmul.mubr.f32.gmra.mrb[4].mxu1 %v5846_v13  ;;  %4964 = vmatprep.subr.bf16.mxu1 %v4963_v53  ;;  %7343 = vst [vmem:[#allocation23_spill] sm:$0xff] %v6011_v29  ;;  %7349 = vst [vmem:[#allocation29_spill] sm:$0xff] %v6074_v49  ;;  %v6088_v14 = vsel %vm515_vm1, %v6048_v44, 0.0  ;;  %v1449_v7 = vrot.slane %v6074_v49, 1 }
  0x3a   : > { %4562 = vmatmul.mubr.f32.gmra.mrb[4].mxu0 %v5955_v48  ;;  %4244 = vmatprep.mubr.msk.f32.mxu1 %vm515_vm1, %v5839_v5  ;;  %v6060_v22 = vsel %vm1410_vm0, %v1441_v6, %v1442_v52  ;;  %v3717_v6 = vld [vmem:[%s7216_s1 + $0x3e8] sm:$0xff]  ;;  %7350 = vst [vmem:[#allocation30_spill] sm:$0xff] %v6088_v14  ;;  %v6104_v19 = vsel %vm1410_vm0, %v1442_v52, %v1444_v34  ;;  %v3718_v52 = vld [vmem:[%s7216_s1 + $0x3f0] sm:$0xff]  ;;  %v3719_v34 = vld [vmem:[%s7216_s1 + $0x3f8] sm:$0xff] }
  0x3b   : > { %5094 = vmatpush3.bf16.msra.mxu0 %v5896_v47  ;;  %4564 = vmatprep.mubr.f32.mxu0 %v5965_v57  ;;  %v608_v47 = vld [vmem:[%s7216_s1 + $0x48] sm:$0xff]  ;;  %7348 = vst [vmem:[#allocation28_spill] sm:$0xff] %v6060_v22  ;;  %7351 = vst [vmem:[#allocation31_spill] sm:$0xff] %v6104_v19 }
  0x3c   : > { %5096 = vmatprep.subr.bf16.mxu0 %v5947_v16  ;;  %4966 = vmatpush3.bf16.msra.mxu1 %v4963_v53  ;;  %v5103_v53 = vpack.c.bf16 %v3715_v62, %v3714_v50  ;;  %v4971_v27 = vpack.c.bf16 %v608_v47, %v607_v4  ;;  %v609_v50 = vld [vmem:[%s7216_s1 + $0x50] sm:$0xff]  ;;  %v3716_v62 = vld [vmem:[%s7216_s1 + $0x3e0] sm:$0xff]  ;;  %v6082_v4 = vmax.f32 %v428_v36, 0.0  ;;  %v483_v47 = vmax.f32 %v429_v37, 0.0 }
  0x3d   : > { %4245 = vmatmul.mubr.f32.gmra.mrb[6].mxu1 %v5881_v40  ;;  %4968 = vmatprep.subr.bf16.mxu1 %v4967_v28  ;;  %v309_v36 = vld [vmem:[%s5647_s11 + $0xe0] sm:$0xff]  ;;  %v5107_v11 = vpack.c.bf16 %v3717_v6, %v3716_v62 }
  0x3e   : > { %4565 = vmatmul.mubr.f32.gmra.mrb[6].mxu0 %v6011_v29  ;;  %4247 = vmatprep.mubr.msk.f32.mxu1 %vm515_vm1, %v5888_v43  ;;  %v611_v37 = vld [vmem:[%s7216_s1 + $0x60] sm:$0xff]  ;;  %v1452_v60 = vrot.slane %v6082_v4, 1 }
  0x3f   : > { %5098 = vmatpush3.bf16.msra.mxu0 %v5947_v16  ;;  %4567 = vmatprep.mubr.f32.mxu0 %v6014_v45  ;;  %v610_v16 = vld [vmem:[%s7216_s1 + $0x58] sm:$0xff]  ;;  %v4979_v62 = vpack.c.bf16 %v612_v12, %v611_v37  ;;  %v314_v12 = vld [vmem:[%s5647_s11 + $0x108] sm:$0xff]  ;;  %v613_v37 = vld [vmem:[%s7216_s1 + $0x70] sm:$0xff] }
  0x40   : > { %5100 = vmatprep.subr.bf16.mxu0 %v5099_v56  ;;  %4970 = vmatpush3.bf16.msra.mxu1 %v4967_v28  ;;  %v369_v28 = vmul.f32 %v5671_v31, %v308_v18  ;;  %v4975_v15 = vpack.c.bf16 %v610_v16, %v609_v50  ;;  %v311_v18 = vld [vmem:[%s5647_s11 + $0xf0] sm:$0xff]  ;;  %v6109_v50 = vsel %vm1410_vm0, %v1446_v35, %v1447_v30  ;;  %v1451_v16 = vrot.slane %v6088_v14, 1 }
  0x41   : > { %4248 = vmatmul.mubr.f32.gmra.mrb[8].mxu1 %v5913_v63  ;;  %4972 = vmatprep.subr.bf16.mxu1 %v4971_v27  ;;  %7352 = vst [vmem:[#allocation32_spill] sm:$0xff] %v6109_v50  ;;  %v370_v35 = vmul.f32 %v5671_v31, %v309_v36  ;;  %v372_v6 = vmul.f32 %v5671_v31, %v311_v18 }
  0x42   : > { %4568 = vmatmul.mubr.f32.gmra.mrb[8].mxu0 %v6057_v59  ;;  %4250 = vmatprep.mubr.msk.f32.mxu1 %vm515_vm1, %v5949_v42  ;;  %v6134_v14 = vsel %vm1410_vm0, %v1447_v30, %v1449_v7  ;;  %v5111_v18 = vpack.c.bf16 %v3719_v34, %v3718_v52  ;;  %v3720_v30 = vld [vmem:[%s7216_s1 + $0x100] sm:$0xff]  ;;  %v375_v52 = vmul.f32 %v5671_v31, %v314_v12  ;;  %v315_v34 = vld [vmem:[%s5647_s11 + $0x110] sm:$0xff] }
  0x43   : > { %5102 = vmatpush3.bf16.msra.mxu0 %v5099_v56  ;;  %4570 = vmatprep.mubr.f32.mxu0 %v6060_v22  ;;  %v6115_v56 = vsel %vm526_vm2, %v483_v47, 0.0  ;;  %v312_v47 = vld [vmem:[%s5647_s11 + $0xf8] sm:$0xff]  ;;  %7354 = vst [vmem:[#allocation34_spill] sm:$0xff] %v6134_v14  ;;  %v431_v7 = vadd.f32 %v5676_v32, %v370_v35  ;;  %v3722_v12 = vld [vmem:[%s7216_s1 + $0x110] sm:$0xff] }
  0x44   : > { %5104 = vmatprep.subr.bf16.mxu0 %v5103_v53  ;;  %7353 = vst [vmem:[#allocation33_spill] sm:$0xff] %v6115_v56  ;;  %4974 = vmatpush3.bf16.msra.mxu1 %v4971_v27  ;;  %v430_v27 = vadd.f32 %v5676_v32, %v369_v28  ;;  %v1454_v36 = vrot.slane %v6115_v56, 1  ;;  %v614_v28 = vld [vmem:[%s7216_s1 + $0x78] sm:$0xff]  ;;  %v3721_v56 = vld [vmem:[%s7216_s1 + $0x108] sm:$0xff]  ;;  %v373_v49 = vmul.f32 %v5671_v31, %v312_v47 }
  0x45   : > { %4251 = vmatmul.mubr.f32.gmra.mrb[10].mxu1 %v5989_v26  ;;  %4976 = vmatprep.subr.bf16.mxu1 %v4975_v15  ;;  %v4983_v35 = vpack.c.bf16 %v614_v28, %v613_v37  ;;  %v3723_v37 = vld [vmem:[%s7216_s1 + $0x118] sm:$0xff]  ;;  %v318_v28 = vld [vmem:[%s5647_s11 + $0x128] sm:$0xff] }
  0x46   : > { %4571 = vmatmul.mubr.f32.gmra.mrb[10].mxu0 %v6104_v19  ;;  %4253 = vmatprep.mubr.msk.f32.mxu1 %vm515_vm1, %v5999_v10  ;;  %v6167_v47 = vsel %vm1410_vm0, %v1452_v60, %v1454_v36  ;;  %v376_v36 = vmul.f32 %v5671_v31, %v315_v34  ;;  %v5119_v34 = vpack.c.bf16 %v3723_v37, %v3722_v12  ;;  %v323_v12 = vld [vmem:[%s5647_s11 + $0x150] sm:$0xff] }
  0x47   : > { %5106 = vmatpush3.bf16.msra.mxu0 %v5103_v53  ;;  %4573 = vmatprep.mubr.f32.mxu0 %v6109_v50  ;;  %v6145_v53 = vsel %vm1410_vm0, %v1451_v16, %v1452_v60  ;;  %v433_v16 = vadd.f32 %v5676_v32, %v372_v6  ;;  %7356 = vst [vmem:[#allocation36_spill] sm:$0xff] %v6167_v47 }
  0x48   : > { %5108 = vmatprep.subr.bf16.mxu0 %v5107_v11  ;;  %7355 = vst [vmem:[#allocation35_spill] sm:$0xff] %v6145_v53  ;;  %4978 = vmatpush3.bf16.msra.mxu1 %v4975_v15  ;;  %v6160_v15 = vmax.f32 %v430_v27, 0.0  ;;  %v3642_v27 = vld [vmem:[%s7216_s1 + $0x308] sm:$0xff]  ;;  %v5115_v6 = vpack.c.bf16 %v3721_v56, %v3720_v30  ;;  %v434_v60 = vadd.f32 %v5676_v32, %v373_v49  ;;  %v320_v30 = vld [vmem:[%s5647_s11 + $0x138] sm:$0xff] }
  0x49   : > { %4254 = vmatmul.mubr.f32.gmra.mrb[12].mxu1 %v6031_v0  ;;  %4980 = vmatprep.subr.bf16.mxu1 %v4979_v62  ;;  %v6191_v56 = vmax.f32 %v433_v16, 0.0  ;;  %v436_v49 = vadd.f32 %v5676_v32, %v375_v52  ;;  %v437_v52 = vadd.f32 %v5676_v32, %v376_v36  ;;  %v321_v36 = vld [vmem:[%s5647_s11 + $0x140] sm:$0xff] }
  0x4a   : > { %4574 = vmatmul.mubr.f32.gmra.mrb[12].mxu0 %v6134_v14  ;;  %4256 = vmatprep.mubr.msk.f32.mxu1 %vm515_vm1, %v6048_v44  ;;  %v6201_v16 = vmax.f32 %v434_v60, 0.0  ;;  %v381_v60 = vmul.f32 %v5671_v31, %v320_v30  ;;  %v310_v30 = vld [vmem:[%s5647_s11 + $0xe8] sm:$0x3] }
  0x4b   : > { %5110 = vmatpush3.bf16.msra.mxu0 %v5107_v11  ;;  %4576 = vmatprep.mubr.f32.mxu0 %v6145_v53  ;;  %v6177_v11 = vmax.f32 %v431_v7, 0.0  ;;  %v6196_v7 = vpack.c.bf16 %v3642_v27, %v3641_v58  ;;  %v3724_v58 = vld [vmem:[%s7216_s1 + $0x120] sm:$0xff] }
  0x4c   : > { %5112 = vmatprep.subr.bf16.mxu0 %v5111_v18  ;;  %4982 = vmatpush3.bf16.msra.mxu1 %v4979_v62  ;;  %v378_v62 = vmul.f32 %v5671_v31, %v317_v21  ;;  %v379_v21 = vmul.f32 %v5671_v31, %v318_v28  ;;  %v6224_v28 = vmax.f32 %v437_v52, 0.0 }
  0x4d   : > { %4257 = vmatmul.mubr.f32.gmra.mrb[14].mxu1 %v6082_v4  ;;  %4984 = vmatprep.subr.bf16.mxu1 %v4983_v35 }
  0x4e   : > { %4577 = vmatmul.mubr.f32.gmra.mrb[14].mxu0 %v6167_v47  ;;  %4259 = vmatprep.mubr.msk.f32.mxu1 %vm515_vm1, %v6160_v15  ;;  %v439_v27 = vadd.f32 %v5676_v32, %v378_v62  ;;  %v3726_v62 = vld [vmem:[%s7216_s1 + $0x130] sm:$0xff] }
  0x4f   : > { %5114 = vmatpush3.bf16.msra.mxu0 %v5111_v18  ;;  %4635 = vmatprep.mubr.f32.mxu0 %v5856_v17  ;;  %v3725_v18 = vld [vmem:[%s7216_s1 + $0x128] sm:$0xff] }
  0x50   : > { %5116 = vmatprep.subr.bf16.mxu0 %v5115_v6  ;;  %4986 = vmatpush3.bf16.msra.mxu1 %v4983_v35  ;;  %v6216_v35 = vmax.f32 %v436_v49, 0.0  ;;  %v5123_v37 = vpack.c.bf16 %v3725_v18, %v3724_v58  ;;  %v440_v49 = vadd.f32 %v5676_v32, %v379_v21  ;;  %v6239_v52 = vmax.f32 %v439_v27, 0.0  ;;  %v324_v18 = vld [vmem:[%s5647_s11 + $0x158] sm:$0xff] }
  0x51   : > { %4260 = vmatmul.mubr.f32.gmra.mrb[16].mxu1 %v6177_v11  ;;  %4988 = vmatprep.subr.bf16.mxu1 %v6196_v7  ;;  %v442_v21 = vadd.f32 %v5676_v32, %v381_v60  ;;  %v384_v58 = vmul.f32 %v5671_v31, %v323_v12  ;;  %v385_v60 = vmul.f32 %v5671_v31, %v324_v18  ;;  %v313_v12 = vld [vmem:[%s5647_s11 + $0x100] sm:$0x3] }
  0x52   : > { %4636 = vmatmul.mubr.f32.vlgmr.msra.gmra.mrb[0].mxu0 %v5893_v46  ;;  %4262 = vmatprep.mubr.msk.f32.mxu1 %vm515_vm1, %v6191_v56  ;;  %v382_v46 = vmul.f32 %v5671_v31, %v321_v36  ;;  %7357 = vst [vmem:[#allocation37_spill] sm:$0xff] %v6239_v52  ;;  %v326_v36 = vld [vmem:[%s5647_s11 + $0x168] sm:$0xff]  ;;  %v6248_v17 = vmax.f32 %v440_v49, 0.0  ;;  %v329_v18 = vld [vmem:[%s5647_s11 + $0x180] sm:$0xff] }
  0x53   : > { %5118 = vmatpush3.bf16.msra.mxu0 %v5115_v6  ;;  %4638 = vmatprep.mubr.f32.mxu0 %v5945_v39  ;;  %v3727_v6 = vld [vmem:[%s7216_s1 + $0x138] sm:$0xff]  ;;  %v6263_v49 = vmax.f32 %v442_v21, 0.0 }
  0x54   : > { %5120 = vmatprep.subr.bf16.mxu0 %v5119_v34  ;;  %v5127_v39 = vpack.c.bf16 %v3727_v6, %v3726_v62  ;;  %v443_v27 = vadd.f32 %v5676_v32, %v382_v46  ;;  %v3729_v62 = vld [vmem:[%s7216_s1 + $0x148] sm:$0xff]  ;;  %v445_v46 = vadd.f32 %v5676_v32, %v384_v58  ;;  %v387_v6 = vmul.f32 %v5671_v31, %v326_v36 }
  0x55   : > { %4263 = vmatmul.mubr.f32.gmra.mrb[18].mxu1 %v6201_v16  ;;  %v446_v58 = vadd.f32 %v5676_v32, %v385_v60 }
  0x56   : > { %4639 = vmatmul.mubr.f32.gmra.mrb[2].mxu0 %v5955_v48  ;;  %4265 = vmatprep.mubr.msk.f32.mxu1 %vm515_vm1, %v6216_v35  ;;  %v371_v48 = vmul.f32 %v5671_v31, %v310_v30  ;;  %v327_v30 = vld [vmem:[%s5647_s11 + $0x170] sm:$0xff]  ;;  %v6274_v21 = vmax.f32 %v443_v27, 0.0  ;;  %v6288_v27 = vmax.f32 %v445_v46, 0.0  ;;  %v448_v60 = vadd.f32 %v5676_v32, %v387_v6 }
  0x57   : > { %4641 = vmatprep.mubr.f32.mxu0 %v5965_v57  ;;  %5122 = vmatpush3.bf16.msra.mxu0 %v5119_v34  ;;  %v3728_v34 = vld [vmem:[%s7216_s1 + $0x140] sm:$0xff]  ;;  %v388_v36 = vmul.f32 %v5671_v31, %v327_v30  ;;  %v6298_v30 = vsel %vm515_vm1, %v6160_v15, 0.0  ;;  %v6302_v6 = vmax.f32 %v446_v58, 0.0 }
  0x58   : > { %5124 = vmatprep.subr.bf16.mxu0 %v5123_v37  ;;  %v432_v57 = vadd.f32 %v5676_v32, %v371_v48  ;;  %v5131_v9 = vpack.c.bf16 %v3729_v62, %v3728_v34  ;;  %v3731_v48 = vld [vmem:[%s7216_s1 + $0x158] sm:$0xff]  ;;  %v330_v34 = vld [vmem:[%s5647_s11 + $0x188] sm:$0xff]  ;;  %v377_v62 = vmul.f32 %v5671_v31, %v316_v8  ;;  %7358 = vst [vmem:[#allocation38_spill] sm:$0xff] %v6298_v30  ;;  %v3732_v8 = vld [vmem:[%s7216_s1 + $0x160] sm:$0xff] }
  0x59   : > { %4266 = vmatmul.mubr.f32.gmra.mrb[20].mxu1 %v6224_v28 }
  0x5a   : > { %4642 = vmatmul.mubr.f32.gmra.mrb[4].mxu0 %v6011_v29  ;;  %4268 = vmatprep.mubr.msk.f32.mxu1 %vm515_vm1, %v6239_v52  ;;  %v374_v29 = vmul.f32 %v5671_v31, %v313_v12  ;;  %v390_v12 = vmul.f32 %v5671_v31, %v329_v18  ;;  %v449_v18 = vadd.f32 %v5676_v32, %v388_v36  ;;  %v1456_v36 = vrot.slane %v6298_v30, 1 }
  0x5b   : > { %4644 = vmatprep.mubr.f32.mxu0 %v6014_v45  ;;  %5126 = vmatpush3.bf16.msra.mxu0 %v5123_v37  ;;  %v3730_v37 = vld [vmem:[%s7216_s1 + $0x150] sm:$0xff] }
  0x5c   : > { %5128 = vmatprep.subr.bf16.mxu0 %v5127_v39  ;;  %v435_v46 = vadd.f32 %v5676_v32, %v374_v29  ;;  %v5135_v45 = vpack.c.bf16 %v3731_v48, %v3730_v37  ;;  %v6317_v29 = vmax.f32 %v448_v60, 0.0  ;;  %v451_v58 = vadd.f32 %v5676_v32, %v390_v12 }
  0x5d   : > { %4269 = vmatmul.mubr.f32.gmra.mrb[22].mxu1 %v6248_v17  ;;  %v1457_v37 = vrot.slane %v6177_v11, 1  ;;  %v6326_v48 = vsel %vm515_vm1, %v6191_v56, 0.0  ;;  %v6335_v30 = vmax.f32 %v449_v18, 0.0 }
  0x5e   : > { %4645 = vmatmul.mubr.f32.gmra.mrb[6].mxu0 %v6057_v59  ;;  %4271 = vmatprep.mubr.msk.f32.mxu1 %vm515_vm1, %v6263_v49  ;;  %v486_v59 = vmax.f32 %v432_v57, 0.0  ;;  %v3733_v57 = vld [vmem:[%s7216_s1 + $0x168] sm:$0xff]  ;;  %7359 = vst [vmem:[#allocation39_spill] sm:$0xff] %v6326_v48 }
  0x5f   : > { %4647 = vmatprep.mubr.f32.mxu0 %v6060_v22  ;;  %5130 = vmatpush3.bf16.msra.mxu0 %v5127_v39  ;;  %v391_v39 = vmul.f32 %v5671_v31, %v330_v34  ;;  %v319_v22 = vld [vmem:[%s5647_s11 + $0x130] sm:$0x3]  ;;  %v438_v34 = vadd.f32 %v5676_v32, %v377_v62  ;;  %v1461_v62 = vrot.slane %v6326_v48, 1  ;;  %v6355_v18 = vsel %vm1410_vm0, %v1456_v36, %v1457_v37 }
  0x60   : > { %5132 = vmatprep.subr.bf16.mxu0 %v5131_v9  ;;  %v6331_v60 = vsel %vm526_vm2, %v486_v59, 0.0  ;;  %v380_v12 = vmul.f32 %v5671_v31, %v319_v22  ;;  %v3735_v59 = vld [vmem:[%s7216_s1 + $0x178] sm:$0xff]  ;;  %v6349_v22 = vmax.f32 %v451_v58, 0.0  ;;  %7362 = vst [vmem:[#allocation42_spill] sm:$0xff] %v6355_v18 }
  0x61   : > { %4272 = vmatmul.mubr.f32.gmra.mrb[24].mxu1 %v6274_v21  ;;  %7360 = vst [vmem:[#allocation40_spill] sm:$0xff] %v6331_v60  ;;  %v452_v41 = vadd.f32 %v5676_v32, %v391_v39  ;;  %v1459_v39 = vrot.slane %v6331_v60, 1  ;;  %v325_v60 = vld [vmem:[%s5647_s11 + $0x160] sm:$0x3] }
  0x62   : > { %4648 = vmatmul.mubr.f32.gmra.mrb[8].mxu0 %v6104_v19  ;;  %4274 = vmatprep.mubr.msk.f32.mxu1 %vm515_vm1, %v6288_v27  ;;  %v489_v19 = vmax.f32 %v435_v46, 0.0  ;;  %7361 = vst [vmem:[#allocation41_spill] sm:$0xff] %v6349_v22  ;;  %v1462_v46 = vrot.slane %v6201_v16, 1 }
  0x63   : > { %4650 = vmatprep.mubr.f32.mxu0 %v6109_v50  ;;  %5134 = vmatpush3.bf16.msra.mxu0 %v5131_v9  ;;  %v5139_v50 = vpack.c.bf16 %v3733_v57, %v3732_v8  ;;  %v3734_v9 = vld [vmem:[%s7216_s1 + $0x170] sm:$0xff]  ;;  %v6361_v8 = vsel %vm515_vm1, %v6216_v35, 0.0  ;;  %v492_v57 = vmax.f32 %v438_v34, 0.0  ;;  %v6370_v48 = vmax.f32 %v452_v41, 0.0  ;;  %v3736_v34 = vld [vmem:[%s7216_s1 + $0x280] sm:$0xff] }
  0x64   : > { %5136 = vmatprep.subr.bf16.mxu0 %v5135_v45  ;;  %7363 = vst [vmem:[#allocation43_spill] sm:$0xff] %v6361_v8  ;;  %v6365_v58 = vsel %vm526_vm2, %v489_v19, 0.0  ;;  %v5143_v36 = vpack.c.bf16 %v3735_v59, %v3734_v9  ;;  %v3737_v19 = vld [vmem:[%s7216_s1 + $0x288] sm:$0xff]  ;;  %v1466_v41 = vrot.slane %v6361_v8, 1 }
  0x65   : > { %4275 = vmatmul.mubr.f32.gmra.mrb[26].mxu1 %v6302_v6  ;;  %7364 = vst [vmem:[#allocation44_spill] sm:$0xff] %v6365_v58  ;;  %7365 = vst [vmem:[#allocation45_spill] sm:$0xff] %v6370_v48  ;;  %v1464_v9 = vrot.slane %v6365_v58, 1  ;;  %v6395_v59 = vsel %vm526_vm2, %v492_v57, 0.0  ;;  %v386_v57 = vmul.f32 %v5671_v31, %v325_v60  ;;  %v6410_v8 = vpack.c.bf16 %v3737_v19, %v3736_v34  ;;  %v328_v58 = vld [vmem:[%s5647_s11 + $0x178] sm:$0x3] }
  0x66   : > { %4651 = vmatmul.mubr.f32.gmra.mrb[10].mxu0 %v6134_v14  ;;  %4277 = vmatprep.mubr.msk.f32.mxu1 %vm515_vm1, %v6317_v29  ;;  %v441_v14 = vadd.f32 %v5676_v32, %v380_v12  ;;  %v6390_v12 = vsel %vm1410_vm0, %v1457_v37, %v1459_v39  ;;  %v3644_v37 = vld [vmem:[%s7216_s1 + $0x318] sm:$0xff]  ;;  %v1469_v34 = vrot.slane %v6395_v59, 1 }
  0x67   : > { %4653 = vmatprep.mubr.f32.mxu0 %v6145_v53  ;;  %5138 = vmatpush3.bf16.msra.mxu0 %v5135_v45  ;;  %v383_v53 = vmul.f32 %v5671_v31, %v322_v33  ;;  %v6384_v33 = vsel %vm1410_vm0, %v1461_v62, %v1462_v46  ;;  %v1467_v45 = vrot.slane %v6224_v28, 1  ;;  %7367 = vst [vmem:[#allocation47_spill] sm:$0xff] %v6390_v12  ;;  %v6400_v62 = vsel %vm515_vm1, %v6239_v52, 0.0 }
  0x68   : > { %5140 = vmatprep.subr.bf16.mxu0 %v5139_v50  ;;  %7366 = vst [vmem:[#allocation46_spill] sm:$0xff] %v6384_v33  ;;  %7368 = vst [vmem:[#allocation48_spill] sm:$0xff] %v6400_v62  ;;  %v495_v39 = vmax.f32 %v441_v14, 0.0  ;;  %v1471_v14 = vrot.slane %v6400_v62, 1  ;;  %v6423_v60 = vsel %vm1410_vm0, %v1462_v46, %v1464_v9  ;;  %v3646_v46 = vld [vmem:[%s7216_s1 + $0x328] sm:$0xff]  ;;  %v389_v9 = vmul.f32 %v5671_v31, %v328_v58 }
  0x69   : > { %4278 = vmatmul.mubr.f32.gmra.mrb[28].mxu1 %v6335_v30  ;;  %v6417_v52 = vsel %vm1410_vm0, %v1466_v41, %v1467_v45  ;;  %7370 = vst [vmem:[#allocation50_spill] sm:$0xff] %v6423_v60  ;;  %v1477_v62 = vrot.slane %v6274_v21, 1  ;;  %v6458_v31 = vsel %vm1410_vm0, %v1467_v45, %v1469_v34  ;;  %v5510_v34 = vld [vmem:[%s7217_s2] ss:$0 sm:$0xff] }
  0x6a   : > { %4654 = vmatmul.mubr.f32.gmra.mrb[12].mxu0 %v6167_v47  ;;  %4280 = vmatprep.mubr.msk.f32.mxu1 %vm515_vm1, %v6349_v22  ;;  %v3643_v47 = vld [vmem:[%s7216_s1 + $0x310] sm:$0xff]  ;;  %7369 = vst [vmem:[#allocation49_spill] sm:$0xff] %v6417_v52  ;;  %v6433_v41 = vsel %vm526_vm2, %v495_v39, 0.0  ;;  %7373 = vst [vmem:[#allocation52_spill] sm:$0xff] %v6458_v31 }
  0x6b   : > { %4656 = vmatprep.mubr.f32.mxu0 %v6355_v18  ;;  %5142 = vmatpush3.bf16.msra.mxu0 %v5139_v50  ;;  %v444_v18 = vadd.f32 %v5676_v32, %v383_v53  ;;  %v7273_v50 = vmov 0.0   ;;  %v1472_v53 = vrot.slane %v6248_v17, 1  ;;  %v4991_v19 = vpack.c.bf16 %v3644_v37, %v3643_v47  ;;  %v331_v37 = vld [vmem:[%s5647_s11 + $0x190] sm:$0x3] }
  0x6c   : > { %5144 = vmatprep.subr.bf16.mxu0 %v5143_v36  ;;  %v447_v47 = vadd.f32 %v5676_v32, %v386_v57  ;;  %v1474_v32 = vrot.slane %v6433_v41, 1 }
  0x6d   : > { %4281 = vmatmul.mubr.f32.gmra.mrb[30].mxu1 %v6370_v48 }
  0x6e   : > { %4657 = vmatmul.mubr.f32.gmra.mrb[14].mxu0 %v6390_v12  ;;  %4315 = vmatprep.mubr.f32.mxu1 %v7273_v50  ;;  %v6429_v50 = vsel %vm515_vm1, %v6263_v49, 0.0  ;;  %v498_v12 = vmax.f32 %v444_v18, 0.0  ;;  %v6449_v18 = vsel %vm1410_vm0, %v1471_v14, %v1472_v53  ;;  %v501_v14 = vmax.f32 %v447_v47, 0.0 }
  0x6f   : > { %4659 = vmatprep.mubr.f32.mxu0 %v6384_v33  ;;  %5146 = vmatpush3.bf16.msra.mxu0 %v5143_v36  ;;  %v3645_v33 = vld [vmem:[%s7216_s1 + $0x320] sm:$0xff]  ;;  %v7371_v36 = vmov 0.0   ;;  %7372 = vst [vmem:[#allocation51_spill] sm:$0xff] %v6449_v18  ;;  %v1476_v39 = vrot.slane %v6429_v50, 1  ;;  %v1482_v47 = vrot.slane %v6302_v6, 1 }
  0x70   : > { %5148 = vmatprep.subr.bf16.mxu0 %v6410_v8  ;;  %v4995_v58 = vpack.c.bf16 %v3646_v46, %v3645_v33  ;;  %v6468_v57 = vsel %vm526_vm2, %v498_v12, 0.0  ;;  %v3647_v33 = vld [vmem:[%s7216_s1 + $0x330] sm:$0xff]  ;;  %v3648_v12 = vld [vmem:[%s7216_s1 + $0x338] sm:$0xff] }
  0x71   : > { %4316 = vmatmul.mubr.f32.vlgmr.msra.gmra.mrb[0].mxu1 %v7371_v36 }
  0x72   : > { %4660 = vmatmul.mubr.f32.gmra.mrb[16].mxu0 %v6423_v60  ;;  %4990 = vmatpush3.bf16.msra.mxu1 %v6196_v7  ;;  %v6464_v7 = vsel %vm515_vm1, %v6288_v27, 0.0  ;;  %v6504_v60 = vsel %vm526_vm2, %v501_v14, 0.0 }
  0x73   : > { %4318 = vmatprep.mubr.msk.f32.mxu1 %vm515_vm1, %v5712_v54  ;;  %4662 = vmatprep.mubr.f32.mxu0 %v6417_v52  ;;  %7374 = vst [vmem:[#allocation53_spill] sm:$0xff] %v6464_v7  ;;  %v5509_v54 = vld [vmem:[%s7218_s3] ss:$0 sm:$0xff]  ;;  %v392_v52 = vmul.f32 %v5510_v34, %v331_v37  ;;  %v1481_v46 = vrot.slane %v6464_v7, 1  ;;  %v6494_v37 = vsel %vm1410_vm0, %v1476_v39, %v1477_v62  ;;  %v1479_v34 = vrot.slane %v6468_v57, 1  ;;  %v3650_v39 = vld [vmem:[%s7216_s1 + $0x348] sm:$0xff] }
  0x74   : > { %4992 = vmatprep.subr.bf16.mxu1 %v4991_v19  ;;  %v450_v45 = vadd.f32 %v5509_v54, %v389_v9  ;;  %v6491_v9 = vsel %vm1410_vm0, %v1472_v53, %v1474_v32  ;;  %7376 = vst [vmem:[#allocation55_spill] sm:$0xff] %v6494_v37  ;;  %v4999_v7 = vpack.c.bf16 %v3648_v12, %v3647_v33  ;;  %v1484_v14 = vrot.slane %v6504_v60, 1 }
  0x75   : > { %4319 = vmatmul.mubr.f32.gmra.mrb[2].mxu1 %v5714_v55  ;;  %7375 = vst [vmem:[#allocation54_spill] sm:$0xff] %v6491_v9  ;;  %v453_v53 = vadd.f32 %v5509_v54, %v392_v52  ;;  %v6518_v32 = vsel %vm1410_vm0, %v1481_v46, %v1482_v47  ;;  %v6522_v52 = vsel %vm1410_vm0, %v1477_v62, %v1479_v34  ;;  %v593_v12 = vsel %vm515_vm1, %v6349_v22, 0.0  ;;  %v3651_v62 = vld [vmem:[%s7216_s1 + $0x350] sm:$0xff] }
  0x76   : > { %4663 = vmatmul.mubr.f32.gmra.mrb[18].mxu0 %v6458_v31  ;;  %4321 = vmatprep.mubr.msk.f32.mxu1 %vm515_vm1, %v5740_v3  ;;  %v6500_v31 = vsel %vm515_vm1, %v6317_v29, 0.0  ;;  %7377 = vst [vmem:[#allocation56_spill] sm:$0xff] %v6518_v32  ;;  %7378 = vst [vmem:[#allocation57_spill] sm:$0xff] %v6522_v52 }
  0x77   : > { %4665 = vmatprep.mubr.f32.mxu0 %v6449_v18  ;;  %4994 = vmatpush3.bf16.msra.mxu1 %v4991_v19  ;;  %v504_v18 = vmax.f32 %v450_v45, 0.0  ;;  %v3649_v19 = vld [vmem:[%s7216_s1 + $0x340] sm:$0xff]  ;;  %v1486_v54 = vrot.slane %v6500_v31, 1  ;;  %v1487_v45 = vrot.slane %v6335_v30, 1  ;;  %v507_v46 = vmax.f32 %v453_v53, 0.0 }
  0x78   : > { %4996 = vmatprep.subr.bf16.mxu1 %v4995_v58  ;;  %v1491_v53 = vrot.slane %v593_v12, 1 }
  0x79   : > { %4322 = vmatmul.mubr.f32.gmra.mrb[4].mxu1 %v5780_v24  ;;  %v6529_v33 = vsel %vm526_vm2, %v504_v18, 0.0  ;;  %v6547_v18 = vsel %vm1410_vm0, %v1482_v47, %v1484_v14  ;;  %v3653_v47 = vld [vmem:[%s7216_s1 + $0x360] sm:$0xff] }
  0x7a   : > { %4666 = vmatmul.mubr.f32.gmra.mrb[20].mxu0 %v6491_v9  ;;  %4324 = vmatprep.mubr.msk.f32.mxu1 %vm515_vm1, %v5830_v61  ;;  %7379 = vst [vmem:[#allocation58_spill] sm:$0xff] %v6547_v18  ;;  %v1489_v34 = vrot.slane %v6529_v33, 1 }
  0x7b   : > { %4668 = vmatprep.mubr.f32.mxu0 %v6494_v37  ;;  %4998 = vmatpush3.bf16.msra.mxu1 %v4995_v58  ;;  %v5003_v37 = vpack.c.bf16 %v3650_v39, %v3649_v19  ;;  %v3652_v58 = vld [vmem:[%s7216_s1 + $0x358] sm:$0xff]  ;;  %v6551_v19 = vsel %vm1410_vm0, %v1486_v54, %v1487_v45  ;;  %v1492_v39 = vrot.slane %v6370_v48, 1 }
  0x7c   : > { %5000 = vmatprep.subr.bf16.mxu1 %v4999_v7  ;;  %7380 = vst [vmem:[#allocation59_spill] sm:$0xff] %v6551_v19  ;;  %v5007_v9 = vpack.c.bf16 %v3652_v58, %v3651_v62  ;;  %v6569_v38 = vsel %vm1410_vm0, %v1487_v45, %v1489_v34  ;;  %v3655_v62 = vld [vmem:[%s7216_s1 + $0x370] sm:$0xff]  ;;  %v3656_v58 = vld [vmem:[%s7216_s1 + $0x378] sm:$0xff]  ;;  %v6590_v45 = vrot.slane %v7371_v36, 1 }
  0x7d   : > { %4325 = vmatmul.mubr.f32.gmra.mrb[6].mxu1 %v5846_v13  ;;  %7381 = vst [vmem:[#allocation60_spill] sm:$0xff] %v6569_v38  ;;  %v6572_v54 = vsel %vm1410_vm0, %v1491_v53, %v1492_v39  ;;  %v5015_v34 = vpack.c.bf16 %v3656_v58, %v3655_v62  ;;  %v3672_v53 = vld [vmem:[%s7216_s1 + $0x80] sm:$0xff]  ;;  %v2365_v62 = vrot.slane %v5737_v1, 2  ;;  %v2366_v58 = vrot.slane %v5714_v55, 2 }
  0x7e   : > { %4669 = vmatmul.mubr.f32.gmra.mrb[22].mxu0 %v6522_v52  ;;  %4327 = vmatprep.mubr.msk.f32.mxu1 %vm515_vm1, %v5839_v5  ;;  %v595_v52 = vsel %vm526_vm2, %v507_v46, 0.0  ;;  %7382 = vst [vmem:[#allocation61_spill] sm:$0xff] %v6572_v54  ;;  %7384 = vst [vmem:[#allocation63_spill] sm:$0xff] %v6590_v45  ;;  %v2368_v55 = vrot.slane %v5773_v20, 2  ;;  %v3741_v20 = vld [vmem:[%s7216_s1 + $0x2a8] sm:$0xff] }
  0x7f   : > { %4671 = vmatprep.mubr.f32.mxu0 %v6518_v32  ;;  %5002 = vmatpush3.bf16.msra.mxu1 %v4999_v7  ;;  %v3654_v7 = vld [vmem:[%s7216_s1 + $0x368] sm:$0xff]  ;;  %v1494_v14 = vrot.slane %v595_v52, 1  ;;  %v3746_v32 = vld [vmem:[%s7216_s1 + $0x2d0] sm:$0xff] }
  0x80   : > { %5004 = vmatprep.subr.bf16.mxu1 %v5003_v37  ;;  %v5011_v46 = vpack.c.bf16 %v3654_v7, %v3653_v47  ;;  %v3673_v47 = vld [vmem:[%s7216_s1 + $0x88] sm:$0xff]  ;;  %v6606_v7 = vrot.slane %v7371_v36, 2 }
  0x81   : > { %4328 = vmatmul.mubr.f32.gmra.mrb[8].mxu1 %v5881_v40 }
  0x82   : > { %4672 = vmatmul.mubr.f32.gmra.mrb[24].mxu0 %v6547_v18  ;;  %4330 = vmatprep.mubr.msk.f32.mxu1 %vm515_vm1, %v5888_v43  ;;  %7385 = vst [vmem:[#allocation64_spill] sm:$0xff] %v6606_v7 }
  0x83   : > { %4674 = vmatprep.mubr.f32.mxu0 %v6551_v19  ;;  %5006 = vmatpush3.bf16.msra.mxu1 %v5003_v37  ;;  %v6587_v37 = vsel %vm1410_vm0, %v1492_v39, %v1494_v14  ;;  %v2440_v39 = vrot.slane %v593_v12, 2  ;;  %v2443_v14 = vrot.slane %v595_v52, 2  ;;  %v3738_v12 = vld [vmem:[%s7216_s1 + $0x290] sm:$0xff]  ;;  %v3739_v52 = vld [vmem:[%s7216_s1 + $0x298] sm:$0xff]  ;;  %v3744_v19 = vld [vmem:[%s7216_s1 + $0x2c0] sm:$0xff] }
  0x84   : > { %5008 = vmatprep.subr.bf16.mxu1 %v5007_v9  ;;  %7383 = vst [vmem:[#allocation62_spill] sm:$0xff] %v6587_v37 }
  0x85   : > { %4331 = vmatmul.mubr.f32.gmra.mrb[10].mxu1 %v5913_v63  ;;  %v7419_v23 = vld [vmem:[#allocation63_spill] sm:$0xff] }
  0x86   : > { %4675 = vmatmul.mubr.f32.gmra.mrb[26].mxu0 %v6569_v38  ;;  %4333 = vmatprep.mubr.msk.f32.mxu1 %vm515_vm1, %v5949_v42 }
  0x87   : > { %4677 = vmatprep.mubr.f32.mxu0 %v6572_v54  ;;  %5010 = vmatpush3.bf16.msra.mxu1 %v5007_v9  ;;  %v2441_v9 = vrot.slane %v6370_v48, 2  ;;  %v3750_v48 = vld [vmem:[%s7216_s1 + $0x2f0] sm:$0xff] }
  0x88   : > { %5012 = vmatprep.subr.bf16.mxu1 %v5011_v46 }
  0x89   : > { %4334 = vmatmul.mubr.f32.gmra.mrb[12].mxu1 %v5989_v26  ;;  %v6613_v54 = vsel %vm2359_vm3, %v2440_v39, %v2441_v9  ;;  %v6623_v1 = vsel %vm2359_vm3, %v2441_v9, %v2443_v14  ;;  %v5151_v39 = vpack.c.bf16 %v3739_v52, %v3738_v12  ;;  %v3740_v9 = vld [vmem:[%s7216_s1 + $0x2a0] sm:$0xff]  ;;  %v2376_v12 = vrot.slane %v5846_v13, 2 }
  0x8a   : > { %4678 = vmatmul.mubr.f32.gmra.mrb[28].mxu0 %v6587_v37  ;;  %4336 = vmatprep.mubr.msk.f32.mxu1 %vm515_vm1, %v5999_v10  ;;  %v6610_v37 = vpack.c.bf16 %v3673_v47, %v3672_v53  ;;  %7386 = vst [vmem:[#allocation65_spill] sm:$0xff] %v6613_v54  ;;  %7387 = vst [vmem:[#allocation66_spill] sm:$0xff] %v6623_v1  ;;  %v2370_v53 = vrot.slane %v5785_v25, 2  ;;  %v2371_v47 = vrot.slane %v5780_v24, 2  ;;  %v2391_v1 = vrot.slane %v5989_v26, 2 }
  0x8b   : > { %4680 = vmatprep.mubr.f32.mxu0 %v6590_v45  ;;  %5014 = vmatpush3.bf16.msra.mxu1 %v5011_v46  ;;  %v6632_v46 = vsel %vm2359_vm3, %v2365_v62, %v2366_v58  ;;  %v6651_v25 = vsel %vm2359_vm3, %v2366_v58, %v2368_v55  ;;  %v2375_v62 = vrot.slane %v5869_v2, 2  ;;  %v5155_v52 = vpack.c.bf16 %v3741_v20, %v3740_v9  ;;  %v3743_v58 = vld [vmem:[%s7216_s1 + $0x2b8] sm:$0xff]  ;;  %v7389_v9 = vld [vmem:[#allocation14_spill] sm:$0xff] }
  0x8c   : > { %5016 = vmatprep.subr.bf16.mxu1 %v5015_v34  ;;  %v6655_v14 = vsel %vm2359_vm3, %v2370_v53, %v2371_v47  ;;  %v7388_v2 = vld [vmem:[#allocation13_spill] sm:$0xff]  ;;  %v2380_v20 = vrot.slane %v7389_v9, 2  ;;  %v2386_v9 = vrot.slane %v5913_v63, 2 }
  0x8d   : > { %4337 = vmatmul.mubr.f32.gmra.mrb[14].mxu1 %v6031_v0  ;;  %v2378_v55 = vrot.slane %v7388_v2, 2  ;;  %v6676_v53 = vsel %vm2359_vm3, %v2375_v62, %v2376_v12 }
  0x8e   : > { %4681 = vmatmul.mubr.f32.gmra.mrb[30].mxu0 %v6590_v45  ;;  %4339 = vmatprep.mubr.msk.f32.mxu1 %vm515_vm1, %v6048_v44  ;;  %v3748_v45 = vld [vmem:[%s7216_s1 + $0x2e0] sm:$0xff] }
  0x8f   : > { %4715 = vmatprep.mubr.f32.mxu0 %v6606_v7  ;;  %5018 = vmatpush3.bf16.msra.mxu1 %v5015_v34  ;;  %v2373_v34 = vrot.slane %v5816_v51, 2 }
  0x90   : > { %5020 = vmatprep.subr.bf16.mxu1 %v6610_v37 }
  0x91   : > { %4340 = vmatmul.mubr.f32.gmra.mrb[16].mxu1 %v6082_v4  ;;  %v6672_v51 = vsel %vm2359_vm3, %v2371_v47, %v2373_v34  ;;  %v3745_v47 = vld [vmem:[%s7216_s1 + $0x2c8] sm:$0xff]  ;;  %v7390_v34 = vld [vmem:[#allocation16_spill] sm:$0xff] }
  0x92   : > { %4716 = vmatmul.mubr.f32.vlgmr.msra.gmra.mrb[0].mxu0 %v6606_v7  ;;  %4342 = vmatprep.mubr.msk.f32.mxu1 %vm515_vm1, %v6160_v15  ;;  %v2381_v7 = vrot.slane %v5881_v40, 2  ;;  %v2383_v62 = vrot.slane %v7390_v34, 2  ;;  %v5163_v18 = vpack.c.bf16 %v3745_v47, %v3744_v19  ;;  %v7394_v34 = vld [vmem:[#allocation22_spill] sm:$0xff] }
  0x93   : > { %5150 = vmatpush3.bf16.msra.mxu0 %v6410_v8  ;;  %4718 = vmatprep.mubr.f32.mxu0 %v6632_v46  ;;  %v3742_v8 = vld [vmem:[%s7216_s1 + $0x2b0] sm:$0xff] }
  0x94   : > { %5152 = vmatprep.subr.bf16.mxu0 %v5151_v39  ;;  %v5159_v38 = vpack.c.bf16 %v3743_v58, %v3742_v8  ;;  %v6697_v8 = vsel %vm2359_vm3, %v2380_v20, %v2381_v7  ;;  %v7391_v58 = vld [vmem:[#allocation17_spill] sm:$0xff]  ;;  %v6714_v19 = vsel %vm2359_vm3, %v2381_v7, %v2383_v62  ;;  %v3749_v7 = vld [vmem:[%s7216_s1 + $0x2e8] sm:$0xff] }
  0x95   : > { %4343 = vmatmul.mubr.f32.gmra.mrb[18].mxu1 %v6177_v11  ;;  %v2385_v2 = vrot.slane %v7391_v58, 2  ;;  %v2390_v58 = vrot.slane %v7394_v34, 2  ;;  %v2396_v34 = vrot.slane %v6031_v0, 2  ;;  %v5171_v36 = vpack.c.bf16 %v3749_v7, %v3748_v45  ;;  %v7399_v45 = vld [vmem:[#allocation29_spill] sm:$0xff]  ;;  %v7401_v7 = vld [vmem:[#allocation30_spill] sm:$0xff] }
  0x96   : > { %4719 = vmatmul.mubr.f32.gmra.mrb[2].mxu0 %v6651_v25  ;;  %4345 = vmatprep.mubr.msk.f32.mxu1 %vm515_vm1, %v6191_v56 }
  0x97   : > { %4721 = vmatprep.mubr.f32.mxu0 %v6655_v14  ;;  %5154 = vmatpush3.bf16.msra.mxu0 %v5151_v39  ;;  %v6693_v39 = vsel %vm2359_vm3, %v2376_v12, %v2378_v55  ;;  %v3747_v12 = vld [vmem:[%s7216_s1 + $0x2d8] sm:$0xff]  ;;  %v6718_v47 = vsel %vm2359_vm3, %v2385_v2, %v2386_v9  ;;  %v6739_v2 = vsel %vm2359_vm3, %v2390_v58, %v2391_v1 }
  0x98   : > { %5156 = vmatprep.subr.bf16.mxu0 %v5155_v52  ;;  %v7393_v55 = vld [vmem:[#allocation21_spill] sm:$0xff]  ;;  %v5167_v54 = vpack.c.bf16 %v3747_v12, %v3746_v32  ;;  %7396 = vst [vmem:[#allocation13_spill] sm:$0xff] %v6739_v2  ;;  %v7397_v12 = vld [vmem:[#allocation26_spill] sm:$0xff] }
  0x99   : > { %4346 = vmatmul.mubr.f32.gmra.mrb[20].mxu1 %v6201_v16  ;;  %v2388_v20 = vrot.slane %v7393_v55, 2  ;;  %v2395_v55 = vrot.slane %v7397_v12, 2  ;;  %v2401_v12 = vrot.slane %v6082_v4, 2 }
  0x9a   : > { %4722 = vmatmul.mubr.f32.gmra.mrb[4].mxu0 %v6672_v51  ;;  %4348 = vmatprep.mubr.msk.f32.mxu1 %vm515_vm1, %v6216_v35 }
  0x9b   : > { %4724 = vmatprep.mubr.f32.mxu0 %v6676_v53  ;;  %5158 = vmatpush3.bf16.msra.mxu0 %v5155_v52  ;;  %v7392_v52 = vld [vmem:[#allocation37_spill] sm:$0xff]  ;;  %v6735_v32 = vsel %vm2359_vm3, %v2386_v9, %v2388_v20  ;;  %v2398_v20 = vrot.slane %v7399_v45, 2  ;;  %v6760_v58 = vsel %vm2359_vm3, %v2395_v55, %v2396_v34 }
  0x9c   : > { %5160 = vmatprep.subr.bf16.mxu0 %v5159_v38  ;;  %v3751_v9 = vld [vmem:[%s7216_s1 + $0x2f8] sm:$0xff]  ;;  %7400 = vst [vmem:[#allocation16_spill] sm:$0xff] %v6760_v58 }
  0x9d   : > { %4349 = vmatmul.mubr.f32.gmra.mrb[22].mxu1 %v6224_v28  ;;  %v5175_v22 = vpack.c.bf16 %v3751_v9, %v3750_v48  ;;  %v6777_v48 = vsel %vm2359_vm3, %v2396_v34, %v2398_v20  ;;  %v7404_v9 = vld [vmem:[#allocation38_spill] sm:$0xff]  ;;  %v3674_v34 = vld [vmem:[%s7216_s1 + $0x90] sm:$0xff] }
  0x9e   : > { %4725 = vmatmul.mubr.f32.gmra.mrb[6].mxu0 %v6693_v39  ;;  %4351 = vmatprep.mubr.msk.f32.mxu1 %vm515_vm1, %v7392_v52  ;;  %7402 = vst [vmem:[#allocation17_spill] sm:$0xff] %v6777_v48  ;;  %v2405_v45 = vrot.slane %v7404_v9, 2  ;;  %v7405_v20 = vld [vmem:[#allocation40_spill] sm:$0xff] }
  0x9f   : > { %4727 = vmatprep.mubr.f32.mxu0 %v6697_v8  ;;  %5162 = vmatpush3.bf16.msra.mxu0 %v5159_v38  ;;  %v7395_v38 = vld [vmem:[#allocation25_spill] sm:$0xff] }
  0xa0   : > { %5164 = vmatprep.subr.bf16.mxu0 %v5163_v18  ;;  %v2393_v62 = vrot.slane %v7395_v38, 2  ;;  %v2400_v38 = vrot.slane %v7401_v7, 2  ;;  %v2406_v7 = vrot.slane %v6177_v11, 2 }
  0xa1   : > { %4352 = vmatmul.mubr.f32.gmra.mrb[24].mxu1 %v6248_v17 }
  0xa2   : > { %4728 = vmatmul.mubr.f32.gmra.mrb[8].mxu0 %v6714_v19  ;;  %4354 = vmatprep.mubr.msk.f32.mxu1 %vm515_vm1, %v6263_v49  ;;  %v6781_v55 = vsel %vm2359_vm3, %v2400_v38, %v2401_v12  ;;  %v2408_v38 = vrot.slane %v7405_v20, 2  ;;  %v2416_v20 = vrot.slane %v6224_v28, 2 }
  0xa3   : > { %4730 = vmatprep.mubr.f32.mxu0 %v6718_v47  ;;  %5166 = vmatpush3.bf16.msra.mxu0 %v5163_v18  ;;  %v6756_v18 = vsel %vm2359_vm3, %v2391_v1, %v2393_v62  ;;  %v3753_v1 = vld [vmem:[%s7216_s1 + $0x408] sm:$0xff] }
  0xa4   : > { %5168 = vmatprep.subr.bf16.mxu0 %v5167_v54  ;;  %7398 = vst [vmem:[#allocation14_spill] sm:$0xff] %v6756_v18 }
  0xa5   : > { %4355 = vmatmul.mubr.f32.gmra.mrb[26].mxu1 %v6274_v21 }
  0xa6   : > { %4731 = vmatmul.mubr.f32.gmra.mrb[10].mxu0 %v6735_v32  ;;  %4357 = vmatprep.mubr.msk.f32.mxu1 %vm515_vm1, %v6288_v27 }
  0xa7   : > { %4733 = vmatprep.mubr.f32.mxu0 %v6739_v2  ;;  %5170 = vmatpush3.bf16.msra.mxu0 %v5167_v54  ;;  %v3752_v2 = vld [vmem:[%s7216_s1 + $0x400] sm:$0xff]  ;;  %v7403_v54 = vld [vmem:[#allocation33_spill] sm:$0xff] }
  0xa8   : > { %5172 = vmatprep.subr.bf16.mxu0 %v5171_v36  ;;  %v2403_v62 = vrot.slane %v7403_v54, 2  ;;  %v7406_v54 = vld [vmem:[#allocation39_spill] sm:$0xff] }
  0xa9   : > { %4358 = vmatmul.mubr.f32.gmra.mrb[28].mxu1 %v6302_v6  ;;  %v2410_v9 = vrot.slane %v7406_v54, 2 }
  0xaa   : > { %4734 = vmatmul.mubr.f32.gmra.mrb[12].mxu0 %v6756_v18  ;;  %4360 = vmatprep.mubr.msk.f32.mxu1 %vm515_vm1, %v6317_v29  ;;  %v6785_v18 = vpack.c.bf16 %v3753_v1, %v3752_v2  ;;  %v6800_v2 = vsel %vm2359_vm3, %v2401_v12, %v2403_v62  ;;  %v6804_v1 = vsel %vm2359_vm3, %v2405_v45, %v2406_v7  ;;  %v7407_v12 = vld [vmem:[#allocation44_spill] sm:$0xff] }
  0xab   : > { %4736 = vmatprep.mubr.f32.mxu0 %v6760_v58  ;;  %5174 = vmatpush3.bf16.msra.mxu0 %v5171_v36  ;;  %v3675_v36 = vld [vmem:[%s7216_s1 + $0x98] sm:$0xff]  ;;  %v2411_v58 = vrot.slane %v6201_v16, 2  ;;  %v2413_v62 = vrot.slane %v7407_v12, 2 }
  0xac   : > { %5176 = vmatprep.subr.bf16.mxu0 %v5175_v22 }
  0xad   : > { %4361 = vmatmul.mubr.f32.gmra.mrb[30].mxu1 %v6335_v30  ;;  %v6827_v45 = vsel %vm2359_vm3, %v2410_v9, %v2411_v58  ;;  %v7409_v9 = vld [vmem:[#allocation48_spill] sm:$0xff] }
  0xae   : > { %4737 = vmatmul.mubr.f32.gmra.mrb[14].mxu0 %v6777_v48  ;;  %4395 = vmatprep.mubr.msk.f32.mxu1 %vm515_vm1, %v5740_v3  ;;  %v5023_v48 = vpack.c.bf16 %v3675_v36, %v3674_v34  ;;  %v3676_v3 = vld [vmem:[%s7216_s1 + $0xa0] sm:$0xff]  ;;  %v7408_v34 = vld [vmem:[#allocation43_spill] sm:$0xff] }
  0xaf   : > { %4739 = vmatprep.mubr.f32.mxu0 %v6781_v55  ;;  %5178 = vmatpush3.bf16.msra.mxu0 %v5175_v22  ;;  %v3677_v22 = vld [vmem:[%s7216_s1 + $0xa8] sm:$0xff]  ;;  %v2415_v36 = vrot.slane %v7408_v34, 2  ;;  %v2426_v34 = vrot.slane %v6274_v21, 2 }
  0xb0   : > { %5180 = vmatprep.subr.bf16.mxu0 %v6785_v18 }
  0xb1   : > { %4396 = vmatmul.mubr.f32.vlgmr.msra.gmra.mrb[0].mxu1 %v5780_v24  ;;  %v6823_v24 = vsel %vm2359_vm3, %v2406_v7, %v2408_v38  ;;  %v3679_v7 = vld [vmem:[%s7216_s1 + $0xb8] sm:$0xff]  ;;  %v6844_v38 = vsel %vm2359_vm3, %v2411_v58, %v2413_v62  ;;  %v6848_v54 = vsel %vm2359_vm3, %v2415_v36, %v2416_v20  ;;  %v3681_v58 = vld [vmem:[%s7216_s1 + $0xc8] sm:$0xff]  ;;  %v2425_v62 = vrot.slane %v6429_v50, 2 }
  0xb2   : > { %4740 = vmatmul.mubr.f32.gmra.mrb[16].mxu0 %v6800_v2  ;;  %5022 = vmatpush3.bf16.msra.mxu1 %v6610_v37  ;;  %v5027_v37 = vpack.c.bf16 %v3677_v22, %v3676_v3  ;;  %v2420_v3 = vrot.slane %v7409_v9, 2  ;;  %v2421_v22 = vrot.slane %v6248_v17, 2 }
  0xb3   : > { %4398 = vmatprep.mubr.msk.f32.mxu1 %vm515_vm1, %v5830_v61  ;;  %4742 = vmatprep.mubr.f32.mxu0 %v6804_v1  ;;  %v3678_v61 = vld [vmem:[%s7216_s1 + $0xb0] sm:$0xff] }
  0xb4   : > { %5024 = vmatprep.subr.bf16.mxu1 %v5023_v48  ;;  %v5031_v12 = vpack.c.bf16 %v3679_v7, %v3678_v61  ;;  %v2431_v7 = vrot.slane %v6302_v6, 2 }
  0xb5   : > { %4399 = vmatmul.mubr.f32.gmra.mrb[2].mxu1 %v5846_v13  ;;  %v2418_v13 = vrot.slane %v6395_v59, 2 }
  0xb6   : > { %4743 = vmatmul.mubr.f32.gmra.mrb[18].mxu0 %v6823_v24  ;;  %4401 = vmatprep.mubr.msk.f32.mxu1 %vm515_vm1, %v5839_v5  ;;  %v3680_v5 = vld [vmem:[%s7216_s1 + $0xc0] sm:$0xff] }
  0xb7   : > { %4745 = vmatprep.mubr.f32.mxu0 %v6827_v45  ;;  %5026 = vmatpush3.bf16.msra.mxu1 %v5023_v48  ;;  %v6865_v59 = vsel %vm2359_vm3, %v2416_v20, %v2418_v13  ;;  %v6869_v48 = vsel %vm2359_vm3, %v2420_v3, %v2421_v22  ;;  %v5035_v36 = vpack.c.bf16 %v3681_v58, %v3680_v5 }
  0xb8   : > { %5028 = vmatprep.subr.bf16.mxu1 %v5027_v37  ;;  %v6890_v20 = vsel %vm2359_vm3, %v2425_v62, %v2426_v34  ;;  %v7411_v62 = vld [vmem:[#allocation2_spill] sm:$0xff] }
  0xb9   : > { %4402 = vmatmul.mubr.f32.gmra.mrb[4].mxu1 %v5881_v40  ;;  %v2423_v40 = vrot.slane %v6433_v41, 2  ;;  %v3683_v41 = vld [vmem:[%s7216_s1 + $0xd8] sm:$0xff] }
  0xba   : > { %4746 = vmatmul.mubr.f32.gmra.mrb[20].mxu0 %v6844_v38  ;;  %4404 = vmatprep.mubr.msk.f32.mxu1 %vm515_vm1, %v5888_v43  ;;  %v3682_v43 = vld [vmem:[%s7216_s1 + $0xd0] sm:$0xff] }
  0xbb   : > { %4748 = vmatprep.mubr.f32.mxu0 %v6848_v54  ;;  %5030 = vmatpush3.bf16.msra.mxu1 %v5027_v37  ;;  %v6886_v50 = vsel %vm2359_vm3, %v2421_v22, %v2423_v40  ;;  %v7410_v37 = vld [vmem:[#allocation53_spill] sm:$0xff]  ;;  %v5039_v13 = vpack.c.bf16 %v3683_v41, %v3682_v43  ;;  %v2435_v22 = vrot.slane %v6500_v31, 2 }
  0xbc   : > { %5032 = vmatprep.subr.bf16.mxu1 %v5031_v12  ;;  %v2430_v61 = vrot.slane %v7410_v37, 2  ;;  %v3767_v41 = vld [vmem:[%s7216_s1 + $0x478] sm:$0xff] }
  0xbd   : > { %4405 = vmatmul.mubr.f32.gmra.mrb[6].mxu1 %v5913_v63  ;;  %v2428_v63 = vrot.slane %v6468_v57, 2  ;;  %v3685_v57 = vld [vmem:[%s7216_s1 + $0xe8] sm:$0xff]  ;;  %v7414_v37 = vld [vmem:[#allocation41_spill] sm:$0xff] }
  0xbe   : > { %4749 = vmatmul.mubr.f32.gmra.mrb[22].mxu0 %v6865_v59  ;;  %4407 = vmatprep.mubr.msk.f32.mxu1 %vm515_vm1, %v5949_v42  ;;  %v3684_v42 = vld [vmem:[%s7216_s1 + $0xe0] sm:$0xff]  ;;  %v6911_v3 = vsel %vm2359_vm3, %v2430_v61, %v2431_v7 }
  0xbf   : > { %4751 = vmatprep.mubr.f32.mxu0 %v6869_v48  ;;  %5034 = vmatpush3.bf16.msra.mxu1 %v5031_v12  ;;  %v6907_v9 = vsel %vm2359_vm3, %v2426_v34, %v2428_v63  ;;  %v2436_v12 = vrot.slane %v6335_v30, 2  ;;  %v5043_v5 = vpack.c.bf16 %v3685_v57, %v3684_v42  ;;  %v3757_v34 = vld [vmem:[%s7216_s1 + $0x428] sm:$0xff]  ;;  %v7413_v63 = vld [vmem:[#allocation14_spill] sm:$0xff]  ;;  %v7420_v42 = vld [vmem:[#allocation8_spill] sm:$0xff] }
  0xc0   : > { %5036 = vmatprep.subr.bf16.mxu1 %v5035_v36  ;;  %v7421_v57 = vld [vmem:[#allocation3_spill] sm:$0xff] }
  0xc1   : > { %4408 = vmatmul.mubr.f32.gmra.mrb[8].mxu1 %v5989_v26  ;;  %v2433_v26 = vrot.slane %v6504_v60, 2  ;;  %v3687_v60 = vld [vmem:[%s7216_s1 + $0xf8] sm:$0xff]  ;;  %v6932_v58 = vsel %vm2359_vm3, %v2435_v22, %v2436_v12  ;;  %v7423_v22 = vld [vmem:[#allocation12_spill] sm:$0xff] }
  0xc2   : > { %4752 = vmatmul.mubr.f32.gmra.mrb[24].mxu0 %v6886_v50  ;;  %4410 = vmatprep.mubr.msk.f32.mxu1 %vm515_vm1, %v5999_v10  ;;  %v3686_v10 = vld [vmem:[%s7216_s1 + $0xf0] sm:$0xff] }
  0xc3   : > { %4754 = vmatprep.mubr.f32.mxu0 %v6890_v20  ;;  %5038 = vmatpush3.bf16.msra.mxu1 %v5035_v36  ;;  %v6928_v31 = vsel %vm2359_vm3, %v2431_v7, %v2433_v26  ;;  %v5047_v40 = vpack.c.bf16 %v3687_v60, %v3686_v10  ;;  %v3765_v36 = vld [vmem:[%s7216_s1 + $0x468] sm:$0xff]  ;;  %v7417_v7 = vld [vmem:[#allocation17_spill] sm:$0xff]  ;;  %v7426_v10 = vld [vmem:[#allocation18_spill] sm:$0xff] }
  0xc4   : > { %5040 = vmatprep.subr.bf16.mxu1 %v5039_v13  ;;  %v7422_v26 = vld [vmem:[#allocation11_spill] sm:$0xff]  ;;  %v7427_v60 = vld [vmem:[#allocation5_spill] sm:$0xff] }
  0xc5   : > { %4411 = vmatmul.mubr.f32.gmra.mrb[10].mxu1 %v6031_v0  ;;  %v2438_v0 = vrot.slane %v6529_v33, 2  ;;  %v3754_v33 = vld [vmem:[%s7216_s1 + $0x410] sm:$0xff] }
  0xc6   : > { %4755 = vmatmul.mubr.f32.gmra.mrb[26].mxu0 %v6907_v9  ;;  %4413 = vmatprep.mubr.msk.f32.mxu1 %vm515_vm1, %v6048_v44 }
  0xc7   : > { %4757 = vmatprep.mubr.f32.mxu0 %v6911_v3  ;;  %5042 = vmatpush3.bf16.msra.mxu1 %v5039_v13  ;;  %v6941_v44 = vsel %vm2359_vm3, %v2436_v12, %v2438_v0  ;;  %v7418_v13 = vmov 0.0   ;;  %v7424_v12 = vld [vmem:[#allocation4_spill] sm:$0xff]  ;;  %v7428_v0 = vld [vmem:[#allocation19_spill] sm:$0xff] }
  0xc8   : > { %5044 = vmatprep.subr.bf16.mxu1 %v5043_v5 }
  0xc9   : > { %4414 = vmatmul.mubr.f32.gmra.mrb[12].mxu1 %v6082_v4  ;;  %v3755_v4 = vld [vmem:[%s7216_s1 + $0x418] sm:$0xff] }
  0xca   : > { %4758 = vmatmul.mubr.f32.gmra.mrb[28].mxu0 %v6928_v31  ;;  %4416 = vmatprep.mubr.msk.f32.mxu1 %vm515_vm1, %v6160_v15  ;;  %v5183_v15 = vpack.c.bf16 %v3755_v4, %v3754_v33  ;;  %v7430_v33 = vld [vmem:[#allocation6_spill] sm:$0xff]  ;;  %v7431_v4 = vld [vmem:[#allocation23_spill] sm:$0xff] }
  0xcb   : > { %4760 = vmatprep.mubr.f32.mxu0 %v6932_v58  ;;  %5046 = vmatpush3.bf16.msra.mxu1 %v5043_v5  ;;  %v7425_v5 = vld [vmem:[#allocation15_spill] sm:$0xff] }
  0xcc   : > { %5048 = vmatprep.subr.bf16.mxu1 %v5047_v40 }
  0xcd   : > { %4417 = vmatmul.mubr.f32.gmra.mrb[14].mxu1 %v6177_v11  ;;  %v3756_v11 = vld [vmem:[%s7216_s1 + $0x420] sm:$0xff] }
  0xce   : > { %4761 = vmatmul.mubr.f32.gmra.mrb[30].mxu0 %v6941_v44  ;;  %4419 = vmatprep.mubr.msk.f32.mxu1 %vm515_vm1, %v6191_v56  ;;  %v5187_v56 = vpack.c.bf16 %v3757_v34, %v3756_v11  ;;  %v7434_v11 = vld [vmem:[#allocation27_spill] sm:$0xff]  ;;  %v7435_v34 = vld [vmem:[#allocation28_spill] sm:$0xff] }
  0xcf   : > { %4795 = vmatprep.mubr.f32.mxu0 %v6632_v46  ;;  %5050 = vmatpush3.bf16.msra.mxu1 %v5047_v40  ;;  %v3759_v46 = vld [vmem:[%s7216_s1 + $0x438] sm:$0xff]  ;;  %v7429_v40 = vld [vmem:[#allocation20_spill] sm:$0xff] }
  0xd0   : > { %5211 = vmatprep.subr.bf16.mxu1 %v7411_v62 }
  0xd1   : > { %4420 = vmatmul.mubr.f32.gmra.mrb[16].mxu1 %v6201_v16  ;;  %v3758_v16 = vld [vmem:[%s7216_s1 + $0x430] sm:$0xff] }
  0xd2   : > { %4796 = vmatmul.mubr.f32.vlgmr.msra.gmra.mrb[0].mxu0 %v6651_v25  ;;  %4422 = vmatprep.mubr.msk.f32.mxu1 %vm515_vm1, %v6216_v35  ;;  %v5191_v35 = vpack.c.bf16 %v3759_v46, %v3758_v16  ;;  %v3761_v25 = vld [vmem:[%s7216_s1 + $0x448] sm:$0xff]  ;;  %v7438_v46 = vld [vmem:[#allocation32_spill] sm:$0xff] }
  0xd3   : > { %5182 = vmatpush3.bf16.msra.mxu0 %v6785_v18  ;;  %4798 = vmatprep.mubr.f32.mxu0 %v6655_v14  ;;  %v3763_v18 = vld [vmem:[%s7216_s1 + $0x458] sm:$0xff]  ;;  %v7437_v16 = vld [vmem:[#allocation31_spill] sm:$0xff] }
  0xd4   : > { %5184 = vmatprep.subr.bf16.mxu0 %v5183_v15 }
  0xd5   : > { %4423 = vmatmul.mubr.f32.gmra.mrb[18].mxu1 %v6224_v28  ;;  %v3760_v28 = vld [vmem:[%s7216_s1 + $0x440] sm:$0xff] }
  0xd6   : > { %4799 = vmatmul.mubr.f32.gmra.mrb[2].mxu0 %v6672_v51  ;;  %4425 = vmatprep.mubr.msk.f32.mxu1 %vm515_vm1, %v7392_v52  ;;  %v5195_v52 = vpack.c.bf16 %v3761_v25, %v3760_v28  ;;  %v7440_v28 = vld [vmem:[#allocation10_spill] sm:$0xff] }
  0xd7   : > { %4801 = vmatprep.mubr.f32.mxu0 %v6676_v53  ;;  %5186 = vmatpush3.bf16.msra.mxu0 %v5183_v15  ;;  %v7432_v15 = vld [vmem:[#allocation24_spill] sm:$0xff]  ;;  %v7441_v25 = vld [vmem:[#allocation34_spill] sm:$0xff] }
  0xd8   : > { %5188 = vmatprep.subr.bf16.mxu0 %v5187_v56 }
  0xd9   : > { %4426 = vmatmul.mubr.f32.gmra.mrb[20].mxu1 %v6248_v17  ;;  %v3762_v17 = vld [vmem:[%s7216_s1 + $0x450] sm:$0xff] }
  0xda   : > { %4802 = vmatmul.mubr.f32.gmra.mrb[4].mxu0 %v6693_v39  ;;  %4428 = vmatprep.mubr.msk.f32.mxu1 %vm515_vm1, %v6263_v49  ;;  %v5199_v49 = vpack.c.bf16 %v3763_v18, %v3762_v17  ;;  %v7443_v17 = vld [vmem:[#allocation35_spill] sm:$0xff]  ;;  %v7444_v18 = vld [vmem:[#allocation36_spill] sm:$0xff] }
  0xdb   : > { %4804 = vmatprep.mubr.f32.mxu0 %v6697_v8  ;;  %5190 = vmatpush3.bf16.msra.mxu0 %v5187_v56  ;;  %v7436_v56 = vld [vmem:[#allocation9_spill] sm:$0xff] }
  0xdc   : > { %5192 = vmatprep.subr.bf16.mxu0 %v5191_v35 }
  0xdd   : > { %4429 = vmatmul.mubr.f32.gmra.mrb[22].mxu1 %v6274_v21  ;;  %v3764_v21 = vld [vmem:[%s7216_s1 + $0x460] sm:$0xff] }
  0xde   : > { %4805 = vmatmul.mubr.f32.gmra.mrb[6].mxu0 %v6714_v19  ;;  %4431 = vmatprep.mubr.msk.f32.mxu1 %vm515_vm1, %v6288_v27  ;;  %v7412_v27 = vld [vmem:[#allocation13_spill] sm:$0xff]  ;;  %v5203_v43 = vpack.c.bf16 %v3765_v36, %v3764_v21  ;;  %v7446_v21 = vld [vmem:[#allocation47_spill] sm:$0xff]  ;;  %v7447_v36 = vld [vmem:[#allocation46_spill] sm:$0xff] }
  0xdf   : > { %4807 = vmatprep.mubr.f32.mxu0 %v6718_v47  ;;  %5194 = vmatpush3.bf16.msra.mxu0 %v5191_v35  ;;  %v7439_v35 = vld [vmem:[#allocation65_spill] sm:$0xff] }
  0xe0   : > { %5196 = vmatprep.subr.bf16.mxu0 %v5195_v52 }
  0xe1   : > { %4432 = vmatmul.mubr.f32.gmra.mrb[24].mxu1 %v6302_v6  ;;  %v3766_v6 = vld [vmem:[%s7216_s1 + $0x470] sm:$0xff] }
  0xe2   : > { %4808 = vmatmul.mubr.f32.gmra.mrb[8].mxu0 %v6735_v32  ;;  %4434 = vmatprep.mubr.msk.f32.mxu1 %vm515_vm1, %v6317_v29  ;;  %v7415_v29 = vld [vmem:[#allocation16_spill] sm:$0xff]  ;;  %v5207_v61 = vpack.c.bf16 %v3767_v41, %v3766_v6 }
  0xe3   : > { %4810 = vmatprep.mubr.f32.mxu0 %v7412_v27  ;;  %5198 = vmatpush3.bf16.msra.mxu0 %v5195_v52  ;;  %v7442_v52 = vld [vmem:[#allocation66_spill] sm:$0xff]  ;;  %v7458_v6 = vld [vmem:[#allocation60_spill] sm:$0xff] }
  0xe4   : > { %5200 = vmatprep.subr.bf16.mxu0 %v5199_v49 }
  0xe5   : > { %4435 = vmatmul.mubr.f32.gmra.mrb[26].mxu1 %v6335_v30  ;;  %v7416_v30 = vld [vmem:[#allocation45_spill] sm:$0xff] }
  0xe6   : > { %4811 = vmatmul.mubr.f32.gmra.mrb[10].mxu0 %v7413_v63  ;;  %4437 = vmatprep.mubr.msk.f32.mxu1 %vm515_vm1, %v7414_v37 }
  0xe7   : > { %4813 = vmatprep.mubr.f32.mxu0 %v7415_v29  ;;  %5202 = vmatpush3.bf16.msra.mxu0 %v5199_v49  ;;  %v7445_v49 = vld [vmem:[#allocation42_spill] sm:$0xff] }
  0xe8   : > { %5204 = vmatprep.subr.bf16.mxu0 %v5203_v43 }
  0xe9   : > { %4438 = vmatmul.mubr.f32.gmra.mrb[28].mxu1 %v7416_v30 }
  0xea   : > { %4814 = vmatmul.mubr.f32.gmra.mrb[12].mxu0 %v7417_v7  ;;  %4440 = vmatprep.mubr.f32.mxu1 %v7418_v13 }
  0xeb   : > { %4816 = vmatprep.mubr.f32.mxu0 %v6781_v55  ;;  %5206 = vmatpush3.bf16.msra.mxu0 %v5203_v43  ;;  %v7448_v43 = vld [vmem:[#allocation50_spill] sm:$0xff] }
  0xec   : > { %5208 = vmatprep.subr.bf16.mxu0 %v5207_v61 }
  0xed   : > { %4441 = vmatmul.mubr.f32.gmra.mrb[30].mxu1 %v7418_v13 }
  0xee   : > { %4817 = vmatmul.mubr.f32.gmra.mrb[14].mxu0 %v6800_v2  ;;  %4475 = vmatprep.mubr.f32.mxu1 %v7419_v23 }
  0xef   : > { %4819 = vmatprep.mubr.f32.mxu0 %v6804_v1  ;;  %5210 = vmatpush3.bf16.msra.mxu0 %v5207_v61 }
  0xf1   : > { %4476 = vmatmul.mubr.f32.vlgmr.msra.gmra.mrb[0].mxu1 %v7419_v23 }
  0xf2   : > { %4820 = vmatmul.mubr.f32.gmra.mrb[16].mxu0 %v6823_v24  ;;  %5219 = vmatpush3.bf16.msra.mxu1 %v7411_v62  ;;  %v7433_v62 = vld [vmem:[#allocation7_spill] sm:$0xff] }
  0xf3   : > { %4478 = vmatprep.mubr.f32.mxu1 %v7420_v42  ;;  %4822 = vmatprep.mubr.f32.mxu0 %v6827_v45 }
  0xf4   : > { %5212 = vmatprep.subr.bf16.mxu1 %v7421_v57 }
  0xf5   : > { %4479 = vmatmul.mubr.f32.gmra.mrb[2].mxu1 %v7422_v26 }
  0xf6   : > { %4823 = vmatmul.mubr.f32.gmra.mrb[18].mxu0 %v6844_v38  ;;  %4481 = vmatprep.mubr.f32.mxu1 %v7423_v22 }
  0xf7   : > { %4825 = vmatprep.mubr.f32.mxu0 %v6848_v54  ;;  %5220 = vmatpush3.bf16.msra.mxu1 %v7421_v57 }
  0xf8   : > { %5213 = vmatprep.subr.bf16.mxu1 %v7424_v12 }
  0xf9   : > { %4482 = vmatmul.mubr.f32.gmra.mrb[4].mxu1 %v7425_v5 }
  0xfa   : > { %4826 = vmatmul.mubr.f32.gmra.mrb[20].mxu0 %v6865_v59  ;;  %4484 = vmatprep.mubr.f32.mxu1 %v7426_v10 }
  0xfb   : > { %4828 = vmatprep.mubr.f32.mxu0 %v6869_v48  ;;  %5221 = vmatpush3.bf16.msra.mxu1 %v7424_v12 }
  0xfc   : > { %5214 = vmatprep.subr.bf16.mxu1 %v7427_v60 }
  0xfd   : > { %4485 = vmatmul.mubr.f32.gmra.mrb[6].mxu1 %v7428_v0 }
  0xfe   : > { %4829 = vmatmul.mubr.f32.gmra.mrb[22].mxu0 %v6886_v50  ;;  %4487 = vmatprep.mubr.f32.mxu1 %v7429_v40 }
  0xff   : > { %4831 = vmatprep.mubr.f32.mxu0 %v6890_v20  ;;  %5222 = vmatpush3.bf16.msra.mxu1 %v7427_v60 }
 0x100   : > { %5215 = vmatprep.subr.bf16.mxu1 %v7430_v33 }
 0x101   : > { %4488 = vmatmul.mubr.f32.gmra.mrb[8].mxu1 %v7431_v4 }
 0x102   : > { %4832 = vmatmul.mubr.f32.gmra.mrb[24].mxu0 %v6907_v9  ;;  %4490 = vmatprep.mubr.f32.mxu1 %v7432_v15 }
 0x103   : > { %4834 = vmatprep.mubr.f32.mxu0 %v6911_v3  ;;  %5223 = vmatpush3.bf16.msra.mxu1 %v7430_v33 }
 0x104   : > { %5216 = vmatprep.subr.bf16.mxu1 %v7433_v62 }
 0x105   : > { %4491 = vmatmul.mubr.f32.gmra.mrb[10].mxu1 %v7434_v11 }
 0x106   : > { %4835 = vmatmul.mubr.f32.gmra.mrb[26].mxu0 %v6928_v31  ;;  %4493 = vmatprep.mubr.f32.mxu1 %v7435_v34 }
 0x107   : > { %4837 = vmatprep.mubr.f32.mxu0 %v6932_v58  ;;  %5224 = vmatpush3.bf16.msra.mxu1 %v7433_v62 }
 0x108   : > { %5217 = vmatprep.subr.bf16.mxu1 %v7436_v56 }
 0x109   : > { %4494 = vmatmul.mubr.f32.gmra.mrb[12].mxu1 %v7437_v16 }
 0x10a   : > { %4838 = vmatmul.mubr.f32.gmra.mrb[28].mxu0 %v6941_v44  ;;  %4496 = vmatprep.mubr.f32.mxu1 %v7438_v46 }
 0x10b   : > { %4840 = vmatprep.mubr.f32.mxu0 %v7439_v35  ;;  %5225 = vmatpush3.bf16.msra.mxu1 %v7436_v56 }
 0x10c   : > { %5218 = vmatprep.subr.bf16.mxu1 %v7440_v28 }
 0x10d   : > { %4497 = vmatmul.mubr.f32.gmra.mrb[14].mxu1 %v7441_v25 }
 0x10e   : > { %4841 = vmatmul.mubr.f32.gmra.mrb[30].mxu0 %v7442_v52  ;;  %4499 = vmatprep.mubr.f32.mxu1 %v7443_v17 }
 0x10f   : > { %4875 = vmatprep.mubr.f32.mxu0 %v6655_v14  ;;  %5226 = vmatpush3.bf16.msra.mxu1 %v7440_v28  ;;  %v7449_v14 = vld [vmem:[#allocation49_spill] sm:$0xff] }
 0x111   : > { %4500 = vmatmul.mubr.f32.gmra.mrb[16].mxu1 %v7444_v18 }
 0x112   : > { %4876 = vmatmul.mubr.f32.vlgmr.msra.gmra.mrb[0].mxu0 %v6672_v51  ;;  %4502 = vmatprep.mubr.f32.mxu1 %v7445_v49  ;;  %v7450_v51 = vld [vmem:[#allocation52_spill] sm:$0xff] }
 0x113   : > { %4878 = vmatprep.mubr.f32.mxu0 %v6676_v53  ;;  %v7451_v53 = vld [vmem:[#allocation51_spill] sm:$0xff] }
 0x115   : > { %4503 = vmatmul.mubr.f32.gmra.mrb[18].mxu1 %v7446_v21 }
 0x116   : > { %4879 = vmatmul.mubr.f32.gmra.mrb[2].mxu0 %v6693_v39  ;;  %4505 = vmatprep.mubr.f32.mxu1 %v7447_v36  ;;  %v7452_v39 = vld [vmem:[#allocation54_spill] sm:$0xff] }
 0x117   : > { %4881 = vmatprep.mubr.f32.mxu0 %v6697_v8  ;;  %v7453_v8 = vld [vmem:[#allocation55_spill] sm:$0xff] }
 0x119   : > { %4506 = vmatmul.mubr.f32.gmra.mrb[20].mxu1 %v7448_v43 }
 0x11a   : > { %4882 = vmatmul.mubr.f32.gmra.mrb[4].mxu0 %v6714_v19  ;;  %4508 = vmatprep.mubr.f32.mxu1 %v7449_v14  ;;  %v7454_v19 = vld [vmem:[#allocation57_spill] sm:$0xff] }
 0x11b   : > { %4884 = vmatprep.mubr.f32.mxu0 %v6718_v47  ;;  %v7455_v47 = vld [vmem:[#allocation56_spill] sm:$0xff] }
 0x11d   : > { %4509 = vmatmul.mubr.f32.gmra.mrb[22].mxu1 %v7450_v51 }
 0x11e   : > { %4885 = vmatmul.mubr.f32.gmra.mrb[6].mxu0 %v6735_v32  ;;  %4511 = vmatprep.mubr.f32.mxu1 %v7451_v53  ;;  %v7456_v32 = vld [vmem:[#allocation58_spill] sm:$0xff] }
 0x11f   : > { %4887 = vmatprep.mubr.f32.mxu0 %v7412_v27  ;;  %v7457_v27 = vld [vmem:[#allocation59_spill] sm:$0xff] }
 0x121   : > { %4512 = vmatmul.mubr.f32.gmra.mrb[24].mxu1 %v7452_v39 }
 0x122   : > { %4888 = vmatmul.mubr.f32.gmra.mrb[8].mxu0 %v7413_v63  ;;  %4514 = vmatprep.mubr.f32.mxu1 %v7453_v8 }
 0x123   : > { %4890 = vmatprep.mubr.f32.mxu0 %v7415_v29 }
 0x125   : > { %4515 = vmatmul.mubr.f32.gmra.mrb[26].mxu1 %v7454_v19 }
 0x126   : > { %4891 = vmatmul.mubr.f32.gmra.mrb[10].mxu0 %v7417_v7  ;;  %4517 = vmatprep.mubr.f32.mxu1 %v7455_v47 }
 0x127   : > { %4893 = vmatprep.mubr.f32.mxu0 %v6781_v55  ;;  %v7459_v55 = vld [vmem:[#allocation61_spill] sm:$0xff] }
 0x129   : > { %4518 = vmatmul.mubr.f32.gmra.mrb[28].mxu1 %v7456_v32 }
 0x12a   : > { %4894 = vmatmul.mubr.f32.gmra.mrb[12].mxu0 %v6800_v2  ;;  %4520 = vmatprep.mubr.f32.mxu1 %v7457_v27  ;;  %v7460_v2 = vld [vmem:[#allocation64_spill] sm:$0xff] }
 0x12b   : > { %4896 = vmatprep.mubr.f32.mxu0 %v6804_v1  ;;  %v7461_v1 = vld [vmem:[#allocation62_spill] sm:$0xff] }
 0x12d   : > { %4521 = vmatmul.mubr.f32.gmra.mrb[30].mxu1 %v7458_v6 }
 0x12e   : > { %4897 = vmatmul.mubr.f32.gmra.mrb[14].mxu0 %v6823_v24  ;;  %4579 = vmatprep.mubr.f32.mxu1 %v7445_v49 }
 0x12f   : > { %4899 = vmatprep.mubr.f32.mxu0 %v6827_v45 }
 0x131   : > { %4580 = vmatmul.mubr.f32.vlgmr.msra.gmra.mrb[16].mxu1 %v7446_v21 }
 0x132   : > { %4900 = vmatmul.mubr.f32.gmra.mrb[16].mxu0 %v6844_v38  ;;  %4582 = vmatprep.mubr.f32.mxu1 %v7447_v36 }
 0x133   : > { %4902 = vmatprep.mubr.f32.mxu0 %v6848_v54 }
 0x135   : > { %4583 = vmatmul.mubr.f32.gmra.mrb[18].mxu1 %v7448_v43 }
 0x136   : > { %4903 = vmatmul.mubr.f32.gmra.mrb[18].mxu0 %v6865_v59  ;;  %4585 = vmatprep.mubr.f32.mxu1 %v7449_v14 }
 0x137   : > { %4905 = vmatprep.mubr.f32.mxu0 %v6869_v48 }
 0x139   : > { %4586 = vmatmul.mubr.f32.gmra.mrb[20].mxu1 %v7450_v51 }
 0x13a   : > { %4906 = vmatmul.mubr.f32.gmra.mrb[20].mxu0 %v6886_v50  ;;  %4588 = vmatprep.mubr.f32.mxu1 %v7451_v53 }
 0x13b   : > { %4908 = vmatprep.mubr.f32.mxu0 %v6890_v20 }
 0x13d   : > { %4589 = vmatmul.mubr.f32.gmra.mrb[22].mxu1 %v7452_v39 }
 0x13e   : > { %4909 = vmatmul.mubr.f32.gmra.mrb[22].mxu0 %v6907_v9  ;;  %4591 = vmatprep.mubr.f32.mxu1 %v7453_v8 }
 0x13f   : > { %4911 = vmatprep.mubr.f32.mxu0 %v6911_v3 }
 0x141   : > { %4592 = vmatmul.mubr.f32.gmra.mrb[24].mxu1 %v7454_v19 }
 0x142   : > { %4912 = vmatmul.mubr.f32.gmra.mrb[24].mxu0 %v6928_v31  ;;  %4594 = vmatprep.mubr.f32.mxu1 %v7455_v47 }
 0x143   : > { %4914 = vmatprep.mubr.f32.mxu0 %v6932_v58 }
 0x145   : > { %4595 = vmatmul.mubr.f32.gmra.mrb[26].mxu1 %v7456_v32 }
 0x146   : > { %4915 = vmatmul.mubr.f32.gmra.mrb[26].mxu0 %v6941_v44  ;;  %4597 = vmatprep.mubr.f32.mxu1 %v7457_v27 }
 0x147   : > { %4917 = vmatprep.mubr.f32.mxu0 %v7439_v35 }
 0x149   : > { %4598 = vmatmul.mubr.f32.gmra.mrb[28].mxu1 %v7458_v6 }
 0x14a   : > { %4918 = vmatmul.mubr.f32.gmra.mrb[28].mxu0 %v7442_v52  ;;  %4600 = vmatprep.mubr.f32.mxu1 %v7459_v55 }
 0x14b   : > { %4920 = vmatprep.mubr.f32.mxu0 %v7460_v2 }
 0x14d   : > { %4601 = vmatmul.mubr.f32.gmra.mrb[30].mxu1 %v7461_v1 }
 0x14e   : > { %4921 = vmatmul.mubr.f32.gmra.mrb[30].mxu0 %v7460_v2 }
 0x1c4   : > { %v4477_v24 = vpop.f32.mrb[0].mxu1 }
 0x1c5   : > { %v1620_v45 = vpop.f32.mrb[1].mxu1 }
 0x1c8   : > { %v4480_v38 = vpop.f32.mrb[2].mxu1 }
 0x1c9   : > { %v1630_v54 = vpop.f32.mrb[3].mxu1 }
 0x1cc   : > { %v4483_v59 = vpop.f32.mrb[4].mxu1 }
 0x1cd   : > { %v1640_v48 = vpop.f32.mrb[5].mxu1 }
 0x1d0   : > { %v4486_v50 = vpop.f32.mrb[6].mxu1 }
 0x1d1   : > { %v1650_v20 = vpop.f32.mrb[7].mxu1 }
 0x1d4   : > { %v4489_v9 = vpop.f32.mrb[8].mxu1 }
 0x1d5   : > { %v1660_v3 = vpop.f32.mrb[9].mxu1 }
 0x1d8   : > { %v7146_v31 = vpop.f32.mrb[10].mxu1 }
 0x1d9   : > { %v7148_v58 = vpop.f32.mrb[11].mxu1 }
 0x1dc   : > { %v7150_v44 = vpop.f32.mrb[12].mxu1 }
 0x1dd   : > { %v7152_v41 = vpop.f32.mrb[13].mxu1 }
 0x1e0   : > { %v7154_v63 = vpop.f32.mrb[14].mxu1 }
 0x1e1   : > { %v7156_v37 = vpop.f32.mrb[15].mxu1 }
 0x1e5   : > { %v4877_v29 = vpop.f32.mrb[0].mxu0 }
 0x1e6   : > { %v5227_v61 = vadd.f32 %v4877_v29, %v4477_v24  ;;  %v3117_v30 = vpop.f32.mrb[1].mxu0 }
 0x1e7   : > { %v5228_v7 = vadd.f32 %v3117_v30, %v1620_v45 }
 0x1e8   : > { %v3347_v13 = vmul.f32 %v5227_v61, %v5227_v61  ;;  %3417 = vst [vmem:[%s7162_s13 + $0x8] sm:$0xff] %v5227_v61 }
 0x1e9   : > { %v3308_v23 = vadd.f32 %v5228_v7, %v5227_v61  ;;  %v3346_v42 = vmul.f32 %v5228_v7, %v5228_v7  ;;  %3416 = vst [vmem:[%s7162_s13] sm:$0xff] %v5228_v7  ;;  %v4880_v57 = vpop.f32.mrb[2].mxu0 }
 0x1ea   : > { %v5229_v26 = vadd.f32 %v4880_v57, %v4480_v38  ;;  %v3127_v22 = vpop.f32.mrb[3].mxu0 }
 0x1eb   : > { %v3378_v12 = vadd.f32 %v3347_v13, %v3346_v42  ;;  %v5230_v5 = vadd.f32 %v3127_v22, %v1630_v54 }
 0x1ec   : > { %3419 = vst [vmem:[%s7162_s13 + $0x18] sm:$0xff] %v5229_v26  ;;  %v3349_v4 = vmul.f32 %v5229_v26, %v5229_v26 }
 0x1ed   : > { %v3309_v10 = vadd.f32 %v5230_v5, %v3308_v23  ;;  %v3348_v60 = vmul.f32 %v5230_v5, %v5230_v5  ;;  %3418 = vst [vmem:[%s7162_s13 + $0x10] sm:$0xff] %v5230_v5  ;;  %v4883_v0 = vpop.f32.mrb[4].mxu0 }
 0x1ee   : > { %v5231_v40 = vadd.f32 %v4883_v0, %v4483_v59  ;;  %v3137_v33 = vpop.f32.mrb[5].mxu0 }
 0x1ef   : > { %v3379_v15 = vadd.f32 %v3378_v12, %v3348_v60  ;;  %v5232_v62 = vadd.f32 %v3137_v33, %v1640_v48  ;;  %v3310_v11 = vadd.f32 %v5229_v26, %v3309_v10 }
 0x1f0   : > { %3421 = vst [vmem:[%s7162_s13 + $0x28] sm:$0xff] %v5231_v40  ;;  %v3351_v25 = vmul.f32 %v5231_v40, %v5231_v40 }
 0x1f1   : > { %v3311_v34 = vadd.f32 %v5232_v62, %v3310_v11  ;;  %v3350_v56 = vmul.f32 %v5232_v62, %v5232_v62  ;;  %v3380_v16 = vadd.f32 %v3379_v15, %v3349_v4  ;;  %3420 = vst [vmem:[%s7162_s13 + $0x20] sm:$0xff] %v5232_v62  ;;  %v4886_v46 = vpop.f32.mrb[6].mxu0 }
 0x1f2   : > { %v5233_v35 = vadd.f32 %v4886_v46, %v4486_v50  ;;  %v3147_v28 = vpop.f32.mrb[7].mxu0 }
 0x1f3   : > { %v3381_v52 = vadd.f32 %v3380_v16, %v3350_v56  ;;  %v5234_v17 = vadd.f32 %v3147_v28, %v1650_v20  ;;  %v3312_v18 = vadd.f32 %v5231_v40, %v3311_v34 }
 0x1f4   : > { %3423 = vst [vmem:[%s7162_s13 + $0x38] sm:$0xff] %v5233_v35  ;;  %v3353_v53 = vmul.f32 %v5233_v35, %v5233_v35 }
 0x1f5   : > { %v3313_v49 = vadd.f32 %v5234_v17, %v3312_v18  ;;  %v3352_v21 = vmul.f32 %v5234_v17, %v5234_v17  ;;  %v3382_v36 = vadd.f32 %v3381_v52, %v3351_v25  ;;  %3422 = vst [vmem:[%s7162_s13 + $0x30] sm:$0xff] %v5234_v17  ;;  %v4889_v43 = vpop.f32.mrb[8].mxu0 }
 0x1f6   : > { %v5235_v14 = vadd.f32 %v4889_v43, %v4489_v9  ;;  %v3157_v51 = vpop.f32.mrb[9].mxu0 }
 0x1f7   : > { %v3383_v39 = vadd.f32 %v3382_v36, %v3352_v21  ;;  %v5236_v8 = vadd.f32 %v3157_v51, %v1660_v3  ;;  %v3314_v19 = vadd.f32 %v5233_v35, %v3313_v49 }
 0x1f8   : > { %3425 = vst [vmem:[%s7162_s13 + $0x48] sm:$0xff] %v5235_v14  ;;  %v3355_v1 = vmul.f32 %v5235_v14, %v5235_v14 }
 0x1f9   : > { %v3315_v47 = vadd.f32 %v5236_v8, %v3314_v19  ;;  %v3354_v32 = vmul.f32 %v5236_v8, %v5236_v8  ;;  %v3384_v27 = vadd.f32 %v3383_v39, %v3353_v53  ;;  %3424 = vst [vmem:[%s7162_s13 + $0x40] sm:$0xff] %v5236_v8  ;;  %v4892_v6 = vpop.f32.mrb[10].mxu0 }
 0x1fa   : > { %v5237_v55 = vadd.f32 %v4892_v6, %v7146_v31  ;;  %v3167_v2 = vpop.f32.mrb[11].mxu0 }
 0x1fb   : > { %v3385_v24 = vadd.f32 %v3384_v27, %v3354_v32  ;;  %v5238_v45 = vadd.f32 %v3167_v2, %v7148_v58  ;;  %v3316_v38 = vadd.f32 %v5235_v14, %v3315_v47 }
 0x1fc   : > { %3427 = vst [vmem:[%s7162_s13 + $0x58] sm:$0xff] %v5237_v55  ;;  %v3357_v3 = vmul.f32 %v5237_v55, %v5237_v55 }
 0x1fd   : > { %v3317_v54 = vadd.f32 %v5238_v45, %v3316_v38  ;;  %v3356_v59 = vmul.f32 %v5238_v45, %v5238_v45  ;;  %v3386_v48 = vadd.f32 %v3385_v24, %v3355_v1  ;;  %3426 = vst [vmem:[%s7162_s13 + $0x50] sm:$0xff] %v5238_v45  ;;  %v4895_v50 = vpop.f32.mrb[12].mxu0 }
 0x1fe   : > { %v5239_v20 = vadd.f32 %v4895_v50, %v7150_v44  ;;  %v3177_v9 = vpop.f32.mrb[13].mxu0 }
 0x1ff   : > { %v3387_v31 = vadd.f32 %v3386_v48, %v3356_v59  ;;  %v5240_v29 = vadd.f32 %v3177_v9, %v7152_v41  ;;  %v3318_v61 = vadd.f32 %v5237_v55, %v3317_v54 }
 0x200   : > { %3429 = vst [vmem:[%s7162_s13 + $0x68] sm:$0xff] %v5239_v20  ;;  %v3359_v57 = vmul.f32 %v5239_v20, %v5239_v20 }
 0x201   : > { %v3319_v30 = vadd.f32 %v5240_v29, %v3318_v61  ;;  %v3358_v58 = vmul.f32 %v5240_v29, %v5240_v29  ;;  %v3388_v7 = vadd.f32 %v3387_v31, %v3357_v3  ;;  %3428 = vst [vmem:[%s7162_s13 + $0x60] sm:$0xff] %v5240_v29  ;;  %v4898_v13 = vpop.f32.mrb[14].mxu0 }
 0x202   : > { %v5241_v23 = vadd.f32 %v4898_v13, %v7154_v63  ;;  %v3187_v42 = vpop.f32.mrb[15].mxu0 }
 0x203   : > { %v3389_v26 = vadd.f32 %v3388_v7, %v3358_v58  ;;  %v5242_v44 = vadd.f32 %v3187_v42, %v7156_v37  ;;  %v3320_v22 = vadd.f32 %v5239_v20, %v3319_v30 }
 0x204   : > { %3431 = vst [vmem:[%s7162_s13 + $0x78] sm:$0xff] %v5241_v23  ;;  %v4581_v12 = vpop.f32.mrb[16].mxu1  ;;  %v3361_v4 = vmul.f32 %v5241_v23, %v5241_v23 }
 0x205   : > { %v3321_v41 = vadd.f32 %v5242_v44, %v3320_v22  ;;  %v3360_v5 = vmul.f32 %v5242_v44, %v5242_v44  ;;  %v3390_v10 = vadd.f32 %v3389_v26, %v3359_v57  ;;  %3430 = vst [vmem:[%s7162_s13 + $0x70] sm:$0xff] %v5242_v44  ;;  %v4901_v60 = vpop.f32.mrb[16].mxu0  ;;  %v1974_v0 = vpop.f32.mrb[17].mxu1 }
 0x206   : > { %v5243_v40 = vadd.f32 %v4901_v60, %v4581_v12  ;;  %v3197_v33 = vpop.f32.mrb[17].mxu0 }
 0x207   : > { %v3391_v63 = vadd.f32 %v3390_v10, %v3360_v5  ;;  %v5244_v15 = vadd.f32 %v3197_v33, %v1974_v0  ;;  %v3322_v62 = vadd.f32 %v5241_v23, %v3321_v41 }
 0x208   : > { %3433 = vst [vmem:[%s7162_s13 + $0x88] sm:$0xff] %v5243_v40  ;;  %v4584_v37 = vpop.f32.mrb[18].mxu1  ;;  %v3363_v25 = vmul.f32 %v5243_v40, %v5243_v40 }
 0x209   : > { %v3323_v11 = vadd.f32 %v5244_v15, %v3322_v62  ;;  %v3362_v34 = vmul.f32 %v5244_v15, %v5244_v15  ;;  %v3392_v56 = vadd.f32 %v3391_v63, %v3361_v4  ;;  %3432 = vst [vmem:[%s7162_s13 + $0x80] sm:$0xff] %v5244_v15  ;;  %v4904_v16 = vpop.f32.mrb[18].mxu0  ;;  %v1984_v46 = vpop.f32.mrb[19].mxu1 }
 0x20a   : > { %v5245_v35 = vadd.f32 %v4904_v16, %v4584_v37  ;;  %v3207_v28 = vpop.f32.mrb[19].mxu0 }
 0x20b   : > { %v3393_v52 = vadd.f32 %v3392_v56, %v3362_v34  ;;  %v5246_v17 = vadd.f32 %v3207_v28, %v1984_v46  ;;  %v3324_v18 = vadd.f32 %v5243_v40, %v3323_v11 }
 0x20c   : > { %3435 = vst [vmem:[%s7162_s13 + $0x98] sm:$0xff] %v5245_v35  ;;  %v4587_v49 = vpop.f32.mrb[20].mxu1  ;;  %v3365_v8 = vmul.f32 %v5245_v35, %v5245_v35 }
 0x20d   : > { %v3325_v21 = vadd.f32 %v5246_v17, %v3324_v18  ;;  %v3364_v36 = vmul.f32 %v5246_v17, %v5246_v17  ;;  %v3394_v43 = vadd.f32 %v3393_v52, %v3363_v25  ;;  %3434 = vst [vmem:[%s7162_s13 + $0x90] sm:$0xff] %v5246_v17  ;;  %v4907_v14 = vpop.f32.mrb[20].mxu0  ;;  %v1994_v51 = vpop.f32.mrb[21].mxu1 }
 0x20e   : > { %v5247_v53 = vadd.f32 %v4907_v14, %v4587_v49  ;;  %v3217_v39 = vpop.f32.mrb[21].mxu0 }
 0x20f   : > { %v3395_v19 = vadd.f32 %v3394_v43, %v3364_v36  ;;  %v5248_v47 = vadd.f32 %v3217_v39, %v1994_v51  ;;  %v3326_v32 = vadd.f32 %v5245_v35, %v3325_v21 }
 0x210   : > { %3437 = vst [vmem:[%s7162_s13 + $0xa8] sm:$0xff] %v5247_v53  ;;  %v4590_v27 = vpop.f32.mrb[22].mxu1  ;;  %v3367_v54 = vmul.f32 %v5247_v53, %v5247_v53 }
 0x211   : > { %v3327_v6 = vadd.f32 %v5248_v47, %v3326_v32  ;;  %v3366_v55 = vmul.f32 %v5248_v47, %v5248_v47  ;;  %v3396_v2 = vadd.f32 %v3395_v19, %v3365_v8  ;;  %3436 = vst [vmem:[%s7162_s13 + $0xa0] sm:$0xff] %v5248_v47  ;;  %v4910_v1 = vpop.f32.mrb[22].mxu0  ;;  %v2004_v24 = vpop.f32.mrb[23].mxu1 }
 0x212   : > { %v5249_v45 = vadd.f32 %v4910_v1, %v4590_v27  ;;  %v3227_v38 = vpop.f32.mrb[23].mxu0 }
 0x213   : > { %v3397_v59 = vadd.f32 %v3396_v2, %v3366_v55  ;;  %v5250_v48 = vadd.f32 %v3227_v38, %v2004_v24  ;;  %v3328_v50 = vadd.f32 %v5247_v53, %v3327_v6 }
 0x214   : > { %3439 = vst [vmem:[%s7162_s13 + $0xb8] sm:$0xff] %v5249_v45  ;;  %v4593_v20 = vpop.f32.mrb[24].mxu1  ;;  %v3369_v7 = vmul.f32 %v5249_v45, %v5249_v45 }
 0x215   : > { %v3329_v9 = vadd.f32 %v5250_v48, %v3328_v50  ;;  %v3368_v3 = vmul.f32 %v5250_v48, %v5250_v48  ;;  %v3398_v31 = vadd.f32 %v3397_v59, %v3367_v54  ;;  %3438 = vst [vmem:[%s7162_s13 + $0xb0] sm:$0xff] %v5250_v48  ;;  %v4913_v29 = vpop.f32.mrb[24].mxu0  ;;  %v2014_v61 = vpop.f32.mrb[25].mxu1 }
 0x216   : > { %v5251_v30 = vadd.f32 %v4913_v29, %v4593_v20  ;;  %v3237_v58 = vpop.f32.mrb[25].mxu0 }
 0x217   : > { %v3399_v13 = vadd.f32 %v3398_v31, %v3368_v3  ;;  %v5252_v23 = vadd.f32 %v3237_v58, %v2014_v61  ;;  %v3330_v42 = vadd.f32 %v5249_v45, %v3329_v9 }
 0x218   : > { %3441 = vst [vmem:[%s7162_s13 + $0xc8] sm:$0xff] %v5251_v30  ;;  %v4596_v57 = vpop.f32.mrb[26].mxu1  ;;  %v3371_v60 = vmul.f32 %v5251_v30, %v5251_v30 }
 0x219   : > { %v3331_v26 = vadd.f32 %v5252_v23, %v3330_v42  ;;  %v3370_v44 = vmul.f32 %v5252_v23, %v5252_v23  ;;  %v3400_v22 = vadd.f32 %v3399_v13, %v3369_v7  ;;  %3440 = vst [vmem:[%s7162_s13 + $0xc0] sm:$0xff] %v5252_v23  ;;  %v4916_v12 = vpop.f32.mrb[26].mxu0  ;;  %v2024_v41 = vpop.f32.mrb[27].mxu1 }
 0x21a   : > { %v5253_v5 = vadd.f32 %v4916_v12, %v4596_v57  ;;  %v3247_v10 = vpop.f32.mrb[27].mxu0 }
 0x21b   : > { %v3401_v0 = vadd.f32 %v3400_v22, %v3370_v44  ;;  %v5254_v40 = vadd.f32 %v3247_v10, %v2024_v41  ;;  %v3332_v33 = vadd.f32 %v5251_v30, %v3331_v26 }
 0x21c   : > { %3443 = vst [vmem:[%s7162_s13 + $0xd8] sm:$0xff] %v5253_v5  ;;  %v4599_v4 = vpop.f32.mrb[28].mxu1  ;;  %v3373_v16 = vmul.f32 %v5253_v5, %v5253_v5 }
 0x21d   : > { %v3333_v63 = vadd.f32 %v5254_v40, %v3332_v33  ;;  %v3372_v15 = vmul.f32 %v5254_v40, %v5254_v40  ;;  %v3402_v62 = vadd.f32 %v3401_v0, %v3371_v60  ;;  %3442 = vst [vmem:[%s7162_s13 + $0xd0] sm:$0xff] %v5254_v40  ;;  %v4919_v37 = vpop.f32.mrb[28].mxu0  ;;  %v2034_v11 = vpop.f32.mrb[29].mxu1 }
 0x21e   : > { %v5255_v34 = vadd.f32 %v4919_v37, %v4599_v4  ;;  %v3257_v56 = vpop.f32.mrb[29].mxu0 }
 0x21f   : > { %v3403_v46 = vadd.f32 %v3402_v62, %v3372_v15  ;;  %v5256_v35 = vadd.f32 %v3257_v56, %v2034_v11  ;;  %v3334_v28 = vadd.f32 %v5253_v5, %v3333_v63 }
 0x220   : > { %3445 = vst [vmem:[%s7162_s13 + $0xe8] sm:$0xff] %v5255_v34  ;;  %v4602_v25 = vpop.f32.mrb[30].mxu1  ;;  %v3375_v14 = vmul.f32 %v5255_v34, %v5255_v34 }
 0x221   : > { %v3335_v52 = vadd.f32 %v5256_v35, %v3334_v28  ;;  %v3374_v17 = vmul.f32 %v5256_v35, %v5256_v35  ;;  %v3404_v18 = vadd.f32 %v3403_v46, %v3373_v16  ;;  %3444 = vst [vmem:[%s7162_s13 + $0xe0] sm:$0xff] %v5256_v35  ;;  %v4922_v49 = vpop.f32.mrb[30].mxu0  ;;  %v2044_v21 = vpop.f32.mrb[31].mxu1 }
 0x222   : > { %v5257_v36 = vadd.f32 %v4922_v49, %v4602_v25  ;;  %v3267_v43 = vpop.f32.mrb[31].mxu0 }
 0x223   : > { %v3405_v51 = vadd.f32 %v3404_v18, %v3374_v17  ;;  %v5258_v53 = vadd.f32 %v3267_v43, %v2044_v21  ;;  %v3336_v39 = vadd.f32 %v5255_v34, %v3335_v52 }
 0x224   : > { %3447 = vst [vmem:[%s7162_s13 + $0xf8] sm:$0xff] %v5257_v36  ;;  %v3377_v32 = vmul.f32 %v5257_v36, %v5257_v36 }
 0x225   : > { %v3337_v8 = vadd.f32 %v5258_v53, %v3336_v39  ;;  %v3376_v19 = vmul.f32 %v5258_v53, %v5258_v53  ;;  %v3406_v47 = vadd.f32 %v3405_v51, %v3375_v14  ;;  %3446 = vst [vmem:[%s7162_s13 + $0xf0] sm:$0xff] %v5258_v53 }
 0x227   : > { %v3338_v27 = vadd.f32 %v5257_v36, %v3337_v8  ;;  %v3407_v6 = vadd.f32 %v3406_v47, %v3376_v19 }
 0x229   : > { %v3339_v55 = vrot.slane %v3338_v27, 4  ;;  %v3408_v2 = vadd.f32 %v3407_v6, %v3377_v32 }
 0x22b   : > { %v3340_v1 = vadd.f32 %v3339_v55, %v3338_v27  ;;  %v3409_v24 = vrot.slane %v3408_v2, 4 }
 0x22d   : > { %v3341_v45 = vrot.slane %v3340_v1, 2  ;;  %v3410_v38 = vadd.f32 %v3409_v24, %v3408_v2 }
 0x22f   : > { %v3342_v54 = vadd.f32 %v3341_v45, %v3340_v1  ;;  %v3411_v59 = vrot.slane %v3410_v38, 2 }
 0x231   : > { %v3343_v48 = vrot.slane %v3342_v54, 1  ;;  %v3412_v50 = vadd.f32 %v3411_v59, %v3410_v38 }
 0x233   : > { %v3344_v20 = vadd.f32 %v3343_v48, %v3342_v54  ;;  %v3413_v9 = vrot.slane %v3412_v50, 1 }
 0x235   : > { %3345 = vst [vmem:[%s280_s17] sm:$0x1] %v3344_v20  ;;  %v3414_v3 = vadd.f32 %v3413_v9, %v3412_v50 }
 0x237   : > { %3415 = vst [vmem:[%s280_s17 + $0x1] sm:$0x1] %v3414_v3 }
 0x238 PF: > { %s16_s20 = sadd.s32 1, %s5533_s20   ;;  %s7462_s18 = smov %s5529_s19 }
 0x239   : > { %p13_p5 = scmp.ge.s32.totalorder %s16_s20, 4   ;;  %s7463_s19 = smov %s7465_s21 }
 0x23b   :  { %15 = sbr.rel (!%p13_p5) target bundleno = 2 (0x2), region = 89 }

</bundles_post_ra>
